<compile_context>
chip_gen: v5e
topology: v5e:2x2
jax: 0.10.0
libtpu: 0.0.40
codegen_flags: <defaults>
</compile_context>

<pallas_src>
import functools

import jax
import jax.numpy as jnp
from jax import lax
from jax.experimental import pallas as pl
from jax.experimental.pallas import tpu as pltpu


# ----------------------------- Pallas kernel --------------------------------
def _bottleneck_kernel(x_ref, w1_ref, w2_ref, w3_ref,
                       s1_ref, b1_ref, s2_ref, b2_ref, s3_ref, b3_ref,
                       out_ref, p2_ref, *, T, H, W, CIN, P, COUT, TK):
    M = T * H * W
    pad_t = (TK - 1) // 2
    cdt = x_ref.dtype                                   # bf16

    xv = x_ref[...]                                     # (T, H, W, CIN)

    # ---- conv1: fold the TK temporal taps into ONE K = TK*CIN matmul ----
    if pad_t > 0:
        zt = jnp.zeros((pad_t, H, W, CIN), cdt)
        xpad = jnp.concatenate([zt, xv, zt], axis=0)    # leading-axis concat (cheap)
    else:
        xpad = xv
    cols1 = [xpad[kt:kt + T].reshape(M, CIN) for kt in range(TK)]
    # lane concat of 128-wide pieces -> lane-aligned, no masked traffic
    patches1 = cols1[0] if TK == 1 else jnp.concatenate(cols1, axis=-1)
    acc1 = jnp.dot(patches1, w1_ref[...], preferred_element_type=jnp.float32)
    h1 = jnp.maximum(acc1 * s1_ref[...] + b1_ref[...], 0.0)        # f32 epilogue
    h1b = h1.astype(cdt).reshape(T, H, W, P)

    # ---- conv2: 3x3 im2col into a VMEM scratch, ONE K = 9*P matmul ----
    # For each tap (dy, dx) store the spatially shifted h1 into its lane block.
    # Only the small invalid halo rows/cols are zero-filled (not the whole scratch).
    for dy in range(3):
        for dx in range(3):
            sy, sx = dy - 1, dx - 1
            y0, y1 = max(0, -sy), H - max(0, sy)
            x0, x1 = max(0, -sx), W - max(0, sx)
            l0 = (dy * 3 + dx) * P
            lanes = slice(l0, l0 + P)
            p2_ref[:, y0:y1, x0:x1, lanes] = h1b[:, y0 + sy:y1 + sy,
                                                 x0 + sx:x1 + sx, :]
            if sy < 0:
                p2_ref[:, 0:y0, :, lanes] = jnp.zeros((T, y0, W, P), cdt)
            elif sy > 0:
                p2_ref[:, y1:H, :, lanes] = jnp.zeros((T, H - y1, W, P), cdt)
            if sx < 0:
                p2_ref[:, y0:y1, 0:x0, lanes] = jnp.zeros((T, y1 - y0, x0, P), cdt)
            elif sx > 0:
                p2_ref[:, y0:y1, x1:W, lanes] = jnp.zeros((T, y1 - y0, W - x1, P), cdt)

    patches2 = p2_ref[...].reshape(M, 9 * P)
    acc2 = jnp.dot(patches2, w2_ref[...], preferred_element_type=jnp.float32)
    h2 = jnp.maximum(acc2 * s2_ref[...] + b2_ref[...], 0.0)
    h2b = h2.astype(cdt)

    # ---- conv3 (1x1x1) + bn3 + residual + relu ----
    acc3 = jnp.dot(h2b, w3_ref[...], preferred_element_type=jnp.float32)
    h3 = acc3 * s3_ref[...] + b3_ref[...]
    res = xv.reshape(M, COUT).astype(jnp.float32)        # residual from the same tile
    out = jnp.maximum(h3 + res, 0.0)
    out_ref[...] = out.reshape(T, H, W, COUT).astype(out_ref.dtype)


# ------------------------------- wrapper -------------------------------------
def bottleneck_pallas(x, w1, w2, w3, s1, b1, s2, b2, s3, b3, *, tk):
    N, T, H, W, CIN = x.shape
    TK, CIN_w, P = w1.shape
    assert TK == tk and CIN_w == CIN
    COUT = w3.shape[-1]
    assert CIN == COUT, "identity residual requires inplanes == planes*4"

    cdt = jnp.bfloat16
    xb = x.astype(cdt)                                  # single activation input
    w1f = w1.reshape(TK * CIN, P).astype(cdt)           # rows: kt*CIN + cin
    w2f = w2.reshape(9 * P, P).astype(cdt)              # rows: (dy*3+dx)*P + cin
    w3f = w3.astype(cdt)                                # (P, COUT)
    s1f = s1.reshape(1, P).astype(jnp.float32)
    b1f = b1.reshape(1, P).astype(jnp.float32)
    s2f = s2.reshape(1, P).astype(jnp.float32)
    b2f = b2.reshape(1, P).astype(jnp.float32)
    s3f = s3.reshape(1, COUT).astype(jnp.float32)
    b3f = b3.reshape(1, COUT).astype(jnp.float32)

    def full_spec(a):
        return pl.BlockSpec(a.shape, lambda n, nd=a.ndim: (0,) * nd)

    kernel = functools.partial(_bottleneck_kernel, T=T, H=H, W=W,
                               CIN=CIN, P=P, COUT=COUT, TK=TK)

    return pl.pallas_call(
        kernel,
        out_shape=jax.ShapeDtypeStruct((N, T, H, W, COUT), jnp.float32),
        grid_spec=pltpu.PrefetchScalarGridSpec(
            num_scalar_prefetch=0,
            grid=(N,),
            in_specs=[
                pl.BlockSpec((None, T, H, W, CIN), lambda n: (n, 0, 0, 0, 0)),
                full_spec(w1f), full_spec(w2f), full_spec(w3f),
                full_spec(s1f), full_spec(b1f),
                full_spec(s2f), full_spec(b2f),
                full_spec(s3f), full_spec(b3f),
            ],
            out_specs=pl.BlockSpec((None, T, H, W, COUT),
                                   lambda n: (n, 0, 0, 0, 0)),
            scratch_shapes=[pltpu.VMEM((T, H, W, 9 * P), cdt)],   # conv2 im2col
        ),
        compiler_params=pltpu.CompilerParams(
            dimension_semantics=("parallel",)),
    )(xb, w1f, w2f, w3f, s1f, b1f, s2f, b2f, s3f, b3f)


# --------------------------- pure-JAX reference ------------------------------
def bottleneck_ref(x, w1, w2, w3, s1, b1, s2, b2, s3, b3, *, tk):
    """Mirrors the kernel's precision: bf16 operands, f32 accumulation, f32 epilogue."""
    CIN = x.shape[-1]
    P = w1.shape[-1]
    COUT = w3.shape[-1]
    pad_t = (tk - 1) // 2
    dn = ('NDHWC', 'DHWIO', 'NDHWC')
    cdt = jnp.bfloat16
    xb = x.astype(cdt)

    h = lax.conv_general_dilated(xb, w1.astype(cdt).reshape(tk, 1, 1, CIN, P),
                                 (1, 1, 1), ((pad_t, pad_t), (0, 0), (0, 0)),
                                 dimension_numbers=dn,
                                 preferred_element_type=jnp.float32)
    h = jnp.maximum(h * s1.reshape(1, 1, 1, 1, P) + b1.reshape(1, 1, 1, 1, P), 0.0)
    h = h.astype(cdt)

    h = lax.conv_general_dilated(h, w2.astype(cdt).reshape(1, 3, 3, P, P),
                                 (1, 1, 1), ((0, 0), (1, 1), (1, 1)),
                                 dimension_numbers=dn,
                                 preferred_element_type=jnp.float32)
    h = jnp.maximum(h * s2.reshape(1, 1, 1, 1, P) + b2.reshape(1, 1, 1, 1, P), 0.0)
    h = h.astype(cdt)

    h = lax.conv_general_dilated(h, w3.astype(cdt).reshape(1, 1, 1, P, COUT),
                                 (1, 1, 1), ((0, 0), (0, 0), (0, 0)),
                                 dimension_numbers=dn,
                                 preferred_element_type=jnp.float32)
    h = h * s3.reshape(1, 1, 1, 1, COUT) + b3.reshape(1, 1, 1, 1, COUT)
    return jnp.maximum(h + xb.astype(jnp.float32), 0.0)


# --------------------------------- main ---------------------------------------
if __name__ == "__main__":
    # Small shapes consistent with the module: inplanes = planes*4 (identity residual).
    # PLANES=32 -> INPLANES=COUT=128, keeping the in/out channel dims lane-dense.
    N, T, H, W = 2, 4, 8, 8
    PLANES = 32
    INPLANES = PLANES * 4          # 128, downsample=None (identity residual)
    TK = 3                         # time_kernel
    EPS = 1e-5

    key = jax.random.PRNGKey(0)
    ks = jax.random.split(key, 16)

    x = jax.random.normal(ks[0], (N, T, H, W, INPLANES), jnp.float32)

    # conv weights (deterministic, fan-in scaled)
    w1 = jax.random.normal(ks[1], (TK, INPLANES, PLANES), jnp.float32) / jnp.sqrt(TK * INPLANES)
    w2 = jax.random.normal(ks[2], (3, 3, PLANES, PLANES), jnp.float32) / jnp.sqrt(9 * PLANES)
    w3 = jax.random.normal(ks[3], (PLANES, 4 * PLANES), jnp.float32) / jnp.sqrt(PLANES)

    # BatchNorm params (eval mode), folded into per-channel scale/shift
    def bn_fold(kg, kb, km, kv, c):
        gamma = 1.0 + 0.1 * jax.random.normal(kg, (c,), jnp.float32)
        beta = 0.1 * jax.random.normal(kb, (c,), jnp.float32)
        mean = 0.1 * jax.random.normal(km, (c,), jnp.float32)
        var = 1.0 + 0.1 * jnp.abs(jax.random.normal(kv, (c,), jnp.float32))
        scale = gamma / jnp.sqrt(var + EPS)
        shift = beta - mean * scale
        return scale.reshape(1, c), shift.reshape(1, c)

    s1, b1 = bn_fold(ks[4], ks[5], ks[6], ks[7], PLANES)
    s2, b2 = bn_fold(ks[8], ks[9], ks[10], ks[11], PLANES)
    s3, b3 = bn_fold(ks[12], ks[13], ks[14], ks[15], 4 * PLANES)

    out = bottleneck_pallas(x, w1, w2, w3, s1, b1, s2, b2, s3, b3, tk=TK)
    out = jax.block_until_ready(out)

    ref = bottleneck_ref(x, w1, w2, w3, s1, b1, s2, b2, s3, b3, tk=TK)
    max_err = float(jnp.max(jnp.abs(out - ref)))
    # bf16 operands + differing MXU accumulation order -> allow a bf16-scale tolerance
    assert max_err < 2e-2, f"mismatch vs reference: {max_err}"

    print("KERNEL_OK")
</pallas_src>

<mosaic_0001>
module attributes {stable_mosaic.version = 11 : i64} {
  func.func @_bottleneck_kernel(%arg0: i32, %arg1: memref<1x4x8x8x128xbf16, #tpu.memory_space<vmem>>, %arg2: memref<384x32xbf16, #tpu.memory_space<vmem>>, %arg3: memref<288x32xbf16, #tpu.memory_space<vmem>>, %arg4: memref<32x128xbf16, #tpu.memory_space<vmem>>, %arg5: memref<1x32xf32, #tpu.memory_space<vmem>>, %arg6: memref<1x32xf32, #tpu.memory_space<vmem>>, %arg7: memref<1x32xf32, #tpu.memory_space<vmem>>, %arg8: memref<1x32xf32, #tpu.memory_space<vmem>>, %arg9: memref<1x128xf32, #tpu.memory_space<vmem>>, %arg10: memref<1x128xf32, #tpu.memory_space<vmem>>, %arg11: memref<1x4x8x8x128xf32, #tpu.memory_space<vmem>>, %arg12: memref<4x8x8x288xbf16, #tpu.memory_space<vmem>>) attributes {dimension_semantics = [#tpu.dimension_semantics<parallel>], iteration_bounds = array<i64: 2>, scalar_prefetch = 0 : i64, scratch_operands = 1 : i64, tpu.core_type = #tpu.core_type<tc>, window_params = [{transform_indices = @transform_0, window_bounds = array<i64: 1, 4, 8, 8, 128>}, {pipeline_mode = #tpu.pipeline_mode<synchronous>, transform_indices = @transform_1, window_bounds = array<i64: 384, 32>}, {pipeline_mode = #tpu.pipeline_mode<synchronous>, transform_indices = @transform_2, window_bounds = array<i64: 288, 32>}, {pipeline_mode = #tpu.pipeline_mode<synchronous>, transform_indices = @transform_3, window_bounds = array<i64: 32, 128>}, {pipeline_mode = #tpu.pipeline_mode<synchronous>, transform_indices = @transform_4, window_bounds = array<i64: 1, 32>}, {pipeline_mode = #tpu.pipeline_mode<synchronous>, transform_indices = @transform_5, window_bounds = array<i64: 1, 32>}, {pipeline_mode = #tpu.pipeline_mode<synchronous>, transform_indices = @transform_6, window_bounds = array<i64: 1, 32>}, {pipeline_mode = #tpu.pipeline_mode<synchronous>, transform_indices = @transform_7, window_bounds = array<i64: 1, 32>}, {pipeline_mode = #tpu.pipeline_mode<synchronous>, transform_indices = @transform_8, window_bounds = array<i64: 1, 128>}, {pipeline_mode = #tpu.pipeline_mode<synchronous>, transform_indices = @transform_9, window_bounds = array<i64: 1, 128>}, {transform_indices = @transform_10, window_bounds = array<i64: 1, 4, 8, 8, 128>}]} {
    %c0 = arith.constant 0 : index
    %c0_0 = arith.constant 0 : index
    %c0_1 = arith.constant 0 : index
    %c0_2 = arith.constant 0 : index
    %c0_3 = arith.constant 0 : index
    %0 = vector.load %arg1[%c0, %c0_0, %c0_1, %c0_2, %c0_3] : memref<1x4x8x8x128xbf16, #tpu.memory_space<vmem>>, vector<1x4x8x8x128xbf16>
    %1 = vector.shape_cast %0 : vector<1x4x8x8x128xbf16> to vector<4x8x8x128xbf16>
    %cst = arith.constant 0.000000e+00 : bf16
    %2 = vector.broadcast %cst : bf16 to vector<1x8x8x128xbf16>
    %3 = tpu.concatenate %2, %1, %2 in 0 : vector<1x8x8x128xbf16>, vector<4x8x8x128xbf16>, vector<1x8x8x128xbf16> -> vector<6x8x8x128xbf16>
    %4 = vector.extract_strided_slice %3 {offsets = [0, 0, 0, 0], sizes = [4, 8, 8, 128], strides = [1, 1, 1, 1]} : vector<6x8x8x128xbf16> to vector<4x8x8x128xbf16>
    %5 = vector.shape_cast %4 : vector<4x8x8x128xbf16> to vector<256x128xbf16>
    %6 = vector.extract_strided_slice %3 {offsets = [1, 0, 0, 0], sizes = [4, 8, 8, 128], strides = [1, 1, 1, 1]} : vector<6x8x8x128xbf16> to vector<4x8x8x128xbf16>
    %7 = vector.shape_cast %6 : vector<4x8x8x128xbf16> to vector<256x128xbf16>
    %8 = vector.extract_strided_slice %3 {offsets = [2, 0, 0, 0], sizes = [4, 8, 8, 128], strides = [1, 1, 1, 1]} : vector<6x8x8x128xbf16> to vector<4x8x8x128xbf16>
    %9 = vector.shape_cast %8 : vector<4x8x8x128xbf16> to vector<256x128xbf16>
    %10 = tpu.concatenate %5, %7, %9 in 1 : vector<256x128xbf16>, vector<256x128xbf16>, vector<256x128xbf16> -> vector<256x384xbf16>
    %c0_4 = arith.constant 0 : index
    %c0_5 = arith.constant 0 : index
    %11 = vector.load %arg2[%c0_4, %c0_5] : memref<384x32xbf16, #tpu.memory_space<vmem>>, vector<384x32xbf16>
    %cst_6 = arith.constant dense<0.000000e+00> : vector<256x32xf32>
    %12 = tpu.matmul %10, %11, %cst_6 {dimension_numbers = #tpu.dot_dimension_numbers<[1], [0], [0], [1], [0, 0, 1, 1], [], []>} : vector<256x384xbf16>, vector<384x32xbf16>, vector<256x32xf32> -> vector<256x32xf32>
    %c0_7 = arith.constant 0 : index
    %c0_8 = arith.constant 0 : index
    %13 = vector.load %arg5[%c0_7, %c0_8] : memref<1x32xf32, #tpu.memory_space<vmem>>, vector<1x32xf32>
    %14 = vector.broadcast %13 : vector<1x32xf32> to vector<256x32xf32>
    %15 = arith.mulf %12, %14 : vector<256x32xf32>
    %c0_9 = arith.constant 0 : index
    %c0_10 = arith.constant 0 : index
    %16 = vector.load %arg6[%c0_9, %c0_10] : memref<1x32xf32, #tpu.memory_space<vmem>>, vector<1x32xf32>
    %17 = vector.broadcast %16 : vector<1x32xf32> to vector<256x32xf32>
    %18 = arith.addf %15, %17 : vector<256x32xf32>
    %cst_11 = arith.constant 0.000000e+00 : f32
    %19 = vector.broadcast %cst_11 : f32 to vector<256x32xf32>
    %20 = arith.maximumf %18, %19 : vector<256x32xf32>
    %21 = arith.truncf %20 : vector<256x32xf32> to vector<256x32xbf16>
    %22 = vector.shape_cast %21 : vector<256x32xbf16> to vector<4x8x8x32xbf16>
    %23 = vector.extract_strided_slice %22 {offsets = [0, 0, 0, 0], sizes = [4, 7, 7, 32], strides = [1, 1, 1, 1]} : vector<4x8x8x32xbf16> to vector<4x7x7x32xbf16>
    %c0_12 = arith.constant 0 : index
    %c1 = arith.constant 1 : index
    %c1_13 = arith.constant 1 : index
    %c0_14 = arith.constant 0 : index
    %24 = vector.load %arg12[%c0_12, %c1, %c1_13, %c0_14] : memref<4x8x8x288xbf16, #tpu.memory_space<vmem>>, vector<4x7x7x32xbf16>
    tpu.vector_store %arg12[%c0_12, %c1, %c1_13, %c0_14], %23 {strides = array<i32>} : memref<4x8x8x288xbf16, #tpu.memory_space<vmem>>, vector<4x7x7x32xbf16>,
    %cst_15 = arith.constant 0.000000e+00 : bf16
    %25 = vector.broadcast %cst_15 : bf16 to vector<4x1x8x32xbf16>
    %c0_16 = arith.constant 0 : index
    %c0_17 = arith.constant 0 : index
    %c0_18 = arith.constant 0 : index
    %c0_19 = arith.constant 0 : index
    %26 = vector.load %arg12[%c0_16, %c0_17, %c0_18, %c0_19] : memref<4x8x8x288xbf16, #tpu.memory_space<vmem>>, vector<4x1x8x32xbf16>
    tpu.vector_store %arg12[%c0_16, %c0_17, %c0_18, %c0_19], %25 {strides = array<i32>} : memref<4x8x8x288xbf16, #tpu.memory_space<vmem>>, vector<4x1x8x32xbf16>,
    %cst_20 = arith.constant 0.000000e+00 : bf16
    %27 = vector.broadcast %cst_20 : bf16 to vector<4x7x1x32xbf16>
    %c0_21 = arith.constant 0 : index
    %c1_22 = arith.constant 1 : index
    %c0_23 = arith.constant 0 : index
    %c0_24 = arith.constant 0 : index
    %28 = vector.load %arg12[%c0_21, %c1_22, %c0_23, %c0_24] : memref<4x8x8x288xbf16, #tpu.memory_space<vmem>>, vector<4x7x1x32xbf16>
    tpu.vector_store %arg12[%c0_21, %c1_22, %c0_23, %c0_24], %27 {strides = array<i32>} : memref<4x8x8x288xbf16, #tpu.memory_space<vmem>>, vector<4x7x1x32xbf16>,
    %29 = vector.extract_strided_slice %22 {offsets = [0, 0, 0, 0], sizes = [4, 7, 8, 32], strides = [1, 1, 1, 1]} : vector<4x8x8x32xbf16> to vector<4x7x8x32xbf16>
    %c0_25 = arith.constant 0 : index
    %c1_26 = arith.constant 1 : index
    %c0_27 = arith.constant 0 : index
    %c32 = arith.constant 32 : index
    %30 = vector.load %arg12[%c0_25, %c1_26, %c0_27, %c32] : memref<4x8x8x288xbf16, #tpu.memory_space<vmem>>, vector<4x7x8x32xbf16>
    tpu.vector_store %arg12[%c0_25, %c1_26, %c0_27, %c32], %29 {strides = array<i32>} : memref<4x8x8x288xbf16, #tpu.memory_space<vmem>>, vector<4x7x8x32xbf16>,
    %cst_28 = arith.constant 0.000000e+00 : bf16
    %31 = vector.broadcast %cst_28 : bf16 to vector<4x1x8x32xbf16>
    %c0_29 = arith.constant 0 : index
    %c0_30 = arith.constant 0 : index
    %c0_31 = arith.constant 0 : index
    %c32_32 = arith.constant 32 : index
    %32 = vector.load %arg12[%c0_29, %c0_30, %c0_31, %c32_32] : memref<4x8x8x288xbf16, #tpu.memory_space<vmem>>, vector<4x1x8x32xbf16>
    tpu.vector_store %arg12[%c0_29, %c0_30, %c0_31, %c32_32], %31 {strides = array<i32>} : memref<4x8x8x288xbf16, #tpu.memory_space<vmem>>, vector<4x1x8x32xbf16>,
    %33 = vector.extract_strided_slice %22 {offsets = [0, 0, 1, 0], sizes = [4, 7, 7, 32], strides = [1, 1, 1, 1]} : vector<4x8x8x32xbf16> to vector<4x7x7x32xbf16>
    %c0_33 = arith.constant 0 : index
    %c1_34 = arith.constant 1 : index
    %c0_35 = arith.constant 0 : index
    %c64 = arith.constant 64 : index
    %34 = vector.load %arg12[%c0_33, %c1_34, %c0_35, %c64] : memref<4x8x8x288xbf16, #tpu.memory_space<vmem>>, vector<4x7x7x32xbf16>
    tpu.vector_store %arg12[%c0_33, %c1_34, %c0_35, %c64], %33 {strides = array<i32>} : memref<4x8x8x288xbf16, #tpu.memory_space<vmem>>, vector<4x7x7x32xbf16>,
    %cst_36 = arith.constant 0.000000e+00 : bf16
    %35 = vector.broadcast %cst_36 : bf16 to vector<4x1x8x32xbf16>
    %c0_37 = arith.constant 0 : index
    %c0_38 = arith.constant 0 : index
    %c0_39 = arith.constant 0 : index
    %c64_40 = arith.constant 64 : index
    %36 = vector.load %arg12[%c0_37, %c0_38, %c0_39, %c64_40] : memref<4x8x8x288xbf16, #tpu.memory_space<vmem>>, vector<4x1x8x32xbf16>
    tpu.vector_store %arg12[%c0_37, %c0_38, %c0_39, %c64_40], %35 {strides = array<i32>} : memref<4x8x8x288xbf16, #tpu.memory_space<vmem>>, vector<4x1x8x32xbf16>,
    %cst_41 = arith.constant 0.000000e+00 : bf16
    %37 = vector.broadcast %cst_41 : bf16 to vector<4x7x1x32xbf16>
    %c0_42 = arith.constant 0 : index
    %c1_43 = arith.constant 1 : index
    %c7 = arith.constant 7 : index
    %c64_44 = arith.constant 64 : index
    %38 = vector.load %arg12[%c0_42, %c1_43, %c7, %c64_44] : memref<4x8x8x288xbf16, #tpu.memory_space<vmem>>, vector<4x7x1x32xbf16>
    tpu.vector_store %arg12[%c0_42, %c1_43, %c7, %c64_44], %37 {strides = array<i32>} : memref<4x8x8x288xbf16, #tpu.memory_space<vmem>>, vector<4x7x1x32xbf16>,
    %39 = vector.extract_strided_slice %22 {offsets = [0, 0, 0, 0], sizes = [4, 8, 7, 32], strides = [1, 1, 1, 1]} : vector<4x8x8x32xbf16> to vector<4x8x7x32xbf16>
    %c0_45 = arith.constant 0 : index
    %c0_46 = arith.constant 0 : index
    %c1_47 = arith.constant 1 : index
    %c96 = arith.constant 96 : index
    %40 = vector.load %arg12[%c0_45, %c0_46, %c1_47, %c96] : memref<4x8x8x288xbf16, #tpu.memory_space<vmem>>, vector<4x8x7x32xbf16>
    tpu.vector_store %arg12[%c0_45, %c0_46, %c1_47, %c96], %39 {strides = array<i32>} : memref<4x8x8x288xbf16, #tpu.memory_space<vmem>>, vector<4x8x7x32xbf16>,
    %cst_48 = arith.constant 0.000000e+00 : bf16
    %41 = vector.broadcast %cst_48 : bf16 to vector<4x8x1x32xbf16>
    %c0_49 = arith.constant 0 : index
    %c0_50 = arith.constant 0 : index
    %c0_51 = arith.constant 0 : index
    %c96_52 = arith.constant 96 : index
    %42 = vector.load %arg12[%c0_49, %c0_50, %c0_51, %c96_52] : memref<4x8x8x288xbf16, #tpu.memory_space<vmem>>, vector<4x8x1x32xbf16>
    tpu.vector_store %arg12[%c0_49, %c0_50, %c0_51, %c96_52], %41 {strides = array<i32>} : memref<4x8x8x288xbf16, #tpu.memory_space<vmem>>, vector<4x8x1x32xbf16>,
    %c0_53 = arith.constant 0 : index
    %c0_54 = arith.constant 0 : index
    %c0_55 = arith.constant 0 : index
    %c128 = arith.constant 128 : index
    %43 = vector.load %arg12[%c0_53, %c0_54, %c0_55, %c128] : memref<4x8x8x288xbf16, #tpu.memory_space<vmem>>, vector<4x8x8x32xbf16>
    tpu.vector_store %arg12[%c0_53, %c0_54, %c0_55, %c128], %22 {strides = array<i32>} : memref<4x8x8x288xbf16, #tpu.memory_space<vmem>>, vector<4x8x8x32xbf16>,
    %44 = vector.extract_strided_slice %22 {offsets = [0, 0, 1, 0], sizes = [4, 8, 7, 32], strides = [1, 1, 1, 1]} : vector<4x8x8x32xbf16> to vector<4x8x7x32xbf16>
    %c0_56 = arith.constant 0 : index
    %c0_57 = arith.constant 0 : index
    %c0_58 = arith.constant 0 : index
    %c160 = arith.constant 160 : index
    %45 = vector.load %arg12[%c0_56, %c0_57, %c0_58, %c160] : memref<4x8x8x288xbf16, #tpu.memory_space<vmem>>, vector<4x8x7x32xbf16>
    tpu.vector_store %arg12[%c0_56, %c0_57, %c0_58, %c160], %44 {strides = array<i32>} : memref<4x8x8x288xbf16, #tpu.memory_space<vmem>>, vector<4x8x7x32xbf16>,
    %cst_59 = arith.constant 0.000000e+00 : bf16
    %46 = vector.broadcast %cst_59 : bf16 to vector<4x8x1x32xbf16>
    %c0_60 = arith.constant 0 : index
    %c0_61 = arith.constant 0 : index
    %c7_62 = arith.constant 7 : index
    %c160_63 = arith.constant 160 : index
    %47 = vector.load %arg12[%c0_60, %c0_61, %c7_62, %c160_63] : memref<4x8x8x288xbf16, #tpu.memory_space<vmem>>, vector<4x8x1x32xbf16>
    tpu.vector_store %arg12[%c0_60, %c0_61, %c7_62, %c160_63], %46 {strides = array<i32>} : memref<4x8x8x288xbf16, #tpu.memory_space<vmem>>, vector<4x8x1x32xbf16>,
    %48 = vector.extract_strided_slice %22 {offsets = [0, 1, 0, 0], sizes = [4, 7, 7, 32], strides = [1, 1, 1, 1]} : vector<4x8x8x32xbf16> to vector<4x7x7x32xbf16>
    %c0_64 = arith.constant 0 : index
    %c0_65 = arith.constant 0 : index
    %c1_66 = arith.constant 1 : index
    %c192 = arith.constant 192 : index
    %49 = vector.load %arg12[%c0_64, %c0_65, %c1_66, %c192] : memref<4x8x8x288xbf16, #tpu.memory_space<vmem>>, vector<4x7x7x32xbf16>
    tpu.vector_store %arg12[%c0_64, %c0_65, %c1_66, %c192], %48 {strides = array<i32>} : memref<4x8x8x288xbf16, #tpu.memory_space<vmem>>, vector<4x7x7x32xbf16>,
    %cst_67 = arith.constant 0.000000e+00 : bf16
    %50 = vector.broadcast %cst_67 : bf16 to vector<4x1x8x32xbf16>
    %c0_68 = arith.constant 0 : index
    %c7_69 = arith.constant 7 : index
    %c0_70 = arith.constant 0 : index
    %c192_71 = arith.constant 192 : index
    %51 = vector.load %arg12[%c0_68, %c7_69, %c0_70, %c192_71] : memref<4x8x8x288xbf16, #tpu.memory_space<vmem>>, vector<4x1x8x32xbf16>
    tpu.vector_store %arg12[%c0_68, %c7_69, %c0_70, %c192_71], %50 {strides = array<i32>} : memref<4x8x8x288xbf16, #tpu.memory_space<vmem>>, vector<4x1x8x32xbf16>,
    %cst_72 = arith.constant 0.000000e+00 : bf16
    %52 = vector.broadcast %cst_72 : bf16 to vector<4x7x1x32xbf16>
    %c0_73 = arith.constant 0 : index
    %c0_74 = arith.constant 0 : index
    %c0_75 = arith.constant 0 : index
    %c192_76 = arith.constant 192 : index
    %53 = vector.load %arg12[%c0_73, %c0_74, %c0_75, %c192_76] : memref<4x8x8x288xbf16, #tpu.memory_space<vmem>>, vector<4x7x1x32xbf16>
    tpu.vector_store %arg12[%c0_73, %c0_74, %c0_75, %c192_76], %52 {strides = array<i32>} : memref<4x8x8x288xbf16, #tpu.memory_space<vmem>>, vector<4x7x1x32xbf16>,
    %54 = vector.extract_strided_slice %22 {offsets = [0, 1, 0, 0], sizes = [4, 7, 8, 32], strides = [1, 1, 1, 1]} : vector<4x8x8x32xbf16> to vector<4x7x8x32xbf16>
    %c0_77 = arith.constant 0 : index
    %c0_78 = arith.constant 0 : index
    %c0_79 = arith.constant 0 : index
    %c224 = arith.constant 224 : index
    %55 = vector.load %arg12[%c0_77, %c0_78, %c0_79, %c224] : memref<4x8x8x288xbf16, #tpu.memory_space<vmem>>, vector<4x7x8x32xbf16>
    tpu.vector_store %arg12[%c0_77, %c0_78, %c0_79, %c224], %54 {strides = array<i32>} : memref<4x8x8x288xbf16, #tpu.memory_space<vmem>>, vector<4x7x8x32xbf16>,
    %cst_80 = arith.constant 0.000000e+00 : bf16
    %56 = vector.broadcast %cst_80 : bf16 to vector<4x1x8x32xbf16>
    %c0_81 = arith.constant 0 : index
    %c7_82 = arith.constant 7 : index
    %c0_83 = arith.constant 0 : index
    %c224_84 = arith.constant 224 : index
    %57 = vector.load %arg12[%c0_81, %c7_82, %c0_83, %c224_84] : memref<4x8x8x288xbf16, #tpu.memory_space<vmem>>, vector<4x1x8x32xbf16>
    tpu.vector_store %arg12[%c0_81, %c7_82, %c0_83, %c224_84], %56 {strides = array<i32>} : memref<4x8x8x288xbf16, #tpu.memory_space<vmem>>, vector<4x1x8x32xbf16>,
    %58 = vector.extract_strided_slice %22 {offsets = [0, 1, 1, 0], sizes = [4, 7, 7, 32], strides = [1, 1, 1, 1]} : vector<4x8x8x32xbf16> to vector<4x7x7x32xbf16>
    %c0_85 = arith.constant 0 : index
    %c0_86 = arith.constant 0 : index
    %c0_87 = arith.constant 0 : index
    %c256 = arith.constant 256 : index
    %59 = vector.load %arg12[%c0_85, %c0_86, %c0_87, %c256] : memref<4x8x8x288xbf16, #tpu.memory_space<vmem>>, vector<4x7x7x32xbf16>
    tpu.vector_store %arg12[%c0_85, %c0_86, %c0_87, %c256], %58 {strides = array<i32>} : memref<4x8x8x288xbf16, #tpu.memory_space<vmem>>, vector<4x7x7x32xbf16>,
    %cst_88 = arith.constant 0.000000e+00 : bf16
    %60 = vector.broadcast %cst_88 : bf16 to vector<4x1x8x32xbf16>
    %c0_89 = arith.constant 0 : index
    %c7_90 = arith.constant 7 : index
    %c0_91 = arith.constant 0 : index
    %c256_92 = arith.constant 256 : index
    %61 = vector.load %arg12[%c0_89, %c7_90, %c0_91, %c256_92] : memref<4x8x8x288xbf16, #tpu.memory_space<vmem>>, vector<4x1x8x32xbf16>
    tpu.vector_store %arg12[%c0_89, %c7_90, %c0_91, %c256_92], %60 {strides = array<i32>} : memref<4x8x8x288xbf16, #tpu.memory_space<vmem>>, vector<4x1x8x32xbf16>,
    %cst_93 = arith.constant 0.000000e+00 : bf16
    %62 = vector.broadcast %cst_93 : bf16 to vector<4x7x1x32xbf16>
    %c0_94 = arith.constant 0 : index
    %c0_95 = arith.constant 0 : index
    %c7_96 = arith.constant 7 : index
    %c256_97 = arith.constant 256 : index
    %63 = vector.load %arg12[%c0_94, %c0_95, %c7_96, %c256_97] : memref<4x8x8x288xbf16, #tpu.memory_space<vmem>>, vector<4x7x1x32xbf16>
    tpu.vector_store %arg12[%c0_94, %c0_95, %c7_96, %c256_97], %62 {strides = array<i32>} : memref<4x8x8x288xbf16, #tpu.memory_space<vmem>>, vector<4x7x1x32xbf16>,
    %c0_98 = arith.constant 0 : index
    %c0_99 = arith.constant 0 : index
    %c0_100 = arith.constant 0 : index
    %c0_101 = arith.constant 0 : index
    %64 = vector.load %arg12[%c0_98, %c0_99, %c0_100, %c0_101] : memref<4x8x8x288xbf16, #tpu.memory_space<vmem>>, vector<4x8x8x288xbf16>
    %65 = vector.shape_cast %64 : vector<4x8x8x288xbf16> to vector<256x288xbf16>
    %c0_102 = arith.constant 0 : index
    %c0_103 = arith.constant 0 : index
    %66 = vector.load %arg3[%c0_102, %c0_103] : memref<288x32xbf16, #tpu.memory_space<vmem>>, vector<288x32xbf16>
    %cst_104 = arith.constant dense<0.000000e+00> : vector<256x32xf32>
    %67 = tpu.matmul %65, %66, %cst_104 {dimension_numbers = #tpu.dot_dimension_numbers<[1], [0], [0], [1], [0, 0, 1, 1], [], []>} : vector<256x288xbf16>, vector<288x32xbf16>, vector<256x32xf32> -> vector<256x32xf32>
    %c0_105 = arith.constant 0 : index
    %c0_106 = arith.constant 0 : index
    %68 = vector.load %arg7[%c0_105, %c0_106] : memref<1x32xf32, #tpu.memory_space<vmem>>, vector<1x32xf32>
    %69 = vector.broadcast %68 : vector<1x32xf32> to vector<256x32xf32>
    %70 = arith.mulf %67, %69 : vector<256x32xf32>
    %c0_107 = arith.constant 0 : index
    %c0_108 = arith.constant 0 : index
    %71 = vector.load %arg8[%c0_107, %c0_108] : memref<1x32xf32, #tpu.memory_space<vmem>>, vector<1x32xf32>
    %72 = vector.broadcast %71 : vector<1x32xf32> to vector<256x32xf32>
    %73 = arith.addf %70, %72 : vector<256x32xf32>
    %cst_109 = arith.constant 0.000000e+00 : f32
    %74 = vector.broadcast %cst_109 : f32 to vector<256x32xf32>
    %75 = arith.maximumf %73, %74 : vector<256x32xf32>
    %76 = arith.truncf %75 : vector<256x32xf32> to vector<256x32xbf16>
    %c0_110 = arith.constant 0 : index
    %c0_111 = arith.constant 0 : index
    %77 = vector.load %arg4[%c0_110, %c0_111] : memref<32x128xbf16, #tpu.memory_space<vmem>>, vector<32x128xbf16>
    %cst_112 = arith.constant dense<0.000000e+00> : vector<256x128xf32>
    %78 = tpu.matmul %76, %77, %cst_112 {dimension_numbers = #tpu.dot_dimension_numbers<[1], [0], [0], [1], [0, 0, 1, 1], [], []>} : vector<256x32xbf16>, vector<32x128xbf16>, vector<256x128xf32> -> vector<256x128xf32>
    %c0_113 = arith.constant 0 : index
    %c0_114 = arith.constant 0 : index
    %79 = vector.load %arg9[%c0_113, %c0_114] : memref<1x128xf32, #tpu.memory_space<vmem>>, vector<1x128xf32>
    %80 = vector.broadcast %79 : vector<1x128xf32> to vector<256x128xf32>
    %81 = arith.mulf %78, %80 : vector<256x128xf32>
    %c0_115 = arith.constant 0 : index
    %c0_116 = arith.constant 0 : index
    %82 = vector.load %arg10[%c0_115, %c0_116] : memref<1x128xf32, #tpu.memory_space<vmem>>, vector<1x128xf32>
    %83 = vector.broadcast %82 : vector<1x128xf32> to vector<256x128xf32>
    %84 = arith.addf %81, %83 : vector<256x128xf32>
    %85 = vector.shape_cast %1 : vector<4x8x8x128xbf16> to vector<256x128xbf16>
    %86 = arith.extf %85 : vector<256x128xbf16> to vector<256x128xf32>
    %87 = arith.addf %84, %86 : vector<256x128xf32>
    %cst_117 = arith.constant 0.000000e+00 : f32
    %88 = vector.broadcast %cst_117 : f32 to vector<256x128xf32>
    %89 = arith.maximumf %87, %88 : vector<256x128xf32>
    %90 = vector.shape_cast %89 : vector<256x128xf32> to vector<4x8x8x128xf32>
    %c0_118 = arith.constant 0 : index
    %c0_119 = arith.constant 0 : index
    %c0_120 = arith.constant 0 : index
    %c0_121 = arith.constant 0 : index
    %c0_122 = arith.constant 0 : index
    %91 = vector.load %arg11[%c0_118, %c0_119, %c0_120, %c0_121, %c0_122] : memref<1x4x8x8x128xf32, #tpu.memory_space<vmem>>, vector<1x4x8x8x128xf32>
    %92 = vector.shape_cast %91 : vector<1x4x8x8x128xf32> to vector<4x8x8x128xf32>
    %93 = vector.shape_cast %90 : vector<4x8x8x128xf32> to vector<1x4x8x8x128xf32>
    tpu.vector_store %arg11[%c0_118, %c0_119, %c0_120, %c0_121, %c0_122], %93 {strides = array<i32>} : memref<1x4x8x8x128xf32, #tpu.memory_space<vmem>>, vector<1x4x8x8x128xf32>,
    return
  }
  func.func @transform_0(%arg0: i32) -> (i32, i32, i32, i32, i32) {
    %c0_i32 = arith.constant 0 : i32
    %c0_i32_0 = arith.constant 0 : i32
    %c0_i32_1 = arith.constant 0 : i32
    %c0_i32_2 = arith.constant 0 : i32
    %c0_i32_3 = arith.constant 0 : i32
    return %arg0, %c0_i32, %c0_i32_0, %c0_i32_1, %c0_i32_2 : i32, i32, i32, i32, i32
  }
  func.func @transform_1(%arg0: i32) -> (i32, i32) {
    %c0_i32 = arith.constant 0 : i32
    %c0_i32_0 = arith.constant 0 : i32
    %c0_i32_1 = arith.constant 0 : i32
    return %c0_i32, %c0_i32_0 : i32, i32
  }
  func.func @transform_2(%arg0: i32) -> (i32, i32) {
    %c0_i32 = arith.constant 0 : i32
    %c0_i32_0 = arith.constant 0 : i32
    %c0_i32_1 = arith.constant 0 : i32
    return %c0_i32, %c0_i32_0 : i32, i32
  }
  func.func @transform_3(%arg0: i32) -> (i32, i32) {
    %c0_i32 = arith.constant 0 : i32
    %c0_i32_0 = arith.constant 0 : i32
    %c0_i32_1 = arith.constant 0 : i32
    return %c0_i32, %c0_i32_0 : i32, i32
  }
  func.func @transform_4(%arg0: i32) -> (i32, i32) {
    %c0_i32 = arith.constant 0 : i32
    %c0_i32_0 = arith.constant 0 : i32
    %c0_i32_1 = arith.constant 0 : i32
    return %c0_i32, %c0_i32_0 : i32, i32
  }
  func.func @transform_5(%arg0: i32) -> (i32, i32) {
    %c0_i32 = arith.constant 0 : i32
    %c0_i32_0 = arith.constant 0 : i32
    %c0_i32_1 = arith.constant 0 : i32
    return %c0_i32, %c0_i32_0 : i32, i32
  }
  func.func @transform_6(%arg0: i32) -> (i32, i32) {
    %c0_i32 = arith.constant 0 : i32
    %c0_i32_0 = arith.constant 0 : i32
    %c0_i32_1 = arith.constant 0 : i32
    return %c0_i32, %c0_i32_0 : i32, i32
  }
  func.func @transform_7(%arg0: i32) -> (i32, i32) {
    %c0_i32 = arith.constant 0 : i32
    %c0_i32_0 = arith.constant 0 : i32
    %c0_i32_1 = arith.constant 0 : i32
    return %c0_i32, %c0_i32_0 : i32, i32
  }
  func.func @transform_8(%arg0: i32) -> (i32, i32) {
    %c0_i32 = arith.constant 0 : i32
    %c0_i32_0 = arith.constant 0 : i32
    %c0_i32_1 = arith.constant 0 : i32
    return %c0_i32, %c0_i32_0 : i32, i32
  }
  func.func @transform_9(%arg0: i32) -> (i32, i32) {
    %c0_i32 = arith.constant 0 : i32
    %c0_i32_0 = arith.constant 0 : i32
    %c0_i32_1 = arith.constant 0 : i32
    return %c0_i32, %c0_i32_0 : i32, i32
  }
  func.func @transform_10(%arg0: i32) -> (i32, i32, i32, i32, i32) {
    %c0_i32 = arith.constant 0 : i32
    %c0_i32_0 = arith.constant 0 : i32
    %c0_i32_1 = arith.constant 0 : i32
    %c0_i32_2 = arith.constant 0 : i32
    %c0_i32_3 = arith.constant 0 : i32
    return %arg0, %c0_i32, %c0_i32_0, %c0_i32_1, %c0_i32_2 : i32, i32, i32, i32, i32
  }
}

</mosaic_0001>

<bundles_post_ra>
// kernel: tpu_custom_call.1
= control target key start
LH: loop header
LB: loop body
LE: loop exit
PB: predicated region body
PF: predicated region fallthrough
CT: control target
= control target key end

     0   :  { %15 = vsyncpa [#allocation4], 0  ;;  %s8058_s0 = inlined_call_operand.vmem [shape: bf16[2,4,8,8,128], index: 0, kind: input, shape index: {}]   ;;  %s8059_s1 = inlined_call_operand.vmem [shape: bf16[384,32], index: 1, kind: input, shape index: {}]   ;;  %s8060_s2 = inlined_call_operand.vmem [shape: bf16[288,32], index: 2, kind: input, shape index: {}]   ;;  %s8061_s3 = inlined_call_operand.vmem [shape: bf16[32,128], index: 3, kind: input, shape index: {}]   ;;  %s8062_s4 = inlined_call_operand.vmem [shape: f32[1,32], index: 4, kind: input, shape index: {}]   ;;  %s8063_s5 = inlined_call_operand.vmem [shape: f32[1,32], index: 5, kind: input, shape index: {}]   ;;  %s8064_s6 = inlined_call_operand.vmem [shape: f32[1,32], index: 6, kind: input, shape index: {}]   ;;  %s8065_s7 = inlined_call_operand.vmem [shape: f32[1,32], index: 7, kind: input, shape index: {}]   ;;  %s8066_s8 = inlined_call_operand.vmem [shape: f32[1,128], index: 8, kind: input, shape index: {}]   ;;  %s8067_s9 = inlined_call_operand.vmem [shape: f32[1,128], index: 9, kind: input, shape index: {}]   ;;  %s8068_s10 = inlined_call_operand.hbm [shape: f32[2,4,8,8,128], index: 10, kind: output, shape index: {}]  }
   0x1   :  { %17 = vsyncpa [#allocation4 + $0x1], 0  ;;  %s5363_s13 = smov 0   ;;  %s5365_s14 = smov 0  }
   0x2   :  { %s5367_s15 = smov 0   ;;  %s5369_s16 = smov 0  }
   0x3 LB: > { %s5384_s17 = sadd.s32 4294967295, %s5300_s16   ;;  %s4569_s18 = sadd.s32 4294967294, %s5300_s16   ;;  %s5300_s16 = sphi %s5369_s16, %s8289_s16   ;;  %s5296_s15 = sphi %s5367_s15, %s8288_s15   ;;  %s5292_s14 = sphi %s5365_s14, %s8287_s14   ;;  %s5288_s13 = sphi %s5363_s13, %s8286_s13  }
   0x4   : > { %s5388_s19 = sadd.s32 1, %s5300_s16   ;;  %s245_s20 = sadd.s32 1, %s5296_s15 }
   0x5   : > { %s242_s21 = ssub.s32 %s5300_s16, %s5388_s19  ;;  %p255_p0 = scmp.ne.s32.totalorder %s5296_s15, %s5292_s14 }
   0x6   : > { %p243_p1 = scmp.eq.s32.totalorder %s242_s21, 0  ;;  %p256_p2 = scmp.eq.s32.totalorder %s5384_s17, 1 }
   0x7   : > { %p261_p3 = scmp.ne.s32.totalorder %s5292_s14, %s5288_s13  ;;  %p262_p4 = scmp.eq.s32.totalorder %s4569_s18, 1 }
   0x8   : > { %s5399_s22 = scalar_select %p243_p1, %s5296_s15, %s245_s20  }
   0x9   : > { %p5401_p5 = por %p256_p2, %p255_p0  ;;  %p5405_p6 = por %p262_p4, %p261_p3 }
   0xa   : > { %p4572_p7 = scmp.ge.s32.totalorder %s5300_s16, 1  ;;  %p315_p8 = scmp.lt.s32.totalorder %s5300_s16, 3 }
   0xc   : > { %p316_p9 = pnand %p4572_p7, %p315_p8 }
   0xe   : > { %319 = sbr.rel (%p316_p9) target bundleno = 1117 (0x45d), region = 60 }
  0x13   : > { %v5069_v0 = vld [vmem:[%s8059_s1 + $0x38] sm:$0xff]  ;;  %v5068_v3 = vld [vmem:[%s8059_s1 + $0x30] sm:$0xff]  ;;  %v5067_v6 = vld [vmem:[%s8059_s1 + $0x28] sm:$0xff]  ;;  %p353_p10 = scmp.lt.s32.totalorder %s5384_s17, 1  ;;  %v8069_v21 = vmov 0   ;;  %vm1311_vm0 = vcmask 257024  }
  0x14   : > { %v5417_v1 = vld [vmem:[%s8059_s1 + $0x78] sm:$0xff]  ;;  %683 = vmatpush.bf16.msra.mxu0 %v5069_v0  ;;  %5155 = vmatpush.bf16.msra.mxu3 %v5069_v0  ;;  %v5076_v4 = vld [vmem:[%s8059_s1 + $0x70] sm:$0xff]  ;;  %v5075_v7 = vld [vmem:[%s8059_s1 + $0x68] sm:$0xff]  ;;  %v416_v22 = vunpack.c.l.b16 %v8069_v21  ;;  %1399 = vst.msk [vmem:[#allocation2] sm:$0xf] %vm1311_vm0, %v8069_v21  ;;  %vm8083_vm1 = vcmask 519424  }
  0x15   : > { %v5422_v2 = vld [vmem:[%s8059_s1 + $0xb8] sm:$0xff]  ;;  %772 = vmatpush.bf16.msra.mxu1 %v5417_v1  ;;  %v5435_v5 = vld [vmem:[%s8059_s1 + $0xb0] sm:$0xff]  ;;  %v5447_v8 = vld [vmem:[%s8059_s1 + $0xa8] sm:$0xff]  ;;  %s354_s28 = scalar_select %p353_p10, %s5384_s17, 1  ;;  %1400 = vst.msk [vmem:[#allocation2 + $0x60] sm:$0xf] %vm1311_vm0, %v8069_v21 }
  0x16   : > { %861 = vmatpush.bf16.msra.mxu2 %v5422_v2  ;;  %v5066_v9 = vld [vmem:[%s8059_s1 + $0x20] sm:$0xff]  ;;  %v5065_v12 = vld [vmem:[%s8059_s1 + $0x18] sm:$0xff]  ;;  %v5064_v15 = vld [vmem:[%s8059_s1 + $0x10] sm:$0xff]  ;;  %v5512_v26 = vpack.c.b16 %v416_v22, %v416_v22  ;;  %1401 = vst.msk [vmem:[#allocation2 + $0xc0] sm:$0xf] %vm1311_vm0, %v8069_v21  ;;  %s5303_s27 = smov 32  }
  0x17   : > { %v5074_v10 = vld [vmem:[%s8059_s1 + $0x60] sm:$0xff]  ;;  %v5073_v13 = vld [vmem:[%s8059_s1 + $0x58] sm:$0xff]  ;;  %v5072_v16 = vld [vmem:[%s8059_s1 + $0x50] sm:$0xff]  ;;  %s5045_s21 = sshll.u32 %s354_s28, 7  ;;  %1402 = vst.msk [vmem:[#allocation2 + $0x120] sm:$0xf] %vm1311_vm0, %v8069_v21 }
  0x18   : > { %684 = vmatpush.bf16.msra.mxu0 %v5068_v3  ;;  %5156 = vmatpush.bf16.msra.mxu3 %v5068_v3  ;;  %v5459_v11 = vld [vmem:[%s8059_s1 + $0xa0] sm:$0xff]  ;;  %v5471_v14 = vld [vmem:[%s8059_s1 + $0x98] sm:$0xff]  ;;  %v5484_v17 = vld [vmem:[%s8059_s1 + $0x90] sm:$0xff]  ;;  %s5504_s30 = scalar_lea.vmem %s8058_s0, %s5045_s21  ;;  %3164 = vst.msk [vmem:[#allocation2 + $0x5c] sm:$0xf] %vm1311_vm0, %v8069_v21  ;;  %s5304_s29 = smov 96  }
  0x19   : > { %773 = vmatpush.bf16.msra.mxu1 %v5076_v4  ;;  %v5063_v18 = vld [vmem:[%s8059_s1 + $0x8] sm:$0xff]  ;;  %v5062_v23 = vld [vmem:[%s8059_s1] sm:$0xff]  ;;  %v5536_v33 = vld [vmem:[%s5504_s30 + $0x50] sm:$0xff]  ;;  %3165 = vst.msk [vmem:[#allocation2 + $0xbc] sm:$0xf] %vm1311_vm0, %v8069_v21  ;;  %s5305_s28 = smov 64  }
  0x1a   : > { %862 = vmatpush.bf16.msra.mxu2 %v5435_v5  ;;  %v5071_v19 = vld [vmem:[%s8059_s1 + $0x48] sm:$0xff]  ;;  %v5070_v24 = vld [vmem:[%s8059_s1 + $0x40] sm:$0xff]  ;;  %v5048_v34 = vld [vmem:[%s5504_s30 + $0x10] sm:$0xff]  ;;  %3166 = vst.msk [vmem:[#allocation2 + $0x11c] sm:$0xf] %vm1311_vm0, %v8069_v21  ;;  %vm1403_vm4 = vcmask 253952  }
  0x1b   : > { %v5079_v20 = vld [vmem:[%s8059_s1 + $0x88] sm:$0xff]  ;;  %v5078_v25 = vld [vmem:[%s8059_s1 + $0x80] sm:$0xff]  ;;  %v5541_v35 = vld [vmem:[%s5504_s30 + $0x30] sm:$0xff]  ;;  %3167 = vst.msk [vmem:[#allocation2 + $0x17c] sm:$0xf] %vm1311_vm0, %v8069_v21  ;;  %vm3168_vm10 = vcmask 257027  }
  0x1c   : > { %685 = vmatpush.bf16.msra.mxu0 %v5067_v6  ;;  %5157 = vmatpush.bf16.msra.mxu3 %v5067_v6  ;;  %v5515_v27 = vld [vmem:[%s5504_s30 + $0x40] sm:$0xff]  ;;  %v5526_v30 = vld [vmem:[%s5504_s30 + $0x48] sm:$0xff]  ;;  %v5550_v36 = vld [vmem:[%s5504_s30 + $0x58] sm:$0xff]  ;;  %1631 = vst.msk [vmem:[#allocation2] sm:$0xf] %vm8083_vm1, %v8069_v21  ;;  %vm3702_vm12 = vcmask 261120  }
  0x1d   : > { %774 = vmatpush.bf16.msra.mxu1 %v5075_v7  ;;  %v5046_v28 = vld [vmem:[%s5504_s30] sm:$0xff]  ;;  %v5047_v31 = vld [vmem:[%s5504_s30 + $0x8] sm:$0xff]  ;;  %v5049_v37 = vld [vmem:[%s5504_s30 + $0x18] sm:$0xff]  ;;  %1632 = vst.msk [vmem:[#allocation2 + $0x60] sm:$0xf] %vm8083_vm1, %v8069_v21  ;;  %vm8081_vm13 = vcmask 781824  }
  0x1e   : > { %863 = vmatpush.bf16.msra.mxu2 %v5447_v8  ;;  %v5519_v29 = vld [vmem:[%s5504_s30 + $0x20] sm:$0xff]  ;;  %v5530_v32 = vld [vmem:[%s5504_s30 + $0x28] sm:$0xff]  ;;  %v5554_v38 = vld [vmem:[%s5504_s30 + $0x38] sm:$0xff]  ;;  %1633 = vst.msk [vmem:[#allocation2 + $0xc0] sm:$0xf] %vm8083_vm1, %v8069_v21  ;;  %vm8072_vm14 = vcmask 1044224  }
  0x1f   : > { %v5058_v39 = vld [vmem:[%s5504_s30 + $0x60] sm:$0xff]  ;;  %v5565_v40 = vld [vmem:[%s5504_s30 + $0x68] sm:$0xff]  ;;  %v5571_v41 = vld [vmem:[%s5504_s30 + $0x70] sm:$0xff]  ;;  %1634 = vst.msk [vmem:[#allocation2 + $0x120] sm:$0xf] %vm8083_vm1, %v8069_v21  ;;  %s350_s20 = sand.u32 1, %s5292_s14  }
  0x20   : > { %686 = vmatpush.bf16.msra.mxu0 %v5066_v9  ;;  %5158 = vmatpush.bf16.msra.mxu3 %v5066_v9  ;;  %v5577_v42 = vld [vmem:[%s5504_s30 + $0x78] sm:$0xff]  ;;  %v5606_v47 = vld [vmem:[%s8062_s4] ss:$0 sm:$0xff]  ;;  %vm8082_vm2 = vsmask.f32 7938  ;;  %s4573_s21 = sshll.u32 %s350_s20, 8 }
  0x21   : > { %775 = vmatpush.bf16.msra.mxu1 %v5074_v10  ;;  %v5611_v50 = vld [vmem:[%s8063_s5] ss:$0 sm:$0xff]  ;;  %vm5635_vm3 = vmand %vm1311_vm0, %vm8082_vm2  ;;  %vm8080_vm5 = vsmask.f32 256  ;;  %vm1832_vm6 = vsmask.f32 3328 }
  0x22   : > { %864 = vmatpush.bf16.msra.mxu2 %v5459_v11  ;;  %vm5655_vm7 = vmand %vm1403_vm4, %vm8080_vm5  ;;  %vm1924_vm9 = vsmask.f32 7950  ;;  %1919 = vst.msk [vmem:[#allocation2] sm:$0xf] %vm8081_vm13, %v8069_v21  ;;  %vm2232_vm4 = vcmask 1041152   ;;  %s7656_s11 = scalar_lea.vmem [#allocation3], %s4573_s21 }
  0x23   : > { %vm5666_vm8 = vmand %vm1311_vm0, %vm1832_vm6  ;;  %1920 = vst.msk [vmem:[#allocation2 + $0x60] sm:$0xf] %vm8081_vm13, %v8069_v21  ;;  %s5258_s12 = scalar_lea.hbm %s8068_s10, 512 }
  0x24   : > { %687 = vmatpush.bf16.msra.mxu0 %v5065_v12  ;;  %5159 = vmatpush.bf16.msra.mxu3 %v5065_v12  ;;  %vm5708_vm11 = vmand %vm3168_vm10, %vm1924_vm9  ;;  %1921 = vst.msk [vmem:[#allocation2 + $0xc0] sm:$0xf] %vm8081_vm13, %v8069_v21 }
  0x25   : > { %776 = vmatpush.bf16.msra.mxu1 %v5073_v13  ;;  %1922 = vst.msk [vmem:[#allocation2 + $0x120] sm:$0xf] %vm8081_vm13, %v8069_v21  ;;  %vm5994_vm15 = vmand %vm8072_vm14, %vm8082_vm2 }
  0x26   : > { %865 = vmatpush.bf16.msra.mxu2 %v5471_v14  ;;  %vm6054_vm10 = vmand %vm2232_vm4, %vm8080_vm5  ;;  %vm1923_vm5 = vcmask 781827  }
  0x27   : > { %vm6152_vm4 = vmand %vm8083_vm1, %vm1832_vm6 }
  0x28   : > { %688 = vmatpush.bf16.msra.mxu0 %v5064_v15  ;;  %5160 = vmatpush.bf16.msra.mxu3 %v5064_v15  ;;  %vm6163_vm14 = vmand %vm8081_vm13, %vm1832_vm6  ;;  %vm2572_vm6 = vcmask 519427  }
  0x29   : > { %777 = vmatpush.bf16.msra.mxu1 %v5072_v16  ;;  %vm6223_vm13 = vmand %vm2572_vm6, %vm1924_vm9  ;;  %vm8168_vm6 = vcmask 781824  }
  0x2a   : > { %866 = vmatpush.bf16.msra.mxu2 %v5484_v17  ;;  %vm6232_vm2 = vmand %vm1923_vm5, %vm1924_vm9  ;;  %vm2844_vm5 = vcmask 778752   ;;  %vm8167_vm9 = vsmask.f32 7938 }
  0x2c   : > { %689 = vmatpush.bf16.msra.mxu0 %v5063_v18  ;;  %5161 = vmatpush.bf16.msra.mxu3 %v5063_v18 }
  0x2d   : > { %778 = vmatpush.bf16.msra.mxu1 %v5071_v19 }
  0x2e   : > { %867 = vmatpush.bf16.msra.mxu2 %v5079_v20 }
  0x30   : > { %690 = vmatpush.bf16.msra.mxu0 %v5062_v23  ;;  %5162 = vmatpush.bf16.msra.mxu3 %v5062_v23 }
  0x31   : > { %779 = vmatpush.bf16.msra.mxu1 %v5070_v24 }
  0x32   : > { %868 = vmatpush.bf16.msra.mxu2 %v5078_v25 }
  0x33   : > { %691 = vmatmul.bf16.vlgmr.msra.gmra.mxu0 %v5512_v26  ;;  %751 = vmatmul.bf16.vlgmr.msra.gmra.mxu3 %v5515_v27 }
  0x34   : > { %5163 = vmatpush.bf16.msrb.mxu3 %v5417_v1  ;;  %780 = vmatmul.bf16.vlgmr.msra.gmra.mxu1 %v5046_v28 }
  0x35   : > { %869 = vmatmul.bf16.vlgmr.msra.gmra.mxu2 %v5519_v29 }
  0x38   : > { %5164 = vmatpush.bf16.msrb.mxu3 %v5076_v4 }
  0x3c   : > { %5165 = vmatpush.bf16.msrb.mxu3 %v5075_v7 }
  0x40   : > { %5166 = vmatpush.bf16.msrb.mxu3 %v5074_v10 }
  0x43   : > { %696 = vmatmul.bf16.gmra.mxu0 %v5512_v26  ;;  %756 = vmatmul.bf16.gmra.mxu3 %v5526_v30 }
  0x44   : > { %5167 = vmatpush.bf16.msrb.mxu3 %v5073_v13  ;;  %785 = vmatmul.bf16.gmra.mxu1 %v5047_v31 }
  0x45   : > { %874 = vmatmul.bf16.gmra.mxu2 %v5530_v32 }
  0x48   : > { %5168 = vmatpush.bf16.msrb.mxu3 %v5072_v16 }
  0x4c   : > { %5169 = vmatpush.bf16.msrb.mxu3 %v5071_v19 }
  0x50   : > { %5170 = vmatpush.bf16.msrb.mxu3 %v5070_v24 }
  0x53   : > { %761 = vmatmul.bf16.gmra.mxu3 %v5536_v33  ;;  %701 = vmatmul.bf16.gmra.mxu0 %v5512_v26 }
  0x54   : > { %5171 = vmatpush.bf16.msra.mxu3 %v5422_v2  ;;  %790 = vmatmul.bf16.gmra.mxu1 %v5048_v34 }
  0x55   : > { %879 = vmatmul.bf16.gmra.mxu2 %v5541_v35 }
  0x58   : > { %5172 = vmatpush.bf16.msra.mxu3 %v5435_v5 }
  0x5c   : > { %5173 = vmatpush.bf16.msra.mxu3 %v5447_v8  ;;  %v1314_v8 = vld [vmem:[#allocation2 + $0xc] sm:$0xf] }
  0x60   : > { %5174 = vmatpush.bf16.msra.mxu3 %v5459_v11 }
  0x63   : > { %766 = vmatmul.bf16.gmra.mxu3 %v5550_v36  ;;  %706 = vmatmul.bf16.gmra.mxu0 %v5512_v26 }
  0x64   : > { %5175 = vmatpush.bf16.msra.mxu3 %v5471_v14  ;;  %795 = vmatmul.bf16.gmra.mxu1 %v5049_v37 }
  0x65   : > { %884 = vmatmul.bf16.gmra.mxu2 %v5554_v38 }
  0x68   : > { %5176 = vmatpush.bf16.msra.mxu3 %v5484_v17 }
  0x6c   : > { %5177 = vmatpush.bf16.msra.mxu3 %v5079_v20 }
  0x70   : > { %5178 = vmatpush.bf16.msra.mxu3 %v5078_v25 }
  0x73   : > { %840 = vmatmul.bf16.vlgmr.msrb.gmra.mxu3 %v5058_v39  ;;  %711 = vmatmul.bf16.gmra.mxu0 %v5046_v28 }
  0x74   : > { %800 = vmatmul.bf16.gmra.mxu1 %v5519_v29 }
  0x75   : > { %889 = vmatmul.bf16.gmra.mxu2 %v5515_v27 }
  0x83   : > { %845 = vmatmul.bf16.gmra.mxu3 %v5565_v40  ;;  %716 = vmatmul.bf16.gmra.mxu0 %v5047_v31 }
  0x84   : > { %805 = vmatmul.bf16.gmra.mxu1 %v5530_v32 }
  0x85   : > { %894 = vmatmul.bf16.gmra.mxu2 %v5526_v30 }
  0x93   : > { %850 = vmatmul.bf16.gmra.mxu3 %v5571_v41  ;;  %721 = vmatmul.bf16.gmra.mxu0 %v5048_v34 }
  0x94   : > { %810 = vmatmul.bf16.gmra.mxu1 %v5541_v35 }
  0x95   : > { %899 = vmatmul.bf16.gmra.mxu2 %v5536_v33 }
  0xa3   : > { %855 = vmatmul.bf16.gmra.mxu3 %v5577_v42  ;;  %726 = vmatmul.bf16.gmra.mxu0 %v5049_v37 }
  0xa4   : > { %815 = vmatmul.bf16.gmra.mxu1 %v5554_v38 }
  0xa5   : > { %904 = vmatmul.bf16.gmra.mxu2 %v5550_v36 }
  0xb0   : > { %v692_v43 = vpop.f32.mrf.mxu0 }
  0xb1   : > { %v781_v44 = vpop.f32.mrf.mxu1 }
  0xb2   : > { %v782_v45 = vadd.f32 %v781_v44, %v692_v43 }
  0xb3   : > { %929 = vmatmul.bf16.vlgmr.msra.gmra.mxu3 %v5512_v26  ;;  %731 = vmatmul.bf16.gmra.mxu0 %v5519_v29  ;;  %v1317_v29 = vld [vmem:[#allocation2 + $0x18] sm:$0xf] }
  0xb4   : > { %820 = vmatmul.bf16.gmra.mxu1 %v5515_v27 }
  0xb5   : > { %909 = vmatmul.bf16.gmra.mxu2 %v5058_v39 }
  0xb6   : > { %v5601_v46 = vpop.f32.mrf.mxu3 }
  0xb8   : > { %v870_v48 = vpop.f32.mrf.mxu2  ;;  %v694_v51 = vpop.f32.mrf.mxu0 }
  0xb9   : > { %v871_v49 = vadd.f32 %v870_v48, %v782_v45  ;;  %v783_v52 = vpop.f32.mrf.mxu1  ;;  %v3080_v45 = vld [vmem:[#allocation2 + $0x8] sm:$0xf] }
  0xba   : > { %v784_v56 = vadd.f32 %v783_v52, %v694_v51 }
  0xbb   : > { %v954_v53 = vmul.f32 %v5606_v47, %v871_v49 }
  0xbd   : > { %v990_v54 = vadd.f32 %v5611_v50, %v954_v53 }
  0xbe   : > { %v5621_v57 = vpop.f32.mrf.mxu3 }
  0xbf   : > { %v1022_v55 = vmax.f32 %v990_v54, 0.0 }
  0xc0   : > { %v872_v58 = vpop.f32.mrf.mxu2  ;;  %v697_v61 = vpop.f32.mrf.mxu0 }
  0xc1   : > { %v1054_v59 = vpack.c.bf16 %v1022_v55, %v1022_v55  ;;  %v873_v60 = vadd.f32 %v872_v58, %v784_v56  ;;  %v786_v62 = vpop.f32.mrf.mxu1 }
  0xc2   : > { %v787_v2 = vadd.f32 %v786_v62, %v697_v61 }
  0xc3   : > { %v955_v63 = vmul.f32 %v5606_v47, %v873_v60  ;;  %1518 = vrot.lane.b32.xlu0 %v1054_v59, %s5303_s27  ;;  %v1087_v0 = vshrl.u32 %v1054_v59, 16  ;;  %v1090_v1 = vshll.u32 %v1054_v59, 16  ;;  %2330 = vst.msk [vmem:[#allocation2 + $0x4] sm:$0xf] %vm1311_vm0, %v1054_v59  ;;  %934 = vmatmul.bf16.gmra.mxu3 %v5512_v26  ;;  %v5150_v60 = vld [vmem:[%s8060_s2 + $0x80] sm:$0xff] }
  0xc4   : > { %736 = vmatmul.bf16.gmra.mxu0 %v5530_v32  ;;  %825 = vmatmul.bf16.gmra.mxu1 %v5526_v30 }
  0xc5   : > { %v991_v3 = vadd.f32 %v5611_v50, %v955_v63  ;;  %v1089_v4 = vrot.slane %v1087_v0, 7  ;;  %914 = vmatmul.bf16.gmra.mxu2 %v5565_v40  ;;  %v1635_v5 = vrot.slane %v1087_v0, 4  ;;  %v1636_v6 = vrot.slane %v1090_v1, 5  ;;  %v5151_v40 = vld [vmem:[%s8060_s2 + $0x88] sm:$0xff] }
  0xc6   : > { %v5639_v10 = vpop.f32.mrf.mxu3  ;;  %3935 = vmatpush.bf16.msrb.mxu1 %v5151_v40 }
  0xc7   : > { %v1023_v9 = vmax.f32 %v991_v3, 0.0  ;;  %v1092_v11 = vor.u32 %v1090_v1, %v1089_v4  ;;  %v1637_v12 = vor.u32 %v1636_v6, %v1635_v5  ;;  %v1320_v6 = vld [vmem:[#allocation2 + $0x24] sm:$0xf] }
  0xc8   : > { %v875_v13 = vpop.f32.mrf.mxu2  ;;  %v699_v17 = vpop.f32.mrf.mxu0 }
  0xc9   : > { %v5641_v14 = vpack.c.bf16 %v1023_v9, %v1023_v9  ;;  %v876_v15 = vadd.f32 %v875_v13, %v787_v2  ;;  %2038 = vrot.lane.b32.xlu2 %v1092_v11, %s5304_s29  ;;  %v1315_v16 = vsel %vm5635_vm3, %v1092_v11, %v1314_v8  ;;  %v1638_v18 = vrot.slane %v1637_v12, 4  ;;  %v788_v19 = vpop.f32.mrf.mxu1  ;;  %v3083_v13 = vld [vmem:[#allocation2 + $0x14] sm:$0xf] }
  0xca   : > { %1316 = vst [vmem:[#allocation2 + $0xc] sm:$0xf] %v1315_v16  ;;  %v789_v32 = vadd.f32 %v788_v19, %v699_v17  ;;  %3936 = vmatpush.bf16.msrb.mxu1 %v5150_v60 }
  0xcb   : > { %v956_v20 = vmul.f32 %v5606_v47, %v876_v15  ;;  %2331 = vst.msk [vmem:[#allocation2 + $0x10] sm:$0xf] %vm1311_vm0, %v5641_v14  ;;  %2378 = vrot.lane.b32.xlu1 %v1638_v18, %s5303_s27  ;;  %1747 = vrot.lane.b32.xlu0 %v1638_v18, %s5305_s28  ;;  %v1094_v22 = vshrl.u32 %v5641_v14, 16  ;;  %v1097_v23 = vshll.u32 %v5641_v14, 16 }
  0xcd   : > { %v992_v24 = vadd.f32 %v5611_v50, %v956_v20  ;;  %v1639_v25 = vrot.slane %v1094_v22, 4  ;;  %v1640_v27 = vrot.slane %v1097_v23, 5  ;;  %v1096_v28 = vrot.slane %v1094_v22, 7 }
  0xce   : > { %v5659_v34 = vpop.f32.mrf.mxu3 }
  0xcf   : > { %v1024_v30 = vmax.f32 %v992_v24, 0.0  ;;  %v1641_v37 = vor.u32 %v1640_v27, %v1639_v25  ;;  %v1099_v39 = vor.u32 %v1097_v23, %v1096_v28 }
  0xd0   : > { %v877_v43 = vpop.f32.mrf.mxu2  ;;  %v702_v54 = vpop.f32.mrf.mxu0 }
  0xd1   : > { %v5670_v48 = vpack.c.bf16 %v1024_v30, %v1024_v30  ;;  %v1406_v49 = vld [vmem:[#allocation2 + $0xc] sm:$0x1]  ;;  %v878_v51 = vadd.f32 %v877_v43, %v789_v32  ;;  %1520 = vrot.lane.b32.xlu2 %v5641_v14, %s5303_s27  ;;  %v5674_v52 = vrot.slane %v1641_v37, 4  ;;  %v1318_v53 = vsel %vm5635_vm3, %v1099_v39, %v1317_v29  ;;  %v791_v56 = vpop.f32.mrf.mxu1  ;;  %v1323_v32 = vld [vmem:[#allocation2 + $0x30] sm:$0xf] }
  0xd2   : > { %v1407_v55 = vsel %vm5655_vm7, 0, %v1406_v49  ;;  %1319 = vst [vmem:[#allocation2 + $0x18] sm:$0xf] %v1318_v53  ;;  %v792_v0 = vadd.f32 %v791_v56, %v702_v54  ;;  %v3086_v56 = vld [vmem:[#allocation2 + $0x20] sm:$0xf] }
  0xd3   : > { %1408 = vst [vmem:[#allocation2 + $0xc] sm:$0x1] %v1407_v55  ;;  %v957_v58 = vmul.f32 %v5606_v47, %v878_v51  ;;  %v3081_v59 = vsel %vm5666_vm8, %v5674_v52, %v3080_v45  ;;  %2380 = vrot.lane.b32.xlu1 %v5674_v52, %s5303_s27  ;;  %2040 = vrot.lane.b32.xlu0 %v1099_v39, %s5304_s29  ;;  %v1101_v61 = vshrl.u32 %v5670_v48, 16  ;;  %v1104_v62 = vshll.u32 %v5670_v48, 16 }
  0xd4   : > { %2332 = vst.msk [vmem:[#allocation2 + $0x1c] sm:$0xf] %vm1311_vm0, %v5670_v48  ;;  %939 = vmatmul.bf16.gmra.mxu3 %v5512_v26  ;;  %741 = vmatmul.bf16.gmra.mxu0 %v5541_v35 }
  0xd5   : > { %v993_v63 = vadd.f32 %v5611_v50, %v957_v58  ;;  %3082 = vst [vmem:[#allocation2 + $0x8] sm:$0xf] %v3081_v59  ;;  %830 = vmatmul.bf16.gmra.mxu1 %v5536_v33  ;;  %919 = vmatmul.bf16.gmra.mxu2 %v5571_v41  ;;  %v1103_v1 = vrot.slane %v1101_v61, 7  ;;  %v1643_v2 = vrot.slane %v1101_v61, 4  ;;  %v1644_v3 = vrot.slane %v1104_v62, 5 }
  0xd6   : > { %v5699_v5 = vpop.f32.mrf.mxu3 }
  0xd7   : > { %v1025_v4 = vmax.f32 %v993_v63, 0.0  ;;  %v5701_v35 = vor.u32 %v1104_v62, %v1103_v1  ;;  %v1645_v9 = vor.u32 %v1644_v3, %v1643_v2 }
  0xd8   : > { %v880_v8 = vpop.f32.mrf.mxu2  ;;  %v704_v41 = vpop.f32.mrf.mxu0 }
  0xd9   : > { %v5703_v11 = vpack.c.bf16 %v1025_v4, %v1025_v4  ;;  %v1409_v33 = vld [vmem:[#allocation2 + $0x18] sm:$0x1]  ;;  %v881_v12 = vadd.f32 %v880_v8, %v792_v0  ;;  %2934 = vrot.lane.b32.xlu2 %v5641_v14, %s5304_s29  ;;  %v793_v17 = vpop.f32.mrf.mxu1  ;;  %v1321_v18 = vsel %vm5635_vm3, %v5701_v35, %v1320_v6  ;;  %v5717_v19 = vrot.slane %v1645_v9, 4 }
  0xda   : > { %v1410_v16 = vsel %vm5655_vm7, 0, %v1409_v33  ;;  %v794_v24 = vadd.f32 %v793_v17, %v704_v41  ;;  %1322 = vst [vmem:[#allocation2 + $0x24] sm:$0xf] %v1321_v18  ;;  %v3089_v18 = vld [vmem:[#allocation2 + $0x2c] sm:$0xf] }
  0xdb   : > { %2333 = vst.msk [vmem:[#allocation2 + $0x28] sm:$0xf] %vm1311_vm0, %v5703_v11  ;;  %v958_v14 = vmul.f32 %v5606_v47, %v881_v12  ;;  %2672 = vrot.lane.b32.xlu1 %v5701_v35, %s5305_s28  ;;  %2670 = vrot.lane.b32.xlu0 %v1099_v39, %s5305_s28  ;;  %v1108_v20 = vshrl.u32 %v5703_v11, 16  ;;  %v1111_v22 = vshll.u32 %v5703_v11, 16  ;;  %v3084_v25 = vsel %vm5666_vm8, %v5717_v19, %v3083_v13 }
  0xdc   : > { %v3170_v23 = vld [vmem:[#allocation2 + $0x8] sm:$0x8]  ;;  %1411 = vst [vmem:[#allocation2 + $0x18] sm:$0x1] %v1410_v16 }
  0xdd   : > { %v3171_v27 = vsel %vm5708_vm11, 0, %v3170_v23  ;;  %v994_v28 = vadd.f32 %v5611_v50, %v958_v14  ;;  %v1110_v29 = vrot.slane %v1108_v20, 7  ;;  %v1647_v30 = vrot.slane %v1108_v20, 4  ;;  %3085 = vst [vmem:[#allocation2 + $0x14] sm:$0xf] %v3084_v25 }
  0xde   : > { %3172 = vst [vmem:[#allocation2 + $0x8] sm:$0x8] %v3171_v27  ;;  %v1648_v37 = vrot.slane %v1111_v22, 5  ;;  %v5733_v40 = vpop.f32.mrf.mxu3 }
  0xdf   : > { %v1026_v39 = vmax.f32 %v994_v28, 0.0  ;;  %v5735_v43 = vor.u32 %v1111_v22, %v1110_v29 }
  0xe0   : > { %v882_v45 = vpop.f32.mrf.mxu2  ;;  %v1649_v49 = vor.u32 %v1648_v37, %v1647_v30  ;;  %v707_v54 = vpop.f32.mrf.mxu0 }
  0xe1   : > { %v5737_v51 = vpack.c.bf16 %v1026_v39, %v1026_v39  ;;  %v883_v53 = vadd.f32 %v882_v45, %v794_v24  ;;  %1522 = vrot.lane.b32.xlu2 %v5670_v48, %s5303_s27  ;;  %v1324_v55 = vsel %vm5635_vm3, %v5735_v43, %v1323_v32  ;;  %v796_v58 = vpop.f32.mrf.mxu1  ;;  %v1412_v63 = vld [vmem:[#allocation2 + $0x24] sm:$0x1]  ;;  %v1329_v39 = vld [vmem:[#allocation2 + $0x48] sm:$0xf] }
  0xe2   : > { %1325 = vst [vmem:[#allocation2 + $0x30] sm:$0xf] %v1324_v55  ;;  %v5744_v59 = vrot.slane %v1649_v49, 4  ;;  %v1413_v1 = vsel %vm5655_vm7, 0, %v1412_v63 }
  0xe3   : > { %2334 = vst.msk [vmem:[#allocation2 + $0x34] sm:$0xf] %vm1311_vm0, %v5737_v51  ;;  %v959_v60 = vmul.f32 %v5606_v47, %v883_v53  ;;  %1751 = vrot.lane.b32.xlu1 %v5717_v19, %s5305_s28  ;;  %1749 = vrot.lane.b32.xlu0 %v5674_v52, %s5305_s28  ;;  %v1115_v61 = vshrl.u32 %v5737_v51, 16  ;;  %v1118_v62 = vshll.u32 %v5737_v51, 16  ;;  %v797_v52 = vadd.f32 %v796_v58, %v707_v54 }
  0xe4   : > { %944 = vmatmul.bf16.gmra.mxu3 %v5512_v26  ;;  %746 = vmatmul.bf16.gmra.mxu0 %v5554_v38  ;;  %v3087_v0 = vsel %vm5666_vm8, %v5744_v59, %v3086_v56  ;;  %1414 = vst [vmem:[#allocation2 + $0x24] sm:$0x1] %v1413_v1  ;;  %v3173_v4 = vld [vmem:[#allocation2 + $0x14] sm:$0x8]  ;;  %v3092_v1 = vld [vmem:[#allocation2 + $0x38] sm:$0xf] }
  0xe5   : > { %v995_v2 = vadd.f32 %v5611_v50, %v959_v60  ;;  %835 = vmatmul.bf16.gmra.mxu1 %v5550_v36  ;;  %924 = vmatmul.bf16.gmra.mxu2 %v5577_v42  ;;  %v1651_v3 = vrot.slane %v1115_v61, 4  ;;  %v1652_v26 = vrot.slane %v1118_v62, 5  ;;  %v1117_v6 = vrot.slane %v1115_v61, 7  ;;  %3088 = vst [vmem:[#allocation2 + $0x20] sm:$0xf] %v3087_v0 }
  0xe6   : > { %v3174_v8 = vsel %vm5708_vm11, 0, %v3173_v4  ;;  %v5767_v9 = vpop.f32.mrf.mxu3  ;;  %v1326_v36 = vld [vmem:[#allocation2 + $0x3c] sm:$0xf] }
  0xe7   : > { %v1027_v38 = vmax.f32 %v995_v2, 0.0  ;;  %3175 = vst [vmem:[#allocation2 + $0x14] sm:$0x8] %v3174_v8  ;;  %v1653_v12 = vor.u32 %v1652_v26, %v1651_v3  ;;  %v5769_v41 = vor.u32 %v1118_v62, %v1117_v6 }
  0xe8   : > { %v885_v33 = vpop.f32.mrf.mxu2  ;;  %v709_v17 = vpop.f32.mrf.mxu0 }
  0xe9   : > { %v5771_v13 = vpack.c.bf16 %v1027_v38, %v1027_v38  ;;  %v886_v42 = vadd.f32 %v885_v33, %v797_v52  ;;  %1524 = vrot.lane.b32.xlu2 %v5703_v11, %s5303_s27  ;;  %v1415_v16 = vld [vmem:[#allocation2 + $0x30] sm:$0x1]  ;;  %v798_v14 = vpop.f32.mrf.mxu1  ;;  %v5777_v22 = vrot.slane %v1653_v12, 4  ;;  %v1327_v24 = vsel %vm5635_vm3, %v5769_v41, %v1326_v36  ;;  %v4746_v52 = vld [vmem:[#allocation2 + $0x8] sm:$0xf] }
  0xea   : > { %v1416_v20 = vsel %vm5655_vm7, 0, %v1415_v16  ;;  %v799_v28 = vadd.f32 %v798_v14, %v709_v17  ;;  %1328 = vst [vmem:[#allocation2 + $0x3c] sm:$0xf] %v1327_v24 }
  0xeb   : > { %2335 = vst.msk [vmem:[#allocation2 + $0x40] sm:$0xf] %vm1311_vm0, %v5771_v13  ;;  %v960_v23 = vmul.f32 %v5606_v47, %v886_v42  ;;  %2382 = vrot.lane.b32.xlu1 %v5717_v19, %s5303_s27  ;;  %2936 = vrot.lane.b32.xlu0 %v5670_v48, %s5304_s29  ;;  %v1122_v25 = vshrl.u32 %v5771_v13, 16  ;;  %v1125_v27 = vshll.u32 %v5771_v13, 16  ;;  %v3090_v29 = vsel %vm5666_vm8, %v5777_v22, %v3089_v18 }
  0xec   : > { %1417 = vst [vmem:[#allocation2 + $0x30] sm:$0x1] %v1416_v20  ;;  %v3176_v37 = vld [vmem:[#allocation2 + $0x20] sm:$0x8]  ;;  %v3095_v20 = vld [vmem:[#allocation2 + $0x44] sm:$0xf] }
  0xed   : > { %v996_v30 = vadd.f32 %v5611_v50, %v960_v23  ;;  %3091 = vst [vmem:[#allocation2 + $0x2c] sm:$0xf] %v3090_v29  ;;  %v1124_v19 = vrot.slane %v1122_v25, 7  ;;  %v1655_v32 = vrot.slane %v1122_v25, 4  ;;  %v1656_v48 = vrot.slane %v1125_v27, 5 }
  0xee   : > { %v5795_v49 = vpop.f32.mrf.mxu3  ;;  %v3177_v53 = vsel %vm5708_vm11, 0, %v3176_v37  ;;  %v5088_v56 = vld [vmem:[#allocation2 + $0x10] sm:$0xf0] }
  0xef   : > { %v1028_v45 = vmax.f32 %v996_v30, 0.0  ;;  %v5799_v54 = vor.u32 %v1125_v27, %v1124_v19  ;;  %v1657_v55 = vor.u32 %v1656_v48, %v1655_v32  ;;  %3178 = vst [vmem:[#allocation2 + $0x20] sm:$0x8] %v3177_v53 }
  0xf0   : > { %v887_v58 = vpop.f32.mrf.mxu2  ;;  %v712_v62 = vpop.f32.mrf.mxu0 }
  0xf1   : > { %v5801_v60 = vpack.c.bf16 %v1028_v45, %v1028_v45  ;;  %2938 = vrot.lane.b32.xlu2 %v5703_v11, %s5304_s29  ;;  %v888_v61 = vadd.f32 %v887_v58, %v799_v28  ;;  %v1330_v63 = vsel %vm5635_vm3, %v5799_v54, %v1329_v39  ;;  %v5808_v0 = vrot.slane %v1657_v55, 4  ;;  %v801_v2 = vpop.f32.mrf.mxu1  ;;  %v1418_v16 = vld [vmem:[#allocation2 + $0x3c] sm:$0x1]  ;;  %v3098_v58 = vld [vmem:[#allocation2 + $0x50] sm:$0xf] }
  0xf2   : > { %1331 = vst [vmem:[#allocation2 + $0x48] sm:$0xf] %v1330_v63  ;;  %v4747_v11 = vor.u32 %v5088_v56, %v4746_v52  ;;  %v802_v6 = vadd.f32 %v801_v2, %v712_v62 }
  0xf3   : > { %v1129_v3 = vshrl.u32 %v5801_v60, 16  ;;  %v1132_v4 = vshll.u32 %v5801_v60, 16  ;;  %2336 = vst.msk [vmem:[#allocation2 + $0x4c] sm:$0xf] %vm1311_vm0, %v5801_v60  ;;  %2044 = vrot.lane.b32.xlu1 %v5735_v43, %s5304_s29  ;;  %2042 = vrot.lane.b32.xlu0 %v5701_v35, %s5304_s29  ;;  %v961_v26 = vmul.f32 %v5606_v47, %v888_v61  ;;  %v3093_v8 = vsel %vm5666_vm8, %v5808_v0, %v3092_v1 }
  0xf4   : > { %v3179_v38 = vld [vmem:[#allocation2 + $0x2c] sm:$0x8]  ;;  %v1419_v35 = vsel %vm5655_vm7, 0, %v1418_v16  ;;  %3094 = vst [vmem:[#allocation2 + $0x38] sm:$0xf] %v3093_v8 }
  0xf5   : > { %v1659_v33 = vrot.slane %v1129_v3, 4  ;;  %v1660_v12 = vrot.slane %v1132_v4, 5  ;;  %5000 = vmatmul.msk.bf16.vlgmr.msrb.gmra.mxu1 %vm3702_vm12, %v4747_v11  ;;  %v997_v36 = vadd.f32 %v5611_v50, %v961_v26  ;;  %v3180_v42 = vsel %vm5708_vm11, 0, %v3179_v38  ;;  %1420 = vst [vmem:[#allocation2 + $0x3c] sm:$0x1] %v1419_v35 }
  0xf6   : > { %3181 = vst [vmem:[#allocation2 + $0x2c] sm:$0x8] %v3180_v42  ;;  %v5828_v14 = vpop.f32.mrf.mxu3  ;;  %v1131_v61 = vrot.slane %v1129_v3, 7  ;;  %v1332_v8 = vld [vmem:[#allocation2 + $0x54] sm:$0xf] }
  0xf7   : > { %v1661_v17 = vor.u32 %v1660_v12, %v1659_v33  ;;  %v1029_v18 = vmax.f32 %v997_v36, 0.0  ;;  %v4758_v12 = vld [vmem:[#allocation2 + $0x20] sm:$0xf] }
  0xf8   : > { %v890_v23 = vpop.f32.mrf.mxu2  ;;  %v714_v28 = vpop.f32.mrf.mxu0  ;;  %v5863_v11 = vor.u32 %v1132_v4, %v1131_v61 }
  0xf9   : > { %v5830_v24 = vrot.slane %v1661_v17, 4  ;;  %v5832_v25 = vpack.c.bf16 %v1029_v18, %v1029_v18  ;;  %2384 = vrot.lane.b32.xlu2 %v5744_v59, %s5303_s27  ;;  %v891_v27 = vadd.f32 %v890_v23, %v802_v6  ;;  %v1421_v29 = vld [vmem:[#allocation2 + $0x48] sm:$0x1]  ;;  %v803_v30 = vpop.f32.mrf.mxu1 }
  0xfa   : > { %v1422_v19 = vsel %vm5655_vm7, 0, %v1421_v29  ;;  %v804_v56 = vadd.f32 %v803_v30, %v714_v28  ;;  %v1333_v17 = vsel %vm5635_vm3, %v5863_v11, %v1332_v8  ;;  %v2494_v15 = vld [vmem:[#allocation2 + $0x4c] sm:$0xf] }
  0xfb   : > { %v3096_v32 = vsel %vm5666_vm8, %v5830_v24, %v3095_v20  ;;  %v2011_v48 = vshrl.u32 %v5832_v25, 16  ;;  %v2014_v37 = vshll.u32 %v5832_v25, 16  ;;  %2337 = vst.msk [vmem:[#allocation2 + $0x58] sm:$0xf] %vm1311_vm0, %v5832_v25  ;;  %1753 = vrot.lane.b32.xlu1 %v5744_v59, %s5305_s28  ;;  %2674 = vrot.lane.b32.xlu0 %v5735_v43, %s5305_s28  ;;  %v962_v39 = vmul.f32 %v5606_v47, %v891_v27  ;;  %v3182_v43 = vld [vmem:[#allocation2 + $0x38] sm:$0x8] }
  0xfc   : > { %3097 = vst [vmem:[#allocation2 + $0x44] sm:$0xf] %v3096_v32  ;;  %v3183_v52 = vsel %vm5708_vm11, 0, %v3182_v43 }
  0xfd   : > { %v2362_v45 = vrot.slane %v2011_v48, 4  ;;  %v2363_v53 = vrot.slane %v2014_v37, 5  ;;  %v998_v55 = vadd.f32 %v5611_v50, %v962_v39  ;;  %1423 = vst [vmem:[#allocation2 + $0x48] sm:$0x1] %v1422_v19  ;;  %v5091_v1 = vld [vmem:[#allocation2 + $0x28] sm:$0xf0] }
  0xfe   : > { %v5855_v63 = vpop.f32.mrf.mxu3  ;;  %3184 = vst [vmem:[#allocation2 + $0x38] sm:$0x8] %v3183_v52  ;;  %v4759_v42 = vor.u32 %v5091_v1, %v4758_v12 }
  0xff   : > { %v2364_v59 = vor.u32 %v2363_v53, %v2362_v45  ;;  %v1030_v62 = vmax.f32 %v998_v55, 0.0  ;;  %1334 = vst [vmem:[#allocation2 + $0x54] sm:$0xf] %v1333_v17 }
 0x100   : > { %v892_v2 = vpop.f32.mrf.mxu2  ;;  %v717_v38 = vpop.f32.mrf.mxu0 }
 0x101   : > { %v5865_v26 = vrot.slane %v2364_v59, 4  ;;  %v5867_v3 = vpack.c.bf16 %v1030_v62, %v1030_v62  ;;  %1755 = vrot.lane.b32.xlu2 %v5777_v22, %s5305_s28  ;;  %v893_v6 = vadd.f32 %v892_v2, %v804_v56  ;;  %v806_v33 = vpop.f32.mrf.mxu1 }
 0x102   : > { %v807_v20 = vadd.f32 %v806_v33, %v717_v38  ;;  %v3101_v38 = vld [vmem:[#allocation2 + $0x68] sm:$0xf] }
 0x103   : > { %v3185_v36 = vld [vmem:[#allocation2 + $0x44] sm:$0x8]  ;;  %v3099_v4 = vsel %vm5666_vm8, %v5865_v26, %v3098_v58  ;;  %2338 = vst.msk [vmem:[#allocation2 + $0x64] sm:$0xf] %vm1311_vm0, %v5867_v3  ;;  %2676 = vrot.lane.b32.xlu1 %v5769_v41, %s5305_s28  ;;  %1526 = vrot.lane.b32.xlu0 %v5737_v51, %s5303_s27  ;;  %v963_v16 = vmul.f32 %v5606_v47, %v893_v6 }
 0x104   : > { %v3186_v35 = vsel %vm5708_vm11, 0, %v3185_v36  ;;  %3100 = vst [vmem:[#allocation2 + $0x50] sm:$0xf] %v3099_v4 }
 0x105   : > { %3187 = vst [vmem:[#allocation2 + $0x44] sm:$0x8] %v3186_v35  ;;  %5001 = vmatmul.msk.bf16.gmra.mxu1 %vm3702_vm12, %v4759_v42  ;;  %v999_v18 = vadd.f32 %v5611_v50, %v963_v16 }
 0x106   : > { %v846_v27 = vpop.f32.mrf.mxu3  ;;  %v1424_v43 = vld [vmem:[#allocation2 + $0x54] sm:$0x1] }
 0x107   : > { %v1031_v23 = vmax.f32 %v999_v18, 0.0  ;;  %v5893_v28 = vadd.f32 %v846_v27, %v5639_v10  ;;  %v1425_v6 = vsel %vm5655_vm7, 0, %v1424_v43 }
 0x108   : > { %v895_v29 = vpop.f32.mrf.mxu2  ;;  %v719_v32 = vpop.f32.mrf.mxu0  ;;  %1426 = vst [vmem:[#allocation2 + $0x54] sm:$0x1] %v1425_v6 }
 0x109   : > { %v5895_v30 = vpack.c.bf16 %v1031_v23, %v1031_v23  ;;  %1528 = vrot.lane.b32.xlu2 %v5771_v13, %s5303_s27  ;;  %v896_v19 = vadd.f32 %v895_v29, %v807_v20  ;;  %v808_v39 = vpop.f32.mrf.mxu1 }
 0x10a   : > { %v809_v62 = vadd.f32 %v808_v39, %v719_v32 }
 0x10b   : > { %v3188_v45 = vld [vmem:[#allocation2 + $0x50] sm:$0x8]  ;;  %v1143_v53 = vshrl.u32 %v5895_v30, 16  ;;  %v1146_v55 = vshll.u32 %v5895_v30, 16  ;;  %2339 = vst.msk [vmem:[#allocation2 + $0x70] sm:$0xf] %vm1311_vm0, %v5895_v30  ;;  %2386 = vrot.lane.b32.xlu1 %v5777_v22, %s5303_s27  ;;  %2940 = vrot.lane.b32.xlu0 %v5737_v51, %s5304_s29  ;;  %v964_v10 = vmul.f32 %v5606_v47, %v896_v19 }
 0x10c   : > { %v3189_v56 = vsel %vm5708_vm11, 0, %v3188_v45  ;;  %v4770_v51 = vld [vmem:[#allocation2 + $0x38] sm:$0xf]  ;;  %v5094_v52 = vld [vmem:[#allocation2 + $0x40] sm:$0xf0] }
 0x10d   : > { %3190 = vst [vmem:[#allocation2 + $0x50] sm:$0x8] %v3189_v56  ;;  %v1667_v58 = vrot.slane %v1143_v53, 4  ;;  %v1668_v61 = vrot.slane %v1146_v55, 5  ;;  %v1000_v59 = vadd.f32 %v5611_v50, %v964_v10  ;;  %v4771_v16 = vor.u32 %v5094_v52, %v4770_v51  ;;  %v3104_v45 = vld [vmem:[#allocation2 + $0x74] sm:$0xf] }
 0x10e   : > { %v5915_v2 = vpop.f32.mrf.mxu3  ;;  %v1136_v52 = vshrl.u32 %v5867_v3, 16 }
 0x10f   : > { %v1669_v22 = vor.u32 %v1668_v61, %v1667_v58  ;;  %v1032_v1 = vmax.f32 %v1000_v59, 0.0 }
 0x110   : > { %v897_v8 = vpop.f32.mrf.mxu2  ;;  %v722_v4 = vpop.f32.mrf.mxu0 }
 0x111   : > { %v5919_v33 = vrot.slane %v1669_v22, 4  ;;  %v5921_v12 = vpack.c.bf16 %v1032_v1, %v1032_v1  ;;  %2942 = vrot.lane.b32.xlu2 %v5771_v13, %s5304_s29  ;;  %v898_v36 = vadd.f32 %v897_v8, %v809_v62  ;;  %v811_v42 = vpop.f32.mrf.mxu1 }
 0x112   : > { %v812_v29 = vadd.f32 %v811_v42, %v722_v4  ;;  %v5097_v4 = vld [vmem:[#allocation2 + $0x58] sm:$0xf0] }
 0x113   : > { %v3102_v35 = vsel %vm5666_vm8, %v5919_v33, %v3101_v38  ;;  %v1150_v17 = vshrl.u32 %v5921_v12, 16  ;;  %v1153_v18 = vshll.u32 %v5921_v12, 16  ;;  %2340 = vst.msk [vmem:[#allocation2 + $0x7c] sm:$0xf] %vm1311_vm0, %v5921_v12  ;;  %2048 = vrot.lane.b32.xlu1 %v5799_v54, %s5304_s29  ;;  %2046 = vrot.lane.b32.xlu0 %v5769_v41, %s5304_s29  ;;  %v965_v13 = vmul.f32 %v5606_v47, %v898_v36 }
 0x114   : > { %3103 = vst [vmem:[#allocation2 + $0x68] sm:$0xf] %v3102_v35  ;;  %v4782_v42 = vld [vmem:[#allocation2 + $0x50] sm:$0xf]  ;;  %v1138_v35 = vrot.slane %v1136_v52, 7 }
 0x115   : > { %v1671_v20 = vrot.slane %v1150_v17, 4  ;;  %v1672_v23 = vrot.slane %v1153_v18, 5  ;;  %5002 = vmatmul.msk.bf16.gmra.mxu1 %vm3702_vm12, %v4771_v16  ;;  %v1001_v27 = vadd.f32 %v5611_v50, %v965_v13  ;;  %v1139_v16 = vshll.u32 %v5867_v3, 16 }
 0x116   : > { %v5943_v39 = vpop.f32.mrf.mxu3  ;;  %v1145_v13 = vrot.slane %v1143_v53, 7 }
 0x117   : > { %v1673_v19 = vor.u32 %v1672_v23, %v1671_v20  ;;  %v1033_v32 = vmax.f32 %v1001_v27, 0.0 }
 0x118   : > { %v900_v41 = vpop.f32.mrf.mxu2  ;;  %v724_v61 = vpop.f32.mrf.mxu0 }
 0x119   : > { %v5945_v10 = vrot.slane %v1673_v19, 4  ;;  %v5947_v56 = vpack.c.bf16 %v1033_v32, %v1033_v32  ;;  %2678 = vrot.lane.b32.xlu2 %v5799_v54, %s5305_s28  ;;  %v901_v58 = vadd.f32 %v900_v41, %v812_v29  ;;  %v813_v59 = vpop.f32.mrf.mxu1  ;;  %v3107_v29 = vld [vmem:[#allocation2 + $0x80] sm:$0xf]  ;;  %v5984_v41 = vor.u32 %v1146_v55, %v1145_v13 }
 0x11a   : > { %v814_v36 = vadd.f32 %v813_v59, %v724_v61  ;;  %v2136_v19 = vld [vmem:[#allocation2] sm:$0xf]  ;;  %v4783_v59 = vor.u32 %v5097_v4, %v4782_v42 }
 0x11b   : > { %v3191_v62 = vld [vmem:[#allocation2 + $0x68] sm:$0x8]  ;;  %v3105_v43 = vsel %vm5666_vm8, %v5945_v10, %v3104_v45  ;;  %v1157_v22 = vshrl.u32 %v5947_v56, 16  ;;  %v1160_v1 = vshll.u32 %v5947_v56, 16  ;;  %2341 = vst.msk [vmem:[#allocation2 + $0x88] sm:$0xf] %vm1311_vm0, %v5947_v56  ;;  %1757 = vrot.lane.b32.xlu1 %v5808_v0, %s5305_s28  ;;  %1530 = vrot.lane.b32.xlu0 %v5801_v60, %s5303_s27  ;;  %v966_v54 = vmul.f32 %v5606_v47, %v901_v58 }
 0x11c   : > { %v3192_v51 = vsel %vm5708_vm11, 0, %v3191_v62  ;;  %3106 = vst [vmem:[#allocation2 + $0x74] sm:$0xf] %v3105_v43  ;;  %v5980_v45 = vor.u32 %v1139_v16, %v1138_v35 }
 0x11d   : > { %3193 = vst [vmem:[#allocation2 + $0x68] sm:$0x8] %v3192_v51  ;;  %v1675_v6 = vrot.slane %v1157_v22, 4  ;;  %v1676_v38 = vrot.slane %v1160_v1, 5  ;;  %v1002_v8 = vadd.f32 %v5611_v50, %v966_v54  ;;  %v1335_v54 = vld [vmem:[#allocation2 + $0x6c] sm:$0xf] }
 0x11e   : > { %v5976_v27 = vpop.f32.mrf.mxu3  ;;  %v1338_v51 = vld [vmem:[#allocation2 + $0x78] sm:$0xf]  ;;  %v1336_v13 = vsel %vm5635_vm3, %v5980_v45, %v1335_v54 }
 0x11f   : > { %v1677_v20 = vor.u32 %v1676_v38, %v1675_v6  ;;  %v1034_v23 = vmax.f32 %v1002_v8, 0.0  ;;  %v2013_v6 = vrot.slane %v2011_v48, 7  ;;  %1337 = vst [vmem:[#allocation2 + $0x6c] sm:$0xf] %v1336_v13  ;;  %v5140_v13 = vld [vmem:[%s8060_s2 + $0x30] sm:$0xff] }
 0x120   : > { %v902_v32 = vpop.f32.mrf.mxu2  ;;  %v727_v43 = vpop.f32.mrf.mxu0 }
 0x121   : > { %v5986_v58 = vrot.slane %v1677_v20, 4  ;;  %v5988_v61 = vpack.c.bf16 %v1034_v23, %v1034_v23  ;;  %2388 = vrot.lane.b32.xlu2 %v5808_v0, %s5303_s27  ;;  %v903_v62 = vadd.f32 %v902_v32, %v814_v36  ;;  %v816_v55 = vpop.f32.mrf.mxu1  ;;  %v1339_v20 = vsel %vm5635_vm3, %v5984_v41, %v1338_v51  ;;  %v5141_v32 = vld [vmem:[%s8060_s2 + $0x38] sm:$0xff] }
 0x122   : > { %3751 = vmatpush.bf16.msrb.mxu3 %v5141_v32  ;;  %1340 = vst [vmem:[#allocation2 + $0x78] sm:$0xf] %v1339_v20 }
 0x123   : > { %v3194_v38 = vld [vmem:[#allocation2 + $0x74] sm:$0x8]  ;;  %v3108_v0 = vsel %vm5666_vm8, %v5986_v58, %v3107_v29  ;;  %v8077_v8 = vshrl.u32 %v5988_v61, 16  ;;  %v8076_v35 = vshll.u32 %v5988_v61, 16  ;;  %2342 = vst.msk [vmem:[#allocation2 + $0x94] sm:$0xf] %vm1311_vm0, %v5988_v61  ;;  %2390 = vrot.lane.b32.xlu1 %v5830_v24, %s5303_s27  ;;  %2944 = vrot.lane.b32.xlu0 %v5801_v60, %s5304_s29  ;;  %v2039_v36 = vpop.permute.xlu2 %2038  ;;  %v967_v48 = vmul.f32 %v5606_v47, %v903_v62 }
 0x124   : > { %v3195_v4 = vsel %vm5708_vm11, 0, %v3194_v38  ;;  %3109 = vst [vmem:[#allocation2 + $0x80] sm:$0xf] %v3108_v0  ;;  %v2137_v42 = vsel %vm5994_vm15, %v2039_v36, %v2136_v19  ;;  %v817_v19 = vadd.f32 %v816_v55, %v727_v43  ;;  %v3110_v38 = vld [vmem:[#allocation2 + $0x8c] sm:$0xf]  ;;  %v2016_v55 = vor.u32 %v2014_v37, %v2013_v6 }
 0x125   : > { %3196 = vst [vmem:[#allocation2 + $0x74] sm:$0x8] %v3195_v4  ;;  %v1679_v60 = vrot.slane %v8077_v8, 4  ;;  %v1680_v23 = vrot.slane %v8076_v35, 5  ;;  %5003 = vmatmul.msk.bf16.gmra.mxu1 %vm3702_vm12, %v4783_v59  ;;  %v1003_v29 = vadd.f32 %v5611_v50, %v967_v48 }
 0x126   : > { %2138 = vst [vmem:[#allocation2] sm:$0xf] %v2137_v42  ;;  %v856_v51 = vpop.f32.mrf.mxu3  ;;  %3752 = vmatpush.bf16.msrb.mxu3 %v5140_v13 }
 0x127   : > { %v1681_v62 = vor.u32 %v1680_v23, %v1679_v60  ;;  %v1035_v54 = vmax.f32 %v1003_v29, 0.0  ;;  %v6032_v0 = vadd.f32 %v856_v51, %v5767_v9  ;;  %v6044_v9 = vrot.slane %v1136_v52, 4 }
 0x128   : > { %v905_v36 = vpop.f32.mrf.mxu2  ;;  %v729_v4 = vpop.f32.mrf.mxu0 }
 0x129   : > { %v6034_v59 = vrot.slane %v1681_v62, 4  ;;  %v6036_v43 = vpack.c.bf16 %v1035_v54, %v1035_v54  ;;  %1759 = vrot.lane.b32.xlu2 %v5830_v24, %s5305_s28  ;;  %v906_v48 = vadd.f32 %v905_v36, %v817_v19  ;;  %v818_v42 = vpop.f32.mrf.mxu1  ;;  %v4794_v19 = vld [vmem:[#allocation2 + $0x68] sm:$0xf]  ;;  %v1664_v62 = vrot.slane %v1139_v16, 5 }
 0x12a   : > { %v819_v36 = vadd.f32 %v818_v42, %v729_v4  ;;  %v5139_v16 = vld [vmem:[%s8060_s2 + $0x28] sm:$0xff]  ;;  %v3113_v4 = vld [vmem:[#allocation2 + $0x98] sm:$0xf] }
 0x12b   : > { %v3197_v20 = vld [vmem:[#allocation2 + $0x80] sm:$0x8]  ;;  %v3111_v60 = vsel %vm5666_vm8, %v6034_v59, %v3110_v38  ;;  %v8075_v37 = vshrl.u32 %v6036_v43, 16  ;;  %v8074_v52 = vshll.u32 %v6036_v43, 16  ;;  %2343 = vst.msk [vmem:[#allocation2 + $0xa0] sm:$0xf] %vm1311_vm0, %v6036_v43  ;;  %2052 = vrot.lane.b32.xlu1 %v2016_v55, %s5304_s29  ;;  %2680 = vrot.lane.b32.xlu0 %v5863_v11, %s5305_s28  ;;  %v1521_v6 = vpop.permute.xlu2 %1520  ;;  %v968_v23 = vmul.f32 %v5606_v47, %v906_v48 }
 0x12c   : > { %v3198_v29 = vsel %vm5708_vm11, 0, %v3197_v20  ;;  %3112 = vst [vmem:[#allocation2 + $0x8c] sm:$0xf] %v3111_v60  ;;  %v5100_v32 = vld [vmem:[#allocation2 + $0x70] sm:$0xf0]  ;;  %3753 = vmatpush.bf16.msrb.mxu3 %v5139_v16 }
 0x12d   : > { %3199 = vst [vmem:[#allocation2 + $0x80] sm:$0x8] %v3198_v29  ;;  %v2234_v54 = vld [vmem:[#allocation2] sm:$0x1]  ;;  %v1683_v51 = vrot.slane %v8075_v37, 4  ;;  %v1684_v38 = vrot.slane %v8074_v52, 5  ;;  %v1004_v47 = vadd.f32 %v5611_v50, %v968_v23  ;;  %v1665_v23 = vor.u32 %v1664_v62, %v6044_v9 }
 0x12e   : > { %v2235_v48 = vsel %vm6054_vm10, 0, %v2234_v54  ;;  %1604 = vst.msk [vmem:[#allocation2 + $0x18] sm:$0xf] %vm8083_vm1, %v1521_v6  ;;  %v1427_v20 = vld [vmem:[#allocation2 + $0x6c] sm:$0x1]  ;;  %v6081_v29 = vpop.f32.mrf.mxu3  ;;  %v5149_v54 = vld [vmem:[%s8060_s2 + $0x78] sm:$0xff] }
 0x12f   : > { %2236 = vst [vmem:[#allocation2] sm:$0x1] %v2235_v48  ;;  %v1685_v13 = vor.u32 %v1684_v38, %v1683_v51  ;;  %v1036_v60 = vmax.f32 %v1004_v47, 0.0  ;;  %v1428_v21 = vsel %vm5655_vm7, 0, %v1427_v20  ;;  %v1430_v50 = vld [vmem:[#allocation2 + $0x78] sm:$0x1]  ;;  %v4795_v47 = vor.u32 %v5100_v32, %v4794_v19  ;;  %3840 = vmatpush.bf16.msrb.mxu0 %v5149_v54 }
 0x130   : > { %v907_v42 = vpop.f32.mrf.mxu2  ;;  %1429 = vst [vmem:[#allocation2 + $0x6c] sm:$0x1] %v1428_v21  ;;  %v1431_v6 = vsel %vm5655_vm7, 0, %v1430_v50  ;;  %v732_v20 = vpop.f32.mrf.mxu0  ;;  %v6112_v19 = vld [vmem:[%s8062_s4] ss:$0 sm:$0xff]  ;;  %v1152_v54 = vrot.slane %v1150_v17, 7 }
 0x131   : > { %v6091_v51 = vrot.slane %v1685_v13, 4  ;;  %v6093_v38 = vpack.c.bf16 %v1036_v60, %v1036_v60  ;;  %2946 = vrot.lane.b32.xlu2 %v5832_v25, %s5304_s29  ;;  %v908_v48 = vadd.f32 %v907_v42, %v819_v36  ;;  %1432 = vst [vmem:[#allocation2 + $0x78] sm:$0x1] %v1431_v6  ;;  %v821_v21 = vpop.f32.mrf.mxu1  ;;  %v842_v36 = vadd.f32 %v5828_v14, %v5601_v46  ;;  %v6129_v46 = vld [vmem:[%s8063_s5] ss:$0 sm:$0xff]  ;;  %v5148_v6 = vld [vmem:[%s8060_s2 + $0x70] sm:$0xff] }
 0x132   : > { %v822_v42 = vadd.f32 %v821_v21, %v732_v20  ;;  %v5137_v17 = vld [vmem:[%s8060_s2 + $0x18] sm:$0xff] }
 0x133   : > { %v3200_v9 = vld [vmem:[#allocation2 + $0x8c] sm:$0x8]  ;;  %v3114_v62 = vsel %vm5666_vm8, %v6091_v51, %v3113_v4  ;;  %v8073_v16 = vshrl.u32 %v6093_v38, 16  ;;  %v8071_v13 = vshll.u32 %v6093_v38, 16  ;;  %2344 = vst.msk [vmem:[#allocation2 + $0xac] sm:$0xf] %vm1311_vm0, %v6093_v38  ;;  %2682 = vrot.lane.b32.xlu1 %v2016_v55, %s5305_s28  ;;  %2050 = vrot.lane.b32.xlu0 %v5863_v11, %s5304_s29  ;;  %v6107_v25 = vpop.permute.xlu2 %2934  ;;  %v969_v32 = vmul.f32 %v6112_v19, %v908_v48 }
 0x134   : > { %v3201_v60 = vsel %vm5708_vm11, 0, %v3200_v9  ;;  %3115 = vst [vmem:[#allocation2 + $0x98] sm:$0xf] %v3114_v62  ;;  %v6119_v55 = vrot.slane %v1665_v23, 4  ;;  %v5138_v23 = vld [vmem:[%s8060_s2 + $0x20] sm:$0xff]  ;;  %3841 = vmatpush.bf16.msrb.mxu0 %v5148_v6 }
 0x135   : > { %3202 = vst [vmem:[#allocation2 + $0x8c] sm:$0x8] %v3201_v60  ;;  %v1687_v11 = vrot.slane %v8073_v16, 4  ;;  %v1688_v50 = vrot.slane %v8071_v13, 5  ;;  %v1519_v4 = vpop.permute.xlu0 %1518  ;;  %5004 = vmatmul.msk.bf16.gmra.mxu1 %vm3702_vm12, %v4795_v47  ;;  %v1005_v14 = vadd.f32 %v6129_v46, %v969_v32  ;;  %3754 = vmatpush.bf16.msrb.mxu3 %v5138_v23  ;;  %v3116_v62 = vld [vmem:[#allocation2 + $0xa4] sm:$0xf] }
 0x136   : > { %1603 = vst.msk [vmem:[#allocation2 + $0xc] sm:$0xf] %vm8083_vm1, %v1519_v4  ;;  %v930_v9 = vpop.f32.mrf.mxu3  ;;  %v1341_v23 = vld [vmem:[#allocation2 + $0x84] sm:$0xf]  ;;  %v4806_v52 = vld [vmem:[#allocation2 + $0x80] sm:$0xf] }
 0x137   : > { %v1689_v47 = vor.u32 %v1688_v50, %v1687_v11  ;;  %v1037_v48 = vmax.f32 %v1005_v14, 0.0  ;;  %v931_v32 = vadd.f32 %v930_v9, %v842_v36  ;;  %v6159_v14 = vor.u32 %v1153_v18, %v1152_v54  ;;  %v2476_v54 = vld [vmem:[#allocation2 + $0x4] sm:$0xf] }
 0x138   : > { %v910_v20 = vpop.f32.mrf.mxu2  ;;  %v734_v13 = vpop.f32.mrf.mxu0 }
 0x139   : > { %v6141_v21 = vrot.slane %v1689_v47, 4  ;;  %v6143_v60 = vpack.c.bf16 %v1037_v48, %v1037_v48  ;;  %1761 = vrot.lane.b32.xlu2 %v6119_v55, %s5305_s28  ;;  %v911_v4 = vadd.f32 %v910_v20, %v822_v42  ;;  %v978_v36 = vmul.f32 %v6112_v19, %v931_v32  ;;  %v823_v50 = vpop.f32.mrf.mxu1  ;;  %3755 = vmatpush.bf16.msrb.mxu3 %v5137_v17 }
 0x13b   : > { %v3203_v6 = vld [vmem:[#allocation2 + $0x98] sm:$0x8]  ;;  %v3117_v47 = vsel %vm5666_vm8, %v6141_v21, %v3116_v62  ;;  %v8079_v48 = vshrl.u32 %v6143_v60, 16  ;;  %v8078_v9 = vshll.u32 %v6143_v60, 16  ;;  %2345 = vst.msk [vmem:[#allocation2 + $0xb8] sm:$0xf] %vm1311_vm0, %v6143_v60  ;;  %2392 = vrot.lane.b32.xlu0 %v5865_v26, %s5303_s27  ;;  %v1523_v18 = vpop.permute.xlu2 %1522  ;;  %1532 = vrot.lane.b32.xlu1 %v5867_v3, %s5303_s27  ;;  %v970_v32 = vmul.f32 %v6112_v19, %v911_v4 }
 0x13c   : > { %v844_v62 = vadd.f32 %v5855_v63, %v5621_v57  ;;  %v3204_v20 = vsel %vm5708_vm11, 0, %v3203_v6  ;;  %3118 = vst [vmem:[#allocation2 + $0xa4] sm:$0xf] %v3117_v47  ;;  %v1014_v16 = vadd.f32 %v6129_v46, %v978_v36  ;;  %v824_v63 = vadd.f32 %v823_v50, %v734_v13  ;;  %v5103_v6 = vld [vmem:[#allocation2 + $0x88] sm:$0xf0] }
 0x13d   : > { %3205 = vst [vmem:[#allocation2 + $0x98] sm:$0x8] %v3204_v20  ;;  %v2366_v26 = vrot.slane %v8079_v48, 4  ;;  %v2367_v3 = vrot.slane %v8078_v9, 5  ;;  %v2379_v37 = vpop.permute.xlu1 %2378  ;;  %v1748_v4 = vpop.permute.xlu0 %1747  ;;  %v1834_v35 = vld [vmem:[#allocation2 + $0xc] sm:$0xf]  ;;  %v1006_v57 = vadd.f32 %v6129_v46, %v970_v32  ;;  %v1342_v47 = vsel %vm5635_vm3, %v6159_v14, %v1341_v23 }
 0x13e   : > { %v1046_v8 = vmax.f32 %v1014_v16, 0.0  ;;  %1605 = vst.msk [vmem:[#allocation2 + $0x24] sm:$0xf] %vm8083_vm1, %v1523_v18  ;;  %v2477_v36 = vsel %vm6152_vm4, %v2379_v37, %v2476_v54  ;;  %v1835_v17 = vsel %vm6163_vm14, %v1748_v4, %v1834_v35  ;;  %v932_v48 = vpop.f32.mrf.mxu3  ;;  %v3119_v13 = vld [vmem:[#allocation2 + $0xb0] sm:$0xf]  ;;  %v4807_v35 = vor.u32 %v5103_v6, %v4806_v52 }
 0x13f   : > { %v2368_v20 = vor.u32 %v2367_v3, %v2366_v26  ;;  %2478 = vst [vmem:[#allocation2 + $0x4] sm:$0xf] %v2477_v36  ;;  %v1038_v9 = vmax.f32 %v1006_v57, 0.0  ;;  %v933_v50 = vadd.f32 %v932_v48, %v844_v62  ;;  %v5147_v3 = vld [vmem:[%s8060_s2 + $0x68] sm:$0xff] }
 0x140   : > { %v6197_v16 = vpack.c.bf16 %v1046_v8, %v1046_v8  ;;  %1836 = vst [vmem:[#allocation2 + $0xc] sm:$0xf] %v1835_v17  ;;  %v912_v18 = vpop.f32.mrf.mxu2  ;;  %3842 = vmatpush.bf16.msrb.mxu0 %v5147_v3 }
 0x141   : > { %v6199_v37 = vrot.slane %v2368_v20, 4  ;;  %v6201_v54 = vpack.c.bf16 %v1038_v9, %v1038_v9  ;;  %1534 = vrot.lane.b32.xlu2 %v5895_v30, %s5303_s27  ;;  %v913_v23 = vadd.f32 %v912_v18, %v824_v63  ;;  %v737_v32 = vpop.f32.mrf.mxu0  ;;  %1343 = vst [vmem:[#allocation2 + $0x84] sm:$0xf] %v1342_v47  ;;  %v979_v8 = vmul.f32 %v6112_v19, %v933_v50  ;;  %v826_v26 = vpop.f32.mrf.mxu1  ;;  %v2479_v63 = vld [vmem:[#allocation2 + $0x10] sm:$0xf] }
 0x142   : > { %8158 = vst [vmem:[#allocation6_spill] sm:$0xff] %v6197_v16  ;;  %v827_v47 = vadd.f32 %v826_v26, %v737_v32  ;;  %v1159_v20 = vrot.slane %v1157_v22, 7 }
 0x143   : > { %8159 = vst [vmem:[#allocation7_spill] sm:$0xff] %v6199_v37  ;;  %v3206_v48 = vld [vmem:[#allocation2 + $0xa4] sm:$0x8]  ;;  %v3120_v9 = vsel %vm5666_vm8, %v6199_v37, %v3119_v13  ;;  %v1525_v62 = vpop.permute.xlu2 %1524  ;;  %2394 = vrot.lane.b32.xlu1 %v6119_v55, %s5303_s27  ;;  %2054 = vrot.lane.b32.xlu0 %v5980_v45, %s5304_s29  ;;  %v971_v52 = vmul.f32 %v6112_v19, %v913_v23  ;;  %v5136_v23 = vld [vmem:[%s8060_s2 + $0x10] sm:$0xff]  ;;  %v3122_v37 = vld [vmem:[#allocation2 + $0xc8] sm:$0xf] }
 0x144   : > { %8160 = vst [vmem:[#allocation8_spill] sm:$0xff] %v6201_v54  ;;  %v3207_v57 = vsel %vm5708_vm11, 0, %v3206_v48  ;;  %v1015_v55 = vadd.f32 %v6129_v46, %v979_v8  ;;  %3756 = vmatpush.bf16.msrb.mxu3 %v5136_v23  ;;  %v6273_v23 = vld [vmem:[#allocation2 + $0x98] sm:$0xf] }
 0x145   : > { %2354 = vst.msk [vmem:[#allocation2 + $0x124] sm:$0xf] %vm1311_vm0, %v6197_v16  ;;  %v2381_v36 = vpop.permute.xlu1 %2380  ;;  %v6236_v17 = vpop.permute.xlu0 %2040  ;;  %5005 = vmatmul.msk.bf16.gmra.mxu1 %vm3702_vm12, %v4807_v35  ;;  %v1007_v6 = vadd.f32 %v6129_v46, %v971_v52  ;;  %v5146_v52 = vld [vmem:[%s8060_s2 + $0x60] sm:$0xff] }
 0x146   : > { %2346 = vst.msk [vmem:[#allocation2 + $0xc4] sm:$0xf] %vm1311_vm0, %v6201_v54  ;;  %v2574_v13 = vld [vmem:[#allocation2 + $0x4] sm:$0x8]  ;;  %v1047_v50 = vmax.f32 %v1015_v55, 0.0  ;;  %v2480_v18 = vsel %vm6152_vm4, %v2381_v36, %v2479_v63  ;;  %v935_v26 = vpop.f32.mrf.mxu3  ;;  %v6264_v36 = vor.u32 %v1160_v1, %v1159_v20  ;;  %3843 = vmatpush.bf16.msrb.mxu0 %v5146_v52  ;;  %v5135_v1 = vld [vmem:[%s8060_s2 + $0x8] sm:$0xff] }
 0x147   : > { %3121 = vst [vmem:[#allocation2 + $0xb0] sm:$0xf] %v3120_v9  ;;  %v2575_v35 = vsel %vm6223_vm13, 0, %v2574_v13  ;;  %v1926_v8 = vld [vmem:[#allocation2 + $0xc] sm:$0x8]  ;;  %v1039_v32 = vmax.f32 %v1007_v6, 0.0  ;;  %v936_v9 = vadd.f32 %v935_v26, %v5893_v28 }
 0x148   : > { %3208 = vst [vmem:[#allocation2 + $0xa4] sm:$0x8] %v3207_v57  ;;  %v1927_v22 = vsel %vm6232_vm2, 0, %v1926_v8  ;;  %v6252_v48 = vpack.c.bf16 %v1047_v50, %v1047_v50  ;;  %v1433_v55 = vld [vmem:[#allocation2 + $0x84] sm:$0x1]  ;;  %3757 = vmatpush.bf16.msrb.mxu3 %v5135_v1 }
 0x149   : > { %1606 = vst.msk [vmem:[#allocation2 + $0x30] sm:$0xf] %vm8083_vm1, %v1525_v62  ;;  %v915_v62 = vpop.f32.mrf.mxu2  ;;  %v6258_v3 = vpack.c.bf16 %v1039_v32, %v1039_v32  ;;  %2684 = vrot.lane.b32.xlu2 %v5984_v41, %s5305_s28  ;;  %v739_v63 = vpop.f32.mrf.mxu0  ;;  %v1344_v28 = vld [vmem:[#allocation2 + $0x90] sm:$0xf]  ;;  %v980_v50 = vmul.f32 %v6112_v19, %v936_v9  ;;  %vm6301_vm1 = vmand %vm8168_vm6, %vm8167_vm9  ;;  %vm8173_vm9 = vsmask.f32 256 }
 0x14a   : > { %2481 = vst [vmem:[#allocation2 + $0x10] sm:$0xf] %v2480_v18  ;;  %v916_v57 = vadd.f32 %v915_v62, %v827_v47  ;;  %v8085_v6 = vshrl.u32 %v6252_v48, 16  ;;  %v8084_v13 = vshll.u32 %v6252_v48, 16  ;;  %v828_v18 = vpop.f32.mrf.mxu1  ;;  %v1434_v47 = vsel %vm5655_vm7, 0, %v1433_v55  ;;  %vm6380_vm6 = vmand %vm2844_vm5, %vm8173_vm9 }
 0x14b   : > { %2576 = vst [vmem:[#allocation2 + $0x4] sm:$0x8] %v2575_v35  ;;  %v8088_v35 = vshrl.u32 %v6258_v3, 16  ;;  %v8091_v8 = vshll.u32 %v6258_v3, 16  ;;  %v6282_v32 = vpop.permute.xlu2 %2938  ;;  %2948 = vrot.lane.b32.xlu1 %v5895_v30, %s5304_s29  ;;  %1536 = vrot.lane.b32.xlu0 %v5921_v12, %s5303_s27  ;;  %v1016_v55 = vadd.f32 %v6129_v46, %v980_v50  ;;  %v5145_v30 = vld [vmem:[%s8060_s2 + $0x58] sm:$0xff]  ;;  %vm8178_vm5 = vcmask 1044224  }
 0x14c   : > { %8165 = vst [vmem:[#allocation9_spill] sm:$0xff] %v6252_v48  ;;  %v972_v26 = vmul.f32 %v6112_v19, %v916_v57  ;;  %v1723_v62 = vrot.slane %v8085_v6, 4  ;;  %v1724_v52 = vrot.slane %v8084_v13, 5  ;;  %v1345_v6 = vsel %vm5635_vm3, %v6264_v36, %v1344_v28  ;;  %3844 = vmatpush.bf16.msrb.mxu0 %v5145_v30  ;;  %vm8186_vm9 = vmmov %vm8178_vm5 }
 0x14d   : > { %1928 = vst [vmem:[#allocation2 + $0xc] sm:$0x8] %v1927_v22  ;;  %v829_v22 = vadd.f32 %v828_v18, %v739_v63  ;;  %v3143_v63 = vld [vmem:[#allocation2 + $0x128] sm:$0xf]  ;;  %v1695_v18 = vrot.slane %v8088_v35, 4  ;;  %v1696_v50 = vrot.slane %v8091_v8, 5  ;;  %v2671_v1 = vpop.permute.xlu0 %2670 }
 0x14e   : > { %8166 = vst [vmem:[#allocation10_spill] sm:$0xff] %v6258_v3  ;;  %v3209_v20 = vld [vmem:[#allocation2 + $0xb0] sm:$0x8]  ;;  %v1725_v35 = vor.u32 %v1724_v52, %v1723_v62  ;;  %v1048_v8 = vmax.f32 %v1016_v55, 0.0 }
 0x14f   : > { %2355 = vst.msk [vmem:[#allocation2 + $0x130] sm:$0xf] %vm1311_vm0, %v6252_v48  ;;  %v3210_v9 = vsel %vm5708_vm11, 0, %v3209_v20  ;;  %v1008_v20 = vadd.f32 %v6129_v46, %v972_v26  ;;  %v5106_v13 = vld [vmem:[#allocation2 + $0xa0] sm:$0xf0]  ;;  %v6319_v48 = vadd.f32 %v5943_v39, %v5699_v5  ;;  %v1697_v28 = vor.u32 %v1696_v50, %v1695_v18 }
 0x150   : > { %2347 = vst.msk [vmem:[#allocation2 + $0xd0] sm:$0xf] %vm1311_vm0, %v6258_v3  ;;  %v5134_v26 = vld [vmem:[%s8060_s2] sm:$0xff]  ;;  %v4819_v5 = vor.u32 %v5106_v13, %v6273_v23  ;;  %v6327_v39 = vrot.slane %v1725_v35, 4  ;;  %v6329_v52 = vpack.c.bf16 %v1048_v8, %v1048_v8 }
 0x151   : > { %1435 = vst [vmem:[#allocation2 + $0x84] sm:$0x1] %v1434_v47  ;;  %v6309_v47 = vpop.permute.xlu1 %2672  ;;  %v2577_v3 = vld [vmem:[#allocation2 + $0x10] sm:$0x8]  ;;  %v917_v30 = vpop.f32.mrf.mxu2  ;;  %3758 = vmatpush.bf16.msrb.mxu3 %v5134_v26  ;;  %v6339_v23 = vrot.slane %v1697_v28, 4  ;;  %2396 = vrot.lane.b32.xlu2 %v5919_v33, %s5303_s27 }
 0x152   : > { %3211 = vst [vmem:[#allocation2 + $0xb0] sm:$0x8] %v3210_v9  ;;  %v849_v9 = vadd.f32 %v5915_v2, %v5659_v34  ;;  %v2578_v16 = vsel %vm6223_vm13, 0, %v2577_v3  ;;  %v2755_v54 = vld [vmem:[#allocation2 + $0x4] sm:$0xf]  ;;  %v1040_v34 = vmax.f32 %v1008_v20, 0.0  ;;  %v937_v2 = vpop.f32.mrf.mxu3  ;;  %v3144_v35 = vsel %vm5666_vm8, %v6327_v39, %v3143_v63  ;;  %v742_v50 = vpop.f32.mrf.mxu0 }
 0x153   : > { %1346 = vst [vmem:[#allocation2 + $0x90] sm:$0xf] %v1345_v6  ;;  %v2756_v55 = vsel %vm6301_vm1, %v2671_v1, %v2755_v54  ;;  %v5144_v3 = vld [vmem:[%s8060_s2 + $0x50] sm:$0xff]  ;;  %v918_v54 = vadd.f32 %v917_v30, %v829_v22  ;;  %v8098_v8 = vshrl.u32 %v6329_v52, 16  ;;  %v8097_v18 = vshll.u32 %v6329_v52, 16  ;;  %v2385_v63 = vpop.permute.xlu2 %2384  ;;  %2056 = vrot.lane.b32.xlu1 %v5984_v41, %s5304_s29  ;;  %2686 = vrot.lane.b32.xlu0 %v6159_v14, %s5305_s28 }
 0x154   : > { %8171 = vst [vmem:[#allocation11_spill] sm:$0xff] %v6327_v39  ;;  %v2139_v62 = vld [vmem:[#allocation2 + $0xc] sm:$0xf]  ;;  %v938_v6 = vadd.f32 %v937_v2, %v849_v9  ;;  %3845 = vmatpush.bf16.msrb.mxu0 %v5144_v3  ;;  %v3123_v1 = vsel %vm5666_vm8, %v6339_v23, %v3122_v37  ;;  %v2485_v9 = vld [vmem:[#allocation2 + $0x28] sm:$0xf]  ;;  %v831_v2 = vpop.f32.mrf.mxu1 }
 0x155   : > { %2579 = vst [vmem:[#allocation2 + $0x10] sm:$0x8] %v2578_v16  ;;  %v2140_v13 = vsel %vm5994_vm15, %v6236_v17, %v2139_v62  ;;  %v6341_v16 = vpack.c.bf16 %v1040_v34, %v1040_v34  ;;  %v973_v26 = vmul.f32 %v6112_v19, %v918_v54  ;;  %v1727_v28 = vrot.slane %v8098_v8, 4  ;;  %v1840_v30 = vld [vmem:[#allocation2 + $0x24] sm:$0xf]  ;;  %v6374_v3 = vpop.permute.xlu0 %1749  ;;  %5006 = vmatmul.msk.bf16.gmra.mxu1 %vm3702_vm12, %v4819_v5 }
 0x156   : > { %8172 = vst [vmem:[#allocation12_spill] sm:$0xff] %v6329_v52  ;;  %v981_v17 = vmul.f32 %v6112_v19, %v938_v6  ;;  %v1728_v37 = vrot.slane %v8097_v18, 5  ;;  %v2486_v62 = vsel %vm6152_vm4, %v2385_v63, %v2485_v9  ;;  %v832_v54 = vadd.f32 %v831_v2, %v742_v50  ;;  %v3125_v8 = vld [vmem:[#allocation2 + $0xd4] sm:$0xf]  ;;  %v4738_v39 = vld [vmem:[#allocation2] sm:$0xf] }
 0x157   : > { %2757 = vst [vmem:[#allocation2 + $0x4] sm:$0xf] %v2756_v55  ;;  %v8100_v22 = vshrl.u32 %v6341_v16, 16  ;;  %v8099_v20 = vshll.u32 %v6341_v16, 16 }
 0x158   : > { %2141 = vst [vmem:[#allocation2 + $0xc] sm:$0xf] %v2140_v13  ;;  %v1017_v34 = vadd.f32 %v6129_v46, %v981_v17  ;;  %v1009_v13 = vadd.f32 %v6129_v46, %v973_v26  ;;  %v3146_v17 = vld [vmem:[#allocation2 + $0x134] sm:$0xf] }
 0x159   : > { %3145 = vst [vmem:[#allocation2 + $0x128] sm:$0xf] %v3144_v35  ;;  %v1699_v41 = vrot.slane %v8100_v22, 4  ;;  %v1700_v55 = vrot.slane %v8099_v20, 5  ;;  %v1752_v6 = vpop.permute.xlu1 %1751  ;;  %v1729_v35 = vor.u32 %v1728_v37, %v1727_v28  ;;  %v920_v22 = vpop.f32.mrf.mxu2  ;;  %2950 = vrot.lane.b32.xlu2 %v5921_v12, %s5304_s29 }
 0x15a   : > { %3124 = vst [vmem:[#allocation2 + $0xc8] sm:$0xf] %v3123_v1  ;;  %v1049_v9 = vmax.f32 %v1017_v34, 0.0  ;;  %v1841_v63 = vsel %vm6163_vm14, %v1752_v6, %v1840_v30  ;;  %v1041_v26 = vmax.f32 %v1009_v13, 0.0  ;;  %v940_v50 = vpop.f32.mrf.mxu3 }
 0x15b   : > { %2356 = vst.msk [vmem:[#allocation2 + $0x13c] sm:$0xf] %vm1311_vm0, %v6329_v52  ;;  %v1701_v5 = vor.u32 %v1700_v55, %v1699_v41  ;;  %v6388_v28 = vrot.slane %v1729_v35, 4  ;;  %v941_v34 = vadd.f32 %v940_v50, %v6319_v48  ;;  %1763 = vrot.lane.b32.xlu1 %v5919_v33, %s5305_s28  ;;  %2398 = vrot.lane.b32.xlu0 %v5945_v10, %s5303_s27 }
 0x15c   : > { %2348 = vst.msk [vmem:[#allocation2 + $0xdc] sm:$0xf] %vm1311_vm0, %v6341_v16  ;;  %v2758_v18 = vld [vmem:[#allocation2 + $0x10] sm:$0xf]  ;;  %v6393_v20 = vpack.c.bf16 %v1049_v9, %v1049_v9  ;;  %v6400_v55 = vpack.c.bf16 %v1041_v26, %v1041_v26 }
 0x15d   : > { %2487 = vst [vmem:[#allocation2 + $0x28] sm:$0xf] %v2486_v62  ;;  %v2759_v37 = vsel %vm6301_vm1, %v6309_v47, %v2758_v18  ;;  %v6398_v41 = vrot.slane %v1701_v5, 4  ;;  %v921_v47 = vadd.f32 %v920_v22, %v832_v54  ;;  %v982_v13 = vmul.f32 %v6112_v19, %v941_v34  ;;  %v6414_v22 = vpop.permute.xlu2 %1755 }
 0x15e   : > { %8176 = vst [vmem:[#allocation13_spill] sm:$0xff] %v6388_v28  ;;  %v2846_v2 = vld [vmem:[#allocation2 + $0x4] sm:$0x1]  ;;  %v8102_v48 = vshrl.u32 %v6393_v20, 16  ;;  %v8101_v12 = vshll.u32 %v6393_v20, 16  ;;  %v8108_v50 = vshll.u32 %v6400_v55, 16 }
 0x15f   : > { %1842 = vst [vmem:[#allocation2 + $0x24] sm:$0xf] %v1841_v63  ;;  %v2237_v6 = vld [vmem:[#allocation2 + $0xc] sm:$0x1]  ;;  %v2847_v62 = vsel %vm6380_vm6, 0, %v2846_v2  ;;  %v3147_v63 = vsel %vm5666_vm8, %v6388_v28, %v3146_v17  ;;  %v974_v54 = vmul.f32 %v6112_v19, %v921_v47  ;;  %v8105_v17 = vshrl.u32 %v6400_v55, 16 }
 0x160   : > { %2760 = vst [vmem:[#allocation2 + $0x10] sm:$0xf] %v2759_v37  ;;  %v3233_v18 = vld [vmem:[#allocation2 + $0x128] sm:$0x8]  ;;  %v2238_v30 = vsel %vm6054_vm10, 0, %v2237_v6  ;;  %v1731_v26 = vrot.slane %v8102_v48, 4  ;;  %v3126_v33 = vsel %vm5666_vm8, %v6398_v41, %v3125_v8  ;;  %v1018_v2 = vadd.f32 %v6129_v46, %v982_v13  ;;  %v6435_v6 = vpop.permute.xlu0 %2936  ;;  %v744_v13 = vpop.f32.mrf.mxu0 }
 0x161   : > { %8177 = vst [vmem:[#allocation14_spill] sm:$0xff] %v6398_v41  ;;  %v3234_v35 = vsel %vm5708_vm11, 0, %v3233_v18  ;;  %v3212_v9 = vld [vmem:[#allocation2 + $0xc8] sm:$0x8]  ;;  %v1732_v37 = vrot.slane %v8101_v12, 5  ;;  %v6433_v34 = vpop.permute.xlu1 %2382  ;;  %v854_v47 = vadd.f32 %v5976_v27, %v5733_v40  ;;  %v1703_v8 = vrot.slane %v8105_v17, 4  ;;  %2058 = vrot.lane.b32.xlu2 %v6159_v14, %s5304_s29 }
 0x162   : > { %2848 = vst [vmem:[#allocation2 + $0x4] sm:$0x1] %v2847_v62  ;;  %v3213_v5 = vsel %vm5708_vm11, 0, %v3212_v9  ;;  %v1010_v62 = vadd.f32 %v6129_v46, %v974_v54  ;;  %v3149_v18 = vld [vmem:[#allocation2 + $0x140] sm:$0xf]  ;;  %v833_v9 = vpop.f32.mrf.mxu1  ;;  %v942_v48 = vpop.f32.mrf.mxu3 }
 0x163   : > { %2239 = vst [vmem:[#allocation2 + $0xc] sm:$0x1] %v2238_v30  ;;  %v1837_v40 = vld [vmem:[#allocation2 + $0x18] sm:$0xf]  ;;  %v6448_v27 = vld [vmem:[#allocation2 + $0xe0] sm:$0xf]  ;;  %v834_v52 = vadd.f32 %v833_v9, %v744_v13  ;;  %1538 = vrot.lane.b32.xlu1 %v5947_v56, %s5303_s27  ;;  %2060 = vrot.lane.b32.xlu0 %v6264_v36, %s5304_s29 }
 0x164   : > { %3235 = vst [vmem:[#allocation2 + $0x128] sm:$0x8] %v3234_v35  ;;  %v2583_v30 = vld [vmem:[#allocation2 + $0x28] sm:$0x8]  ;;  %v1704_v35 = vrot.slane %v8108_v50, 5  ;;  %v1042_v41 = vmax.f32 %v1010_v62, 0.0  ;;  %v943_v50 = vadd.f32 %v942_v48, %v854_v47  ;;  %v1838_v48 = vsel %vm6163_vm14, %v6374_v3, %v1837_v40 }
 0x165   : > { %3214 = vst [vmem:[#allocation2 + $0xc8] sm:$0x8] %v3213_v5  ;;  %v1733_v5 = vor.u32 %v1732_v37, %v1731_v26  ;;  %v2584_v54 = vsel %vm6223_vm13, 0, %v2583_v30 }
 0x166   : > { %3148 = vst [vmem:[#allocation2 + $0x134] sm:$0xf] %v3147_v63  ;;  %v1932_v12 = vld [vmem:[#allocation2 + $0x24] sm:$0x8]  ;;  %v1050_v63 = vmax.f32 %v1018_v2, 0.0  ;;  %v1705_v17 = vor.u32 %v1704_v35, %v1703_v8  ;;  %v6467_v62 = vpack.c.bf16 %v1042_v41, %v1042_v41  ;;  %v983_v47 = vmul.f32 %v6112_v19, %v943_v50 }
 0x167   : > { %3019 = vst.msk [vmem:[#allocation2 + $0x4] sm:$0xf] %vm8178_vm5, %v6107_v25  ;;  %v2849_v28 = vld [vmem:[#allocation2 + $0x10] sm:$0x1]  ;;  %v6452_v26 = vrot.slane %v1733_v5, 4  ;;  %v1933_v37 = vsel %vm6232_vm2, 0, %v1932_v12 }
 0x168   : > { %3127 = vst [vmem:[#allocation2 + $0xd4] sm:$0xf] %v3126_v33  ;;  %v2850_v25 = vsel %vm6380_vm6, 0, %v2849_v28  ;;  %v6458_v2 = vpack.c.bf16 %v1050_v63, %v1050_v63  ;;  %v922_v33 = vpop.f32.mrf.mxu2  ;;  %v6465_v28 = vrot.slane %v1705_v17, 4  ;;  %v5143_v12 = vld [vmem:[%s8060_s2 + $0x48] sm:$0xff]  ;;  %v6478_v17 = vpop.permute.xlu2 %1528  ;;  %v8115_v35 = vshrl.u32 %v6467_v62, 16 }
 0x169   : > { %8179 = vst [vmem:[#allocation15_spill] sm:$0xff] %v6452_v26  ;;  %v3150_v14 = vsel %vm5666_vm8, %v6452_v26, %v3149_v18  ;;  %v4830_v50 = vld [vmem:[#allocation2 + $0xb0] sm:$0xf]  ;;  %v8116_v9 = vshll.u32 %v6467_v62, 16  ;;  %v1019_v13 = vadd.f32 %v6129_v46, %v983_v47  ;;  %v5109_v5 = vld [vmem:[#allocation2 + $0xb8] sm:$0xf0]  ;;  %3846 = vmatpush.bf16.msrb.mxu0 %v5143_v12  ;;  %v6495_v63 = vpop.permute.xlu1 %2044  ;;  %1765 = vrot.lane.b32.xlu2 %v5945_v10, %s5305_s28 }
 0x16a   : > { %2357 = vst.msk [vmem:[#allocation2 + $0x148] sm:$0xf] %vm1311_vm0, %v6393_v20  ;;  %v5087_v30 = vld [vmem:[#allocation2 + $0x8] sm:$0xf0]  ;;  %v8114_v8 = vshrl.u32 %v6458_v2, 16  ;;  %v8113_v3 = vshll.u32 %v6458_v2, 16  ;;  %v3129_v18 = vsel %vm5666_vm8, %v6465_v28, %v6448_v27  ;;  %v6497_v27 = vpop.permute.xlu0 %2042 }
 0x16b   : > { %2851 = vst [vmem:[#allocation2 + $0x10] sm:$0x1] %v2850_v25  ;;  %v4739_v41 = vor.u32 %v5087_v30, %v4738_v39  ;;  %v4831_v25 = vor.u32 %v5109_v5, %v4830_v50  ;;  %v923_v30 = vadd.f32 %v922_v33, %v834_v52  ;;  %v1708_v12 = vrot.slane %v8116_v9, 5  ;;  %v945_v52 = vpop.f32.mrf.mxu3  ;;  %v747_v33 = vpop.f32.mrf.mxu0  ;;  %v3152_v5 = vld [vmem:[#allocation2 + $0x14c] sm:$0xf]  ;;  %2952 = vrot.lane.b32.xlu1 %v5947_v56, %s5304_s29 }
 0x16c   : > { %8180 = vst [vmem:[#allocation16_spill] sm:$0xff] %v6465_v28  ;;  %v1735_v39 = vrot.slane %v8114_v8, 4  ;;  %v1736_v40 = vrot.slane %v8113_v3, 5  ;;  %v2482_v8 = vld [vmem:[#allocation2 + $0x1c] sm:$0xf]  ;;  %v836_v9 = vpop.f32.mrf.mxu1  ;;  %1767 = vrot.lane.b32.xlu0 %v5986_v58, %s5305_s28  ;;  %vm8188_vm5 = vcmask 519424  }
 0x16d   : > { %2585 = vst [vmem:[#allocation2 + $0x28] sm:$0x8] %v2584_v54  ;;  %v3236_v54 = vld [vmem:[#allocation2 + $0x134] sm:$0x8]  ;;  %3759 = vmatmul.bf16.vlgmr.msrb.gmra.mxu3 %v4739_v41  ;;  %5007 = vmatmul.msk.bf16.gmra.mxu1 %vm3702_vm12, %v4831_v25  ;;  %v975_v50 = vmul.f32 %v6112_v19, %v923_v30  ;;  %v2483_v25 = vsel %vm6152_vm4, %v6433_v34, %v2482_v8  ;;  %v6549_v56 = vld [vmem:[#allocation2 + $0x90] sm:$0x1] }
 0x16e   : > { %3151 = vst [vmem:[#allocation2 + $0x140] sm:$0xf] %v3150_v14  ;;  %v3237_v47 = vsel %vm5708_vm11, 0, %v3236_v54  ;;  %v1051_v14 = vmax.f32 %v1019_v13, 0.0  ;;  %v1737_v41 = vor.u32 %v1736_v40, %v1735_v39  ;;  %v946_v13 = vadd.f32 %v945_v52, %v6032_v0  ;;  %v5142_v39 = vld [vmem:[%s8060_s2 + $0x40] sm:$0xff] }
 0x16f   : > { %1934 = vst [vmem:[#allocation2 + $0x24] sm:$0x8] %v1933_v37  ;;  %v1707_v37 = vrot.slane %v8115_v35, 4  ;;  %v3215_v3 = vld [vmem:[#allocation2 + $0xd4] sm:$0x8]  ;;  %v837_v30 = vadd.f32 %v836_v9, %v747_v33  ;;  %3847 = vmatpush.bf16.msrb.mxu0 %v5142_v39 }
 0x170   : > { %1839 = vst [vmem:[#allocation2 + $0x18] sm:$0xf] %v1838_v48  ;;  %v3216_v48 = vsel %vm5708_vm11, 0, %v3215_v3  ;;  %v6509_v35 = vpack.c.bf16 %v1051_v14, %v1051_v14  ;;  %v6515_v40 = vrot.slane %v1737_v41, 4  ;;  %v3131_v3 = vld [vmem:[#allocation2 + $0xec] sm:$0xf]  ;;  %v984_v14 = vmul.f32 %v6112_v19, %v946_v13  ;;  %v6535_v9 = vpop.permute.xlu2 %2942 }
 0x171   : > { %3238 = vst [vmem:[#allocation2 + $0x134] sm:$0x8] %v3237_v47  ;;  %v1709_v54 = vor.u32 %v1708_v12, %v1707_v37  ;;  %v925_v47 = vpop.f32.mrf.mxu2  ;;  %2688 = vrot.lane.b32.xlu2 %v6264_v36, %s5305_s28 }
 0x172   : > { %3130 = vst [vmem:[#allocation2 + $0xe0] sm:$0xf] %v3129_v18  ;;  %v1011_v18 = vadd.f32 %v6129_v46, %v975_v50  ;;  %v8118_v37 = vshrl.u32 %v6509_v35, 16  ;;  %v8117_v12 = vshll.u32 %v6509_v35, 16  ;;  %v3153_v8 = vsel %vm5666_vm8, %v6515_v40, %v3152_v5 }
 0x173   : > { %8181 = vst [vmem:[#allocation17_spill] sm:$0xff] %v6509_v35  ;;  %v6525_v0 = vrot.slane %v1709_v54, 4  ;;  %v926_v41 = vadd.f32 %v925_v47, %v837_v30  ;;  %v8184_v50 = vshrl.u32 %v5988_v61, 16  ;;  %v1020_v39 = vadd.f32 %v6129_v46, %v984_v14  ;;  %v6556_v30 = vpop.permute.xlu0 %2674  ;;  %2400 = vrot.lane.b32.xlu1 %v5986_v58, %s5303_s27 }
 0x174   : > { %3217 = vst [vmem:[#allocation2 + $0xd4] sm:$0x8] %v3216_v48  ;;  %v1043_v10 = vmax.f32 %v1011_v18, 0.0  ;;  %v1739_v48 = vrot.slane %v8118_v37, 4  ;;  %v1740_v5 = vrot.slane %v8117_v12, 5  ;;  %v6554_v18 = vpop.permute.xlu1 %1753  ;;  %v838_v58 = vpop.f32.mrf.mxu1 }
 0x175   : > { %8182 = vst [vmem:[#allocation18_spill] sm:$0xff] %v6515_v40  ;;  %v3239_v34 = vld [vmem:[#allocation2 + $0x140] sm:$0x8]  ;;  %v1166_v52 = vrot.slane %v8184_v50, 7  ;;  %v976_v47 = vmul.f32 %v6112_v19, %v926_v41  ;;  %v947_v40 = vpop.f32.mrf.mxu3 }
 0x176   : > { %2349 = vst.msk [vmem:[#allocation2 + $0xe8] sm:$0xf] %vm1311_vm0, %v6400_v55  ;;  %v3240_v33 = vsel %vm5708_vm11, 0, %v3239_v34  ;;  %v6551_v13 = vpack.c.bf16 %v1043_v10, %v1043_v10  ;;  %v859_v34 = vadd.f32 %v6081_v29, %v5795_v49  ;;  %v3132_v10 = vsel %vm5666_vm8, %v6525_v0, %v3131_v3 }
 0x177   : > { %8183 = vst [vmem:[#allocation19_spill] sm:$0xff] %v6525_v0  ;;  %v1929_v54 = vld [vmem:[#allocation2 + $0x18] sm:$0x8]  ;;  %v1741_v50 = vor.u32 %v1740_v5, %v1739_v48  ;;  %v1012_v41 = vadd.f32 %v6129_v46, %v976_v47  ;;  %v8185_v49 = vshll.u32 %v5988_v61, 16  ;;  %v1052_v48 = vmax.f32 %v1020_v39, 0.0 }
 0x178   : > { %2358 = vst.msk [vmem:[#allocation2 + $0x154] sm:$0xf] %vm1311_vm0, %v6458_v2  ;;  %v8122_v12 = vshrl.u32 %v6551_v13, 16  ;;  %v8121_v37 = vshll.u32 %v6551_v13, 16  ;;  %v948_v5 = vadd.f32 %v947_v40, %v859_v34  ;;  %v1437_v40 = vsel %vm5655_vm7, 0, %v6549_v56 }
 0x179   : > { %3154 = vst [vmem:[#allocation2 + $0x14c] sm:$0xf] %v3153_v8  ;;  %v1930_v8 = vsel %vm6232_vm2, 0, %v1929_v54  ;;  %v3218_v14 = vld [vmem:[#allocation2 + $0xe0] sm:$0x8]  ;;  %v6571_v29 = vor.u32 %v8185_v49, %v1166_v52  ;;  %v6577_v3 = vrot.slane %v1741_v50, 4  ;;  %v6591_v52 = vpack.c.bf16 %v1052_v48, %v1052_v48  ;;  %1540 = vrot.lane.b32.xlu2 %v5988_v61, %s5303_s27 }
 0x17a   : > { %3241 = vst [vmem:[#allocation2 + $0x140] sm:$0x8] %v3240_v33  ;;  %v3155_v33 = vld [vmem:[#allocation2 + $0x158] sm:$0xf]  ;;  %v1711_v54 = vrot.slane %v8122_v12, 4  ;;  %v1712_v47 = vrot.slane %v8121_v37, 5  ;;  %v985_v39 = vmul.f32 %v6112_v19, %v948_v5 }
 0x17b   : > { %2484 = vst [vmem:[#allocation2 + $0x1c] sm:$0xf] %v2483_v25  ;;  %v3219_v25 = vsel %vm5708_vm11, 0, %v3218_v14  ;;  %v2145_v50 = vld [vmem:[#allocation2 + $0x24] sm:$0xf]  ;;  %2690 = vrot.lane.b32.xlu0 %v6571_v29, %s5305_s28  ;;  %1769 = vrot.lane.b32.xlu1 %v6034_v59, %s5305_s28 }
 0x17c   : > { %1931 = vst [vmem:[#allocation2 + $0x18] sm:$0x8] %v1930_v8  ;;  %v1044_v8 = vmax.f32 %v1012_v41, 0.0  ;;  %v1713_v14 = vor.u32 %v1712_v47, %v1711_v54  ;;  %v8134_v41 = vshll.u32 %v6591_v52, 16  ;;  %v1021_v49 = vadd.f32 %v6129_v46, %v985_v39  ;;  %v3134_v5 = vld [vmem:[#allocation2 + $0xf8] sm:$0xf]  ;;  %v6612_v47 = vpop.permute.xlu1 %2676 }
 0x17d   : > { %3020 = vst.msk [vmem:[#allocation2 + $0x10] sm:$0xf] %vm8186_vm9, %v6435_v6  ;;  %v3156_v6 = vsel %vm5666_vm8, %v6577_v3, %v3155_v33  ;;  %v8127_v33 = vshrl.u32 %v6591_v52, 16  ;;  %v5086_v54 = vld [vmem:[#allocation2 + $0x4] sm:$0xf] }
 0x17e   : > { %8187 = vst [vmem:[#allocation20_spill] sm:$0xff] %v6577_v3  ;;  %v6596_v36 = vpack.c.bf16 %v1044_v8, %v1044_v8  ;;  %v6609_v48 = vrot.slane %v1713_v14, 4  ;;  %v6614_v8 = vpop.permute.xlu0 %1526  ;;  %v2146_v14 = vsel %vm5994_vm15, %v6495_v63, %v2145_v50  ;;  %v4842_v0 = vld [vmem:[#allocation2 + $0xc8] sm:$0xf] }
 0x17f   : > { %3220 = vst [vmem:[#allocation2 + $0xe0] sm:$0x8] %v3219_v25  ;;  %v1743_v39 = vrot.slane %v8127_v33, 4 }
 0x180   : > { %3133 = vst [vmem:[#allocation2 + $0xec] sm:$0xf] %v3132_v10  ;;  %v3242_v34 = vld [vmem:[#allocation2 + $0x14c] sm:$0x8]  ;;  %v6598_v10 = vpop.permute.xlu2 %2678  ;;  %v8139_v12 = vshll.u32 %v6596_v36, 16  ;;  %v8189_v26 = vshrl.u32 %v6596_v36, 16 }
 0x181   : > { %2350 = vst.msk [vmem:[#allocation2 + $0xf4] sm:$0xf] %vm1311_vm0, %v6467_v62  ;;  %v3243_v56 = vsel %vm5708_vm11, 0, %v3242_v34  ;;  %2954 = vrot.lane.b32.xlu2 %v5988_v61, %s5304_s29 }
 0x182   : > { %3157 = vst [vmem:[#allocation2 + $0x158] sm:$0xf] %v3156_v6  ;;  %v2580_v25 = vld [vmem:[#allocation2 + $0x1c] sm:$0x8]  ;;  %v1715_v33 = vrot.slane %v8189_v26, 4 }
 0x183   : > { %3244 = vst [vmem:[#allocation2 + $0x14c] sm:$0x8] %v3243_v56  ;;  %v2581_v6 = vsel %vm6223_vm13, 0, %v2580_v25  ;;  %v2142_v34 = vld [vmem:[#allocation2 + $0x18] sm:$0xf]  ;;  %v1744_v56 = vrot.slane %v8134_v41, 5  ;;  %2402 = vrot.lane.b32.xlu0 %v6034_v59, %s5303_s27  ;;  %1542 = vrot.lane.b32.xlu1 %v6036_v43, %s5303_s27 }
 0x184   : > { %2359 = vst.msk [vmem:[#allocation2 + $0x160] sm:$0xf] %vm1311_vm0, %v6509_v35  ;;  %v4740_v37 = vld [vmem:[#allocation2 + $0xc] sm:$0xf0]  ;;  %v3158_v25 = vld [vmem:[#allocation2 + $0x164] sm:$0xf]  ;;  %v749_v35 = vpop.f32.mrf.mxu0  ;;  %v2143_v63 = vsel %vm5994_vm15, %v6497_v27, %v2142_v34 }
 0x185   : > { %2582 = vst [vmem:[#allocation2 + $0x1c] sm:$0x8] %v2581_v6  ;;  %v4743_v3 = vor.u32 %v5086_v54, %v4740_v37  ;;  %v1053_v6 = vmax.f32 %v1021_v49, 0.0  ;;  %v1745_v50 = vor.u32 %v1744_v56, %v1743_v39  ;;  %v1716_v41 = vrot.slane %v8139_v12, 5  ;;  %v5112_v27 = vld [vmem:[#allocation2 + $0xd0] sm:$0xf0]  ;;  %v927_v49 = vpop.f32.mrf.mxu2 }
 0x186   : > { %1608 = vst.msk [vmem:[#allocation2 + $0x48] sm:$0xf] %vm8188_vm5, %v6478_v17  ;;  %v839_v17 = vadd.f32 %v838_v58, %v749_v35  ;;  %v3135_v37 = vsel %vm5666_vm8, %v6609_v48, %v3134_v5  ;;  %v4843_v56 = vor.u32 %v5112_v27, %v4842_v0  ;;  %v6664_v58 = vpop.permute.xlu0 %2940 }
 0x187   : > { %v3221_v28 = vld [vmem:[#allocation2 + $0xec] sm:$0x8]  ;;  %1438 = vst [vmem:[#allocation2 + $0x90] sm:$0x1] %v1437_v40  ;;  %3848 = vmatmul.bf16.vlgmr.msrb.gmra.mxu0 %v4743_v3  ;;  %v6644_v40 = vpack.c.bf16 %v1053_v6, %v1053_v6  ;;  %v6646_v34 = vrot.slane %v1745_v50, 4  ;;  %v1717_v39 = vor.u32 %v1716_v41, %v1715_v33  ;;  %v6662_v41 = vpop.permute.xlu1 %2386 }
 0x188   : > { %v3222_v26 = vsel %vm5708_vm11, 0, %v3221_v28  ;;  %2147 = vst [vmem:[#allocation2 + $0x24] sm:$0xf] %v2146_v14  ;;  %v6648_v35 = vpop.permute.xlu2 %2388  ;;  %v1843_v33 = vld [vmem:[#allocation2 + $0x30] sm:$0xf]  ;;  %5008 = vmatmul.msk.bf16.gmra.mxu1 %vm3702_vm12, %v4843_v56  ;;  %v928_v59 = vadd.f32 %v927_v49, %v839_v17  ;;  %v8190_v14 = vshrl.u32 %v6036_v43, 16 }
 0x189   : > { %3223 = vst [vmem:[#allocation2 + $0xec] sm:$0x8] %v3222_v26  ;;  %v3245_v54 = vld [vmem:[#allocation2 + $0x158] sm:$0x8]  ;;  %v8136_v3 = vshrl.u32 %v6644_v40, 16  ;;  %v8135_v5 = vshll.u32 %v6644_v40, 16  ;;  %v3159_v0 = vsel %vm5666_vm8, %v6646_v34, %v3158_v25  ;;  %v1844_v25 = vsel %vm6163_vm14, %v6554_v18, %v1843_v33  ;;  %2062 = vrot.lane.b32.xlu2 %v6571_v29, %s5304_s29 }
 0x18a   : > { %v3246_v28 = vsel %vm5708_vm11, 0, %v3245_v54  ;;  %2144 = vst [vmem:[#allocation2 + $0x18] sm:$0xf] %v2143_v63  ;;  %v1173_v6 = vrot.slane %v8190_v14, 7  ;;  %v6677_v27 = vrot.slane %v1717_v39, 4  ;;  %v977_v17 = vmul.f32 %v6112_v19, %v928_v59 }
 0x18b   : > { %3247 = vst [vmem:[#allocation2 + $0x158] sm:$0x8] %v3246_v28  ;;  %v2374_v50 = vrot.slane %v8136_v3, 4  ;;  %v2375_v26 = vrot.slane %v8135_v5, 5  ;;  %v8191_v18 = vshll.u32 %v6036_v43, 16  ;;  %2956 = vrot.lane.b32.xlu1 %v6036_v43, %s5304_s29 }
 0x18c   : > { %3136 = vst [vmem:[#allocation2 + $0xf8] sm:$0xf] %v3135_v37  ;;  %v2761_v63 = vld [vmem:[#allocation2 + $0x1c] sm:$0xf]  ;;  %v3137_v37 = vld [vmem:[#allocation2 + $0x104] sm:$0xf]  ;;  %v1013_v28 = vadd.f32 %v6129_v46, %v977_v17 }
 0x18d   : > { %2351 = vst.msk [vmem:[#allocation2 + $0x100] sm:$0xf] %vm1311_vm0, %v6551_v13  ;;  %v2376_v49 = vor.u32 %v2375_v26, %v2374_v50  ;;  %v2762_v56 = vsel %vm6301_vm1, %v6556_v30, %v2761_v63  ;;  %v6690_v39 = vor.u32 %v8191_v18, %v1173_v6  ;;  %v3138_v33 = vsel %vm5666_vm8, %v6677_v27, %v3137_v37  ;;  %v3161_v14 = vld [vmem:[#allocation2 + $0x170] sm:$0xf]  ;;  %v4854_v50 = vld [vmem:[#allocation2 + $0xe0] sm:$0xf] }
 0x18e   : > { %3160 = vst [vmem:[#allocation2 + $0x164] sm:$0xf] %v3159_v0  ;;  %v1045_v46 = vmax.f32 %v1013_v28, 0.0  ;;  %v6713_v17 = vpop.permute.xlu0 %2046  ;;  %v1386_v3 = vld [vmem:[#allocation2 + $0x150] sm:$0xf] }
 0x18f   : > { %v2243_v54 = vld [vmem:[#allocation2 + $0x24] sm:$0x1]  ;;  %2360 = vst.msk [vmem:[#allocation2 + $0x16c] sm:$0xf] %vm1311_vm0, %v6591_v52  ;;  %v6697_v30 = vrot.slane %v2376_v49, 4  ;;  %2064 = vrot.lane.b32.xlu0 %v6690_v39, %s5304_s29 }
 0x190   : > { %v2244_v19 = vsel %vm6054_vm10, 0, %v2243_v54  ;;  %1845 = vst [vmem:[#allocation2 + $0x30] sm:$0xf] %v1844_v25  ;;  %v6699_v59 = vpop.permute.xlu2 %1759  ;;  %v6707_v63 = vpack.c.bf16 %v1045_v46, %v1045_v46  ;;  %v6711_v25 = vpop.permute.xlu1 %2048  ;;  %v5115_v37 = vld [vmem:[#allocation2 + $0xe8] sm:$0xf0] }
 0x191   : > { %2245 = vst [vmem:[#allocation2 + $0x24] sm:$0x1] %v2244_v19  ;;  %v2240_v0 = vld [vmem:[#allocation2 + $0x18] sm:$0x1]  ;;  %v3162_v54 = vsel %vm5666_vm8, %v6697_v30, %v3161_v14  ;;  %v1347_v19 = vld [vmem:[#allocation2 + $0x9c] sm:$0xf]  ;;  %1544 = vrot.lane.b32.xlu2 %v6093_v38, %s5303_s27 }
 0x192   : > { %v2241_v61 = vsel %vm6054_vm10, 0, %v2240_v0  ;;  %2763 = vst [vmem:[#allocation2 + $0x1c] sm:$0xf] %v2762_v56  ;;  %v8138_v56 = vshrl.u32 %v6707_v63, 16  ;;  %v8137_v28 = vshll.u32 %v6707_v63, 16 }
 0x193   : > { %2242 = vst [vmem:[#allocation2 + $0x18] sm:$0x1] %v2241_v61  ;;  %v3224_v6 = vld [vmem:[#allocation2 + $0xf8] sm:$0x8]  ;;  %v4855_v61 = vor.u32 %v5115_v37, %v4854_v50  ;;  %2692 = vrot.lane.b32.xlu1 %v6690_v39, %s5305_s28 }
 0x194   : > { %v3225_v26 = vsel %vm5708_vm11, 0, %v3224_v6  ;;  %3139 = vst [vmem:[#allocation2 + $0x104] sm:$0xf] %v3138_v33  ;;  %v2370_v33 = vrot.slane %v8138_v56, 4  ;;  %v2371_v46 = vrot.slane %v8137_v28, 5 }
 0x195   : > { %3226 = vst [vmem:[#allocation2 + $0xf8] sm:$0x8] %v3225_v26  ;;  %v3248_v49 = vld [vmem:[#allocation2 + $0x164] sm:$0x8]  ;;  %v1389_v56 = vld [vmem:[#allocation2 + $0x15c] sm:$0xf] }
 0x196   : > { %v3249_v18 = vsel %vm5708_vm11, 0, %v3248_v49  ;;  %2352 = vst.msk [vmem:[#allocation2 + $0x10c] sm:$0xf] %vm1311_vm0, %v6596_v36  ;;  %v2372_v49 = vor.u32 %v2371_v46, %v2370_v33  ;;  %v2764_v33 = vld [vmem:[#allocation2 + $0x28] sm:$0xf] }
 0x197   : > { %3250 = vst [vmem:[#allocation2 + $0x164] sm:$0x8] %v3249_v18  ;;  %v1935_v0 = vld [vmem:[#allocation2 + $0x30] sm:$0x8]  ;;  %1771 = vrot.lane.b32.xlu0 %v6091_v51, %s5305_s28 }
 0x198   : > { %v1936_v14 = vsel %vm6232_vm2, 0, %v1935_v0  ;;  %3163 = vst [vmem:[#allocation2 + $0x170] sm:$0xf] %v3162_v54  ;;  %v5090_v6 = vld [vmem:[#allocation2 + $0x20] sm:$0xf0]  ;;  %v6740_v18 = vpop.permute.xlu2 %2946  ;;  %v1348_v0 = vsel %vm5635_vm3, %v6571_v29, %v1347_v19  ;;  %5009 = vmatmul.msk.bf16.gmra.mxu1 %vm3702_vm12, %v4855_v61  ;;  %v6757_v29 = vrot.slane %v2372_v49, 4 }
 0x199   : > { %1937 = vst [vmem:[#allocation2 + $0x30] sm:$0x8] %v1936_v14  ;;  %v2852_v26 = vld [vmem:[#allocation2 + $0x1c] sm:$0x1]  ;;  %v2765_v14 = vsel %vm6301_vm1, %v6612_v47, %v2764_v33  ;;  %v2491_v19 = vld [vmem:[#allocation2 + $0x40] sm:$0xf]  ;;  %2958 = vrot.lane.b32.xlu2 %v6093_v38, %s5304_s29 }
 0x19a   : > { %v2853_v50 = vsel %vm6380_vm6, 0, %v2852_v26  ;;  %2361 = vst.msk [vmem:[#allocation2 + $0x178] sm:$0xf] %vm1311_vm0, %v6644_v40  ;;  %v4750_v37 = vld [vmem:[#allocation2 + $0x18] sm:$0xf]  ;;  %v6753_v26 = vpop.permute.xlu1 %1757 }
 0x19b   : > { %2854 = vst [vmem:[#allocation2 + $0x1c] sm:$0x1] %v2853_v50  ;;  %v3227_v54 = vld [vmem:[#allocation2 + $0x104] sm:$0x8]  ;;  %v4751_v43 = vor.u32 %v5090_v6, %v4750_v37  ;;  %v6755_v50 = vpop.permute.xlu0 %1530  ;;  %v3140_v61 = vld [vmem:[#allocation2 + $0x110] sm:$0xf]  ;;  %2404 = vrot.lane.b32.xlu1 %v6091_v51, %s5303_s27 }
 0x19c   : > { %3021 = vst.msk [vmem:[#allocation2 + $0x1c] sm:$0xf] %vm8186_vm9, %v6282_v32  ;;  %v3228_v46 = vsel %vm5708_vm11, 0, %v3227_v54  ;;  %v2492_v32 = vsel %vm6152_vm4, %v6648_v35, %v2491_v19  ;;  %v2488_v37 = vld [vmem:[#allocation2 + $0x34] sm:$0xf]  ;;  %v3141_v35 = vsel %vm5666_vm8, %v6757_v29, %v3140_v61  ;;  %vm8197_vm8 = vmmov %vm8188_vm5 }
 0x19d   : > { %3229 = vst [vmem:[#allocation2 + $0x104] sm:$0x8] %v3228_v46  ;;  %3764 = vmatmul.bf16.gmra.mxu3 %v4751_v43  ;;  %v2489_v49 = vsel %vm6152_vm4, %v6662_v41, %v2488_v37  ;;  %v1350_v54 = vld [vmem:[#allocation2 + $0xa8] sm:$0xf]  ;;  %v8192_v41 = vshrl.u32 %v6143_v60, 16 }
 0x19e   : > { %1349 = vst [vmem:[#allocation2 + $0x9c] sm:$0xf] %v1348_v0  ;;  %v4866_v46 = vld [vmem:[#allocation2 + $0xf8] sm:$0xf] }
 0x19f   : > { %v3251_v6 = vld [vmem:[#allocation2 + $0x170] sm:$0x8]  ;;  %2766 = vst [vmem:[#allocation2 + $0x28] sm:$0xf] %v2765_v14  ;;  %2406 = vrot.lane.b32.xlu0 %v6141_v21, %s5303_s27  ;;  %v2020_v33 = vrot.slane %v8192_v41, 7 }
 0x1a0   : > { %v3252_v47 = vsel %vm5708_vm11, 0, %v3251_v6  ;;  %1607 = vst.msk [vmem:[#allocation2 + $0x3c] sm:$0xf] %vm8188_vm5, %v6614_v8  ;;  %v6778_v0 = vpop.permute.xlu2 %1761  ;;  %v1351_v8 = vsel %vm5635_vm3, %v6690_v39, %v1350_v54 }
 0x1a1   : > { %3253 = vst [vmem:[#allocation2 + $0x170] sm:$0x8] %v3252_v47  ;;  %v8193_v47 = vshll.u32 %v6143_v60, 16 }
 0x1a2   : > { %2493 = vst [vmem:[#allocation2 + $0x40] sm:$0xf] %v2492_v32  ;;  %v2391_v44 = vpop.permute.xlu1 %2390 }
 0x1a3   : > { %2490 = vst [vmem:[#allocation2 + $0x34] sm:$0xf] %v2489_v49  ;;  %v6785_v43 = vpop.permute.xlu0 %2944  ;;  %v2023_v49 = vor.u32 %v8193_v47, %v2020_v33  ;;  %1773 = vrot.lane.b32.xlu1 %v6141_v21, %s5305_s28 }
 0x1a4   : > { %3142 = vst [vmem:[#allocation2 + $0x110] sm:$0xf] %v3141_v35  ;;  %v5118_v14 = vld [vmem:[#allocation2 + $0x100] sm:$0xf0]  ;;  %v8194_v35 = vshrl.u32 %v6093_v38, 16 }
 0x1a5   : > { %v1439_v19 = vld [vmem:[#allocation2 + $0x9c] sm:$0x1]  ;;  %2353 = vst.msk [vmem:[#allocation2 + $0x118] sm:$0xf] %vm1311_vm0, %v6707_v63  ;;  %v4867_v37 = vor.u32 %v5118_v14, %v4866_v46  ;;  %vm8195_vm0 = vmmov %vm8186_vm9 }
 0x1a6   : > { %v1440_v61 = vsel %vm5655_vm7, 0, %v1439_v19  ;;  %v2855_v6 = vld [vmem:[#allocation2 + $0x28] sm:$0x1]  ;;  %1352 = vst [vmem:[#allocation2 + $0xa8] sm:$0xf] %v1351_v8  ;;  %v1180_v8 = vrot.slane %v8194_v35, 7  ;;  %vm8200_vm9 = vmmov %vm8195_vm0 }
 0x1a7   : > { %1441 = vst [vmem:[#allocation2 + $0x9c] sm:$0x1] %v1440_v61  ;;  %v2856_v39 = vsel %vm6380_vm6, 0, %v2855_v6  ;;  %v1846_v32 = vld [vmem:[#allocation2 + $0x3c] sm:$0xf]  ;;  %2068 = vrot.lane.b32.xlu0 %v2023_v49, %s5304_s29  ;;  %v8196_v35 = vshll.u32 %v6093_v38, 16 }
 0x1a8   : > { %2857 = vst [vmem:[#allocation2 + $0x28] sm:$0x1] %v2856_v39  ;;  %v1847_v54 = vsel %vm6163_vm14, %v6414_v22, %v1846_v32  ;;  %v2148_v19 = vld [vmem:[#allocation2 + $0x30] sm:$0xf]  ;;  %v1535_v14 = vpop.permute.xlu2 %1534  ;;  %5010 = vmatmul.msk.bf16.gmra.mxu1 %vm3702_vm12, %v4867_v37  ;;  %v1849_v39 = vld [vmem:[#allocation2 + $0x48] sm:$0xf] }
 0x1a9   : > { %1848 = vst [vmem:[#allocation2 + $0x3c] sm:$0xf] %v1847_v54  ;;  %v2589_v41 = vld [vmem:[#allocation2 + $0x40] sm:$0x8]  ;;  %v2149_v6 = vsel %vm5994_vm15, %v6713_v17, %v2148_v19  ;;  %v1850_v54 = vsel %vm6163_vm14, %v6753_v26, %v1849_v39  ;;  %v5089_v19 = vld [vmem:[#allocation2 + $0x1c] sm:$0xf] }
 0x1aa   : > { %v2590_v46 = vsel %vm6223_vm13, 0, %v2589_v41  ;;  %v2586_v33 = vld [vmem:[#allocation2 + $0x34] sm:$0x8]  ;;  %3022 = vst.msk [vmem:[#allocation2 + $0x28] sm:$0xf] %vm8195_vm0, %v6664_v58  ;;  %v6817_v32 = vpop.permute.xlu1 %2052  ;;  %v1183_v41 = vor.u32 %v8196_v35, %v1180_v8 }
 0x1ab   : > { %2591 = vst [vmem:[#allocation2 + $0x40] sm:$0x8] %v2590_v46  ;;  %v2587_v22 = vsel %vm6223_vm13, 0, %v2586_v33  ;;  %v3230_v61 = vld [vmem:[#allocation2 + $0x110] sm:$0x8]  ;;  %v2681_v58 = vpop.permute.xlu0 %2680  ;;  %v2495_v46 = vsel %vm6152_vm4, %v2391_v44, %v2494_v15  ;;  %2960 = vrot.lane.b32.xlu1 %v6143_v60, %s5304_s29 }
 0x1ac   : > { %2588 = vst [vmem:[#allocation2 + $0x34] sm:$0x8] %v2587_v22  ;;  %v3231_v51 = vsel %vm5708_vm11, 0, %v3230_v61  ;;  %2694 = vrot.lane.b32.xlu2 %v1183_v41, %s5305_s28  ;;  %v1353_v22 = vld [vmem:[#allocation2 + $0xb4] sm:$0xf]  ;;  %vm8198_vm11 = vmmov %vm8188_vm5 }
 0x1ad   : > { %3232 = vst [vmem:[#allocation2 + $0x110] sm:$0x8] %v3231_v51  ;;  %v1442_v47 = vld [vmem:[#allocation2 + $0xa8] sm:$0x1]  ;;  %v5121_v39 = vld [vmem:[#allocation2 + $0x118] sm:$0xf0]  ;;  %vm8202_vm5 = vmmov %vm8195_vm0 }
 0x1ae   : > { %v1443_v17 = vsel %vm5655_vm7, 0, %v1442_v47  ;;  %2150 = vst [vmem:[#allocation2 + $0x30] sm:$0xf] %v2149_v6  ;;  %v6848_v47 = vpop.f32.mrf.mxu1  ;;  %vm8204_vm0 = vmmov %vm8197_vm8 }
 0x1af   : > { %1444 = vst [vmem:[#allocation2 + $0xa8] sm:$0x1] %v1443_v17  ;;  %2696 = vrot.lane.b32.xlu0 %v2023_v49, %s5305_s28 }
 0x1b0   : > { %v1938_v37 = vld [vmem:[#allocation2 + $0x3c] sm:$0x8]  ;;  %1851 = vst [vmem:[#allocation2 + $0x48] sm:$0xf] %v1850_v54  ;;  %v6836_v61 = vpop.permute.xlu2 %2684 }
 0x1b1   : > { %v1939_v26 = vsel %vm6232_vm2, 0, %v1938_v37  ;;  %v4752_v33 = vld [vmem:[#allocation2 + $0x24] sm:$0xf0]  ;;  %1609 = vst.msk [vmem:[#allocation2 + $0x54] sm:$0xf] %vm8197_vm8, %v6755_v50  ;;  %vm8207_vm8 = vmmov %vm8204_vm0 }
 0x1b2   : > { %1940 = vst [vmem:[#allocation2 + $0x3c] sm:$0x8] %v1939_v26  ;;  %v4755_v38 = vor.u32 %v5089_v19, %v4752_v33  ;;  %v2770_v8 = vld [vmem:[#allocation2 + $0x40] sm:$0xf]  ;;  %v6844_v21 = vpop.permute.xlu1 %2682  ;;  %v8199_v26 = vld [vmem:[#allocation8_spill] sm:$0xff] }
 0x1b3   : > { %v2767_v6 = vld [vmem:[#allocation2 + $0x34] sm:$0xf]  ;;  %2496 = vst [vmem:[#allocation2 + $0x4c] sm:$0xf] %v2495_v46  ;;  %v2771_v44 = vsel %vm6301_vm1, %v2681_v58, %v2770_v8  ;;  %v6846_v49 = vpop.permute.xlu0 %2050  ;;  %v1354_v58 = vsel %vm5635_vm3, %v1183_v41, %v1353_v22  ;;  %v2503_v46 = vld [vmem:[#allocation2 + $0x70] sm:$0xf] }
 0x1b4   : > { %v2768_v50 = vsel %vm6301_vm1, %v6598_v10, %v2767_v6  ;;  %3853 = vmatmul.bf16.gmra.mxu0 %v4755_v38  ;;  %1611 = vst.msk [vmem:[#allocation2 + $0x78] sm:$0xf] %vm8198_vm11, %v1535_v14  ;;  %v4878_v51 = vld [vmem:[#allocation2 + $0x110] sm:$0xf]  ;;  %2066 = vrot.lane.b32.xlu2 %v1183_v41, %s5304_s29  ;;  %v1185_v8 = vshrl.u32 %v8199_v26, 16  ;;  %v1188_v22 = vshll.u32 %v8199_v26, 16  ;;  %vm8208_vm11 = vmmov %vm8202_vm5 }
 0x1b5   : > { %2769 = vst [vmem:[#allocation2 + $0x34] sm:$0xf] %v2768_v50  ;;  %v2246_v54 = vld [vmem:[#allocation2 + $0x30] sm:$0x1]  ;;  %v4879_v14 = vor.u32 %v5121_v39, %v4878_v51 }
 0x1b6   : > { %v2247_v35 = vsel %vm6054_vm10, 0, %v2246_v54  ;;  %2772 = vst [vmem:[#allocation2 + $0x40] sm:$0xf] %v2771_v44  ;;  %v1691_v50 = vrot.slane %v1185_v8, 4  ;;  %v1692_v51 = vrot.slane %v1188_v22, 5 }
 0x1b7   : > { %2248 = vst [vmem:[#allocation2 + $0x30] sm:$0x1] %v2247_v35  ;;  %v1941_v10 = vld [vmem:[#allocation2 + $0x48] sm:$0x8]  ;;  %1546 = vrot.lane.b32.xlu0 %v8199_v26, %s5303_s27 }
 0x1b8   : > { %v1942_v17 = vsel %vm6232_vm2, 0, %v1941_v10  ;;  %v1852_v15 = vld [vmem:[#allocation2 + $0x54] sm:$0xf]  ;;  %1355 = vst [vmem:[#allocation2 + $0xb4] sm:$0xf] %v1354_v58  ;;  %v2397_v38 = vpop.permute.xlu2 %2396  ;;  %5011 = vmatmul.msk.bf16.gmra.mxu1 %vm3702_vm12, %v4879_v14  ;;  %v1693_v35 = vor.u32 %v1692_v51, %v1691_v50  ;;  %v6882_v10 = vpop.f32.mrf.mxu1 }
 0x1b9   : > { %v2151_v37 = vld [vmem:[#allocation2 + $0x3c] sm:$0xf]  ;;  %1943 = vst [vmem:[#allocation2 + $0x48] sm:$0x8] %v1942_v17  ;;  %v1853_v19 = vsel %vm6163_vm14, %v6699_v59, %v1852_v15  ;;  %v2504_v60 = vsel %vm6152_vm4, %v2397_v38, %v2503_v46  ;;  %v8201_v17 = vld [vmem:[#allocation7_spill] sm:$0xff]  ;;  %v8203_v38 = vld [vmem:[#allocation6_spill] sm:$0xff] }
 0x1ba   : > { %v2152_v41 = vsel %vm5994_vm15, %v6711_v25, %v2151_v37  ;;  %1854 = vst [vmem:[#allocation2 + $0x54] sm:$0xf] %v1853_v19  ;;  %v2592_v33 = vld [vmem:[#allocation2 + $0x4c] sm:$0x8]  ;;  %v1533_v25 = vpop.permute.xlu1 %1532  ;;  %v1694_v37 = vrot.slane %v1693_v35, 4  ;;  %v1237_v50 = vshll.u32 %v8203_v38, 16 }
 0x1bb   : > { %2153 = vst [vmem:[#allocation2 + $0x3c] sm:$0xf] %v2152_v41  ;;  %v2593_v59 = vsel %vm6223_vm13, 0, %v2592_v33  ;;  %v2393_v44 = vpop.permute.xlu0 %2392 }
 0x1bc   : > { %v2858_v6 = vld [vmem:[#allocation2 + $0x34] sm:$0x1]  ;;  %2594 = vst [vmem:[#allocation2 + $0x4c] sm:$0x8] %v2593_v59  ;;  %2408 = vrot.lane.b32.xlu2 %v8201_v17, %s5303_s27  ;;  %1775 = vrot.lane.b32.xlu1 %v1694_v37, %s5305_s28  ;;  %v1234_v59 = vshrl.u32 %v8203_v38, 16 }
 0x1bd   : > { %v2859_v39 = vsel %vm6380_vm6, 0, %v2858_v6  ;;  %v2861_v54 = vld [vmem:[#allocation2 + $0x40] sm:$0x1]  ;;  %2505 = vst [vmem:[#allocation2 + $0x70] sm:$0xf] %v2504_v60 }
 0x1be   : > { %2860 = vst [vmem:[#allocation2 + $0x34] sm:$0x1] %v2859_v39  ;;  %v2862_v58 = vsel %vm6380_vm6, 0, %v2861_v54  ;;  %v2497_v54 = vld [vmem:[#allocation2 + $0x58] sm:$0xf] }
 0x1bf   : > { %3023 = vst.msk [vmem:[#allocation2 + $0x34] sm:$0xf] %vm8200_vm9, %v6535_v9  ;;  %v1445_v14 = vld [vmem:[#allocation2 + $0xb4] sm:$0x1]  ;;  %2410 = vrot.lane.b32.xlu0 %v1694_v37, %s5303_s27  ;;  %v2498_v17 = vsel %vm6152_vm4, %v2393_v44, %v2497_v54  ;;  %vm8211_vm9 = vcmask 781824  }
 0x1c0   : > { %2863 = vst [vmem:[#allocation2 + $0x40] sm:$0x1] %v2862_v58  ;;  %v1446_v15 = vsel %vm5655_vm7, 0, %v1445_v14  ;;  %v2154_v46 = vld [vmem:[#allocation2 + $0x48] sm:$0xf]  ;;  %v6894_v9 = vpop.permute.xlu2 %2950 }
 0x1c1   : > { %v1944_v19 = vld [vmem:[#allocation2 + $0x54] sm:$0x8]  ;;  %3024 = vst.msk [vmem:[#allocation2 + $0x40] sm:$0xf] %vm8202_vm5, %v6785_v43  ;;  %v2155_v43 = vsel %vm5994_vm15, %v6846_v49, %v2154_v46  ;;  %v2500_v49 = vld [vmem:[#allocation2 + $0x64] sm:$0xf] }
 0x1c2   : > { %v2249_v41 = vld [vmem:[#allocation2 + $0x3c] sm:$0x1]  ;;  %v1945_v33 = vsel %vm6232_vm2, 0, %v1944_v19  ;;  %1447 = vst [vmem:[#allocation2 + $0xb4] sm:$0x1] %v1446_v15  ;;  %v2395_v58 = vpop.permute.xlu1 %2394  ;;  %v1719_v46 = vrot.slane %v1234_v59, 4 }
 0x1c3   : > { %v2250_v60 = vsel %vm6054_vm10, 0, %v2249_v41  ;;  %1946 = vst [vmem:[#allocation2 + $0x54] sm:$0x8] %v1945_v33  ;;  %v2773_v6 = vld [vmem:[#allocation2 + $0x4c] sm:$0xf]  ;;  %v2055_v35 = vpop.permute.xlu0 %2054  ;;  %v2501_v19 = vsel %vm6152_vm4, %v2395_v58, %v2500_v49  ;;  %v1720_v41 = vrot.slane %v1237_v50, 5 }
 0x1c4   : > { %2251 = vst [vmem:[#allocation2 + $0x3c] sm:$0x1] %v2250_v60  ;;  %v2774_v51 = vsel %vm6301_vm1, %v6844_v21, %v2773_v6  ;;  %v2601_v39 = vld [vmem:[#allocation2 + $0x70] sm:$0x8]  ;;  %v2160_v15 = vld [vmem:[#allocation2 + $0x60] sm:$0xf]  ;;  %1560 = vrot.lane.b32.xlu2 %v8203_v38, %s5303_s27  ;;  %v6922_v6 = vpop.f32.mrf.mxu1 }
 0x1c5   : > { %2775 = vst [vmem:[#allocation2 + $0x4c] sm:$0xf] %v2774_v51  ;;  %v2602_v14 = vsel %vm6223_vm13, 0, %v2601_v39  ;;  %v5124_v37 = vld [vmem:[#allocation2 + $0x130] sm:$0xf0]  ;;  %v2161_v60 = vsel %vm5994_vm15, %v2055_v35, %v2160_v15  ;;  %v1187_v39 = vrot.slane %v1185_v8, 7 }
 0x1c6   : > { %2156 = vst [vmem:[#allocation2 + $0x48] sm:$0xf] %v2155_v43  ;;  %v4890_v21 = vld [vmem:[#allocation2 + $0x128] sm:$0xf]  ;;  %v5092_v44 = vld [vmem:[#allocation2 + $0x34] sm:$0xf] }
 0x1c7   : > { %2603 = vst [vmem:[#allocation2 + $0x70] sm:$0x8] %v2602_v14  ;;  %v4891_v51 = vor.u32 %v5124_v37, %v4890_v21  ;;  %v8205_v14 = vld [vmem:[#allocation10_spill] sm:$0xff]  ;;  %v1380_v38 = vld [vmem:[#allocation2 + $0x138] sm:$0xf] }
 0x1c8   : > { %2499 = vst [vmem:[#allocation2 + $0x58] sm:$0xf] %v2498_v17  ;;  %v4764_v33 = vld [vmem:[#allocation2 + $0x3c] sm:$0xf0]  ;;  %v6927_v58 = vpop.permute.xlu2 %2058  ;;  %2962 = vrot.lane.b32.xlu0 %v8205_v14, %s5304_s29  ;;  %1548 = vrot.lane.b32.xlu1 %v8205_v14, %s5303_s27  ;;  %v8206_v21 = vshrl.u32 %v8205_v14, 16  ;;  %v8209_v26 = vshll.u32 %v8205_v14, 16 }
 0x1c9   : > { %1610 = vst.msk [vmem:[#allocation2 + $0x6c] sm:$0xf] %vm8204_vm0, %v1533_v25  ;;  %v4767_v43 = vor.u32 %v5092_v44, %v4764_v33  ;;  %v4762_v25 = vld [vmem:[#allocation2 + $0x30] sm:$0xf]  ;;  %5012 = vmatmul.msk.bf16.gmra.mxu1 %vm3702_vm12, %v4891_v51  ;;  %vm8214_vm0 = vmmov %vm8202_vm5 }
 0x1ca   : > { %v2157_v54 = vld [vmem:[#allocation2 + $0x54] sm:$0xf]  ;;  %2502 = vst [vmem:[#allocation2 + $0x64] sm:$0xf] %v2501_v19  ;;  %v6937_v49 = vpop.permute.xlu1 %2948  ;;  %v1721_v19 = vor.u32 %v1720_v41, %v1719_v46  ;;  %v1194_v44 = vrot.slane %v8206_v21, 7 }
 0x1cb   : > { %v2158_v35 = vsel %vm5994_vm15, %v6817_v32, %v2157_v54  ;;  %v5093_v17 = vld [vmem:[#allocation2 + $0x38] sm:$0xf0]  ;;  %3858 = vmatmul.bf16.gmra.mxu0 %v4767_v43  ;;  %2162 = vst [vmem:[#allocation2 + $0x60] sm:$0xf] %v2161_v60  ;;  %v1537_v37 = vpop.permute.xlu0 %1536  ;;  %v1190_v60 = vor.u32 %v1188_v22, %v1187_v39 }
 0x1cc   : > { %2159 = vst [vmem:[#allocation2 + $0x54] sm:$0xf] %v2158_v35  ;;  %v4763_v8 = vor.u32 %v5093_v17, %v4762_v25  ;;  %v2864_v15 = vld [vmem:[#allocation2 + $0x4c] sm:$0x1]  ;;  %v1722_v54 = vrot.slane %v1721_v19, 4  ;;  %v6955_v22 = vor.u32 %v8209_v26, %v1194_v44  ;;  %v8210_v25 = vmov 0   ;;  %v6965_v14 = vpop.f32.mrf.mxu1 }
 0x1cd   : > { %v2865_v33 = vsel %vm6380_vm6, 0, %v2864_v15  ;;  %v2252_v32 = vld [vmem:[#allocation2 + $0x48] sm:$0x1]  ;;  %1612 = vst.msk [vmem:[#allocation2 + $0x84] sm:$0xf] %vm8207_vm8, %v1537_v37  ;;  %2070 = vrot.lane.b32.xlu2 %v1190_v60, %s5304_s29  ;;  %vm8218_vm8 = vmmov %vm8214_vm0 }
 0x1ce   : > { %3769 = vmatmul.bf16.gmra.mxu3 %v4763_v8  ;;  %2866 = vst [vmem:[#allocation2 + $0x4c] sm:$0x1] %v2865_v33  ;;  %v2253_v43 = vsel %vm6054_vm10, 0, %v2252_v32  ;;  %v1359_v15 = vld [vmem:[#allocation2 + $0xd8] sm:$0xf] }
 0x1cf   : > { %3025 = vst.msk [vmem:[#allocation2 + $0x4c] sm:$0xf] %vm8208_vm11, %v6740_v18  ;;  %v2595_v46 = vld [vmem:[#allocation2 + $0x58] sm:$0x8]  ;;  %v1356_v18 = vld [vmem:[#allocation2 + $0xcc] sm:$0xf] }
 0x1d0   : > { %2254 = vst [vmem:[#allocation2 + $0x48] sm:$0x1] %v2253_v43  ;;  %v2596_v41 = vsel %vm6223_vm13, 0, %v2595_v46  ;;  %v1855_v51 = vld [vmem:[#allocation2 + $0x6c] sm:$0xf]  ;;  %v1766_v8 = vpop.permute.xlu2 %1765  ;;  %1789 = vrot.lane.b32.xlu0 %v1722_v54, %s5305_s28  ;;  %2698 = vrot.lane.b32.xlu1 %v6955_v22, %s5305_s28  ;;  %v1357_v43 = vsel %vm5635_vm3, %v1190_v60, %v1356_v18  ;;  %vm8220_vm11 = vcmask 519424  }
 0x1d1   : > { %2597 = vst [vmem:[#allocation2 + $0x58] sm:$0x8] %v2596_v41  ;;  %v1856_v39 = vsel %vm6163_vm14, %v6778_v0, %v1855_v51  ;;  %v2598_v35 = vld [vmem:[#allocation2 + $0x64] sm:$0x8]  ;;  %v5127_v41 = vld [vmem:[#allocation2 + $0x148] sm:$0xf0]  ;;  %v1360_v51 = vsel %vm5635_vm3, %v6955_v22, %v1359_v15 }
 0x1d2   : > { %2840 = vst.msk [vmem:[#allocation2 + $0x58] sm:$0xf] %vm8211_vm9, %v8210_v25  ;;  %v2258_v17 = vld [vmem:[#allocation2 + $0x60] sm:$0x1]  ;;  %v2599_v0 = vsel %vm6223_vm13, 0, %v2598_v35  ;;  %v6975_v33 = vpop.permute.xlu1 %2056  ;;  %vm8222_vm9 = vmmov %vm8220_vm11 }
 0x1d3   : > { %v2255_v37 = vld [vmem:[#allocation2 + $0x54] sm:$0x1]  ;;  %3047 = vst.msk [vmem:[#allocation2 + $0x58] sm:$0xf] %vm8202_vm5, %v8210_v25  ;;  %v2259_v21 = vsel %vm6054_vm10, 0, %v2258_v17  ;;  %v2687_v32 = vpop.permute.xlu0 %2686  ;;  %vm8226_vm5 = vmmov %vm8222_vm9 }
 0x1d4   : > { %v2256_v19 = vsel %vm6054_vm10, 0, %v2255_v37  ;;  %1857 = vst [vmem:[#allocation2 + $0x6c] sm:$0xf] %v1856_v39  ;;  %v1861_v44 = vld [vmem:[#allocation2 + $0x84] sm:$0xf]  ;;  %v8212_v37 = vld [vmem:[#allocation9_spill] sm:$0xff] }
 0x1d5   : > { %2257 = vst [vmem:[#allocation2 + $0x54] sm:$0x1] %v2256_v19  ;;  %v1862_v46 = vsel %vm6163_vm14, %v1766_v8, %v1861_v44  ;;  %v2779_v26 = vld [vmem:[#allocation2 + $0x70] sm:$0xf]  ;;  %2426 = vrot.lane.b32.xlu2 %v1722_v54, %s5303_s27  ;;  %v4902_v35 = vld [vmem:[#allocation2 + $0x140] sm:$0xf] }
 0x1d6   : > { %2600 = vst [vmem:[#allocation2 + $0x64] sm:$0x8] %v2599_v0  ;;  %v2780_v39 = vsel %vm6301_vm1, %v2687_v32, %v2779_v26  ;;  %v4903_v60 = vor.u32 %v5127_v41, %v4902_v35  ;;  %v5095_v18 = vld [vmem:[#allocation2 + $0x4c] sm:$0xf]  ;;  %v2506_v15 = vld [vmem:[#allocation2 + $0x7c] sm:$0xf]  ;;  %v6996_v41 = vpop.f32.mrf.mxu1 }
 0x1d7   : > { %2260 = vst [vmem:[#allocation2 + $0x60] sm:$0x1] %v2259_v21  ;;  %v1858_v19 = vld [vmem:[#allocation2 + $0x78] sm:$0xf]  ;;  %v4774_v44 = vld [vmem:[#allocation2 + $0x48] sm:$0xf] }
 0x1d8   : > { %1358 = vst [vmem:[#allocation2 + $0xcc] sm:$0xf] %v1357_v43  ;;  %v6987_v8 = vpop.permute.xlu2 %2688  ;;  %1562 = vrot.lane.b32.xlu0 %v8212_v37, %s5303_s27  ;;  %2412 = vrot.lane.b32.xlu1 %v6339_v23, %s5303_s27 }
 0x1d9   : > { %1863 = vst [vmem:[#allocation2 + $0x84] sm:$0xf] %v1862_v46  ;;  %5013 = vmatmul.msk.bf16.gmra.mxu1 %vm3702_vm12, %v4903_v60 }
 0x1da   : > { %1361 = vst [vmem:[#allocation2 + $0xd8] sm:$0xf] %v1360_v51  ;;  %v4776_v17 = vld [vmem:[#allocation2 + $0x54] sm:$0xf0]  ;;  %v1764_v43 = vpop.permute.xlu1 %1763 }
 0x1db   : > { %v1947_v54 = vld [vmem:[#allocation2 + $0x6c] sm:$0x8]  ;;  %v4779_v0 = vor.u32 %v5095_v18, %v4776_v17  ;;  %2781 = vst [vmem:[#allocation2 + $0x70] sm:$0xf] %v2780_v39  ;;  %v2399_v46 = vpop.permute.xlu0 %2398  ;;  %v1859_v35 = vsel %vm6163_vm14, %v1764_v43, %v1858_v19 }
 0x1dc   : > { %v1948_v21 = vsel %vm6232_vm2, 0, %v1947_v54  ;;  %v5096_v32 = vld [vmem:[#allocation2 + $0x50] sm:$0xf0]  ;;  %v2507_v39 = vsel %vm6152_vm4, %v2399_v46, %v2506_v15  ;;  %1860 = vst [vmem:[#allocation2 + $0x78] sm:$0xf] %v1859_v35 }
 0x1dd   : > { %1949 = vst [vmem:[#allocation2 + $0x6c] sm:$0x8] %v1948_v21  ;;  %v2776_v51 = vld [vmem:[#allocation2 + $0x64] sm:$0xf]  ;;  %v4775_v26 = vor.u32 %v5096_v32, %v4774_v44  ;;  %3863 = vmatmul.bf16.gmra.mxu0 %v4779_v0  ;;  %1550 = vrot.lane.b32.xlu2 %v6341_v16, %s5303_s27  ;;  %v8213_v32 = vshrl.u32 %v6341_v16, 16 }
 0x1de   : > { %v2777_v60 = vsel %vm6301_vm1, %v6836_v61, %v2776_v51  ;;  %2508 = vst [vmem:[#allocation2 + $0x7c] sm:$0xf] %v2507_v39  ;;  %v5130_v39 = vld [vmem:[#allocation2 + $0x160] sm:$0xf0] }
 0x1df   : > { %2778 = vst [vmem:[#allocation2 + $0x64] sm:$0xf] %v2777_v60  ;;  %3774 = vmatmul.bf16.gmra.mxu3 %v4775_v26  ;;  %v1448_v18 = vld [vmem:[#allocation2 + $0xcc] sm:$0x1]  ;;  %v1201_v43 = vrot.slane %v8213_v32, 7 }
 0x1e0   : > { %v1449_v17 = vsel %vm5655_vm7, 0, %v1448_v18  ;;  %v1953_v54 = vld [vmem:[#allocation2 + $0x84] sm:$0x8]  ;;  %v1541_v21 = vpop.permute.xlu2 %1540  ;;  %2072 = vrot.lane.b32.xlu0 %v6955_v22, %s5304_s29  ;;  %2964 = vrot.lane.b32.xlu1 %v6341_v16, %s5304_s29 }
 0x1e1   : > { %1450 = vst [vmem:[#allocation2 + $0xcc] sm:$0x1] %v1449_v17  ;;  %v1954_v15 = vsel %vm6232_vm2, 0, %v1953_v54  ;;  %v1451_v0 = vld [vmem:[#allocation2 + $0xd8] sm:$0x1]  ;;  %v1236_v54 = vrot.slane %v1234_v59, 7 }
 0x1e2   : > { %1955 = vst [vmem:[#allocation2 + $0x84] sm:$0x8] %v1954_v15  ;;  %v1452_v61 = vsel %vm5655_vm7, 0, %v1451_v0  ;;  %v2870_v19 = vld [vmem:[#allocation2 + $0x70] sm:$0x1]  ;;  %v1539_v51 = vpop.permute.xlu1 %1538  ;;  %v7030_v15 = vpop.f32.mrf.mxu1 }
 0x1e3   : > { %1453 = vst [vmem:[#allocation2 + $0xd8] sm:$0x1] %v1452_v61  ;;  %v2871_v44 = vsel %vm6380_vm6, 0, %v2870_v19  ;;  %v2061_v26 = vpop.permute.xlu0 %2060  ;;  %v1950_v22 = vld [vmem:[#allocation2 + $0x78] sm:$0x8]  ;;  %v8216_v61 = vshll.u32 %v6341_v16, 16 }
 0x1e4   : > { %v2163_v46 = vld [vmem:[#allocation2 + $0x6c] sm:$0xf]  ;;  %2872 = vst [vmem:[#allocation2 + $0x70] sm:$0x1] %v2871_v44  ;;  %v1951_v18 = vsel %vm6232_vm2, 0, %v1950_v22  ;;  %v8217_v44 = vshrl.u32 %v8212_v37, 16 }
 0x1e5   : > { %v2164_v35 = vsel %vm5994_vm15, %v6975_v33, %v2163_v46  ;;  %3027 = vst.msk [vmem:[#allocation2 + $0x70] sm:$0xf] %vm8214_vm0, %v6894_v9  ;;  %v4914_v17 = vld [vmem:[#allocation2 + $0x158] sm:$0xf]  ;;  %v2604_v33 = vld [vmem:[#allocation2 + $0x7c] sm:$0x8]  ;;  %v1204_v19 = vor.u32 %v8216_v61, %v1201_v43  ;;  %v7054_v43 = vor.u32 %v1237_v50, %v1236_v54 }
 0x1e6   : > { %v2867_v60 = vld [vmem:[#allocation2 + $0x64] sm:$0x1]  ;;  %2165 = vst [vmem:[#allocation2 + $0x6c] sm:$0xf] %v2164_v35  ;;  %v8215_v9 = vld [vmem:[#allocation11_spill] sm:$0xff]  ;;  %v1243_v32 = vrot.slane %v8217_v44, 7  ;;  %v4915_v22 = vor.u32 %v5130_v39, %v4914_v17 }
 0x1e7   : > { %v2868_v0 = vsel %vm6380_vm6, 0, %v2867_v60  ;;  %1952 = vst [vmem:[#allocation2 + $0x78] sm:$0x8] %v1951_v18  ;;  %1791 = vrot.lane.b32.xlu2 %v8215_v9, %s5305_s28  ;;  %v2605_v59 = vsel %vm6223_vm13, 0, %v2604_v33  ;;  %v1362_v46 = vld [vmem:[#allocation2 + $0xe4] sm:$0xf] }
 0x1e8   : > { %2869 = vst [vmem:[#allocation2 + $0x64] sm:$0x1] %v2868_v0  ;;  %v7046_v18 = vpop.permute.xlu2 %2954  ;;  %1777 = vrot.lane.b32.xlu0 %v6339_v23, %s5305_s28  ;;  %v8219_v16 = vld [vmem:[#allocation12_spill] sm:$0xff]  ;;  %v8221_v39 = vshll.u32 %v8212_v37, 16 }
 0x1e9   : > { %3026 = vst.msk [vmem:[#allocation2 + $0x64] sm:$0xf] %vm8218_vm8, %v6937_v49  ;;  %v2169_v35 = vld [vmem:[#allocation2 + $0x84] sm:$0xf]  ;;  %1564 = vrot.lane.b32.xlu1 %v8219_v16, %s5303_s27  ;;  %5014 = vmatmul.msk.bf16.gmra.mxu1 %vm3702_vm12, %v4915_v22  ;;  %v1363_v49 = vsel %vm5635_vm3, %v1204_v19, %v1362_v46  ;;  %vm8233_vm8 = vmmov %vm8226_vm5 }
 0x1ea   : > { %2606 = vst [vmem:[#allocation2 + $0x7c] sm:$0x8] %v2605_v59  ;;  %v2170_v60 = vsel %vm5994_vm15, %v2061_v26, %v2169_v35  ;;  %v1377_v26 = vld [vmem:[#allocation2 + $0x12c] sm:$0xf]  ;;  %v7062_v17 = vor.u32 %v8221_v39, %v1243_v32  ;;  %v7065_v23 = vpop.permute.xlu1 %2952  ;;  %v7079_v59 = vpop.f32.mrf.mxu1  ;;  %v4786_v39 = vld [vmem:[#allocation2 + $0x60] sm:$0xf] }
 0x1eb   : > { %1614 = vst.msk [vmem:[#allocation2 + $0x9c] sm:$0xf] %vm8220_vm11, %v1541_v21  ;;  %v1768_v0 = vpop.permute.xlu0 %1767  ;;  %v1378_v33 = vsel %vm5635_vm3, %v7054_v43, %v1377_v26  ;;  %vm8241_vm11 = vmmov %vm8214_vm0 }
 0x1ec   : > { %1613 = vst.msk [vmem:[#allocation2 + $0x90] sm:$0xf] %vm8222_vm9, %v1539_v51  ;;  %v1381_v61 = vsel %vm5635_vm3, %v7062_v17, %v1380_v38  ;;  %v4788_v32 = vld [vmem:[#allocation2 + $0x6c] sm:$0xf0]  ;;  %vm8245_vm9 = vmmov %vm8214_vm0 }
 0x1ed   : > { %v2261_v50 = vld [vmem:[#allocation2 + $0x6c] sm:$0x1]  ;;  %2171 = vst [vmem:[#allocation2 + $0x84] sm:$0xf] %v2170_v60 }
 0x1ee   : > { %v2262_v21 = vsel %vm6054_vm10, 0, %v2261_v50  ;;  %v2166_v54 = vld [vmem:[#allocation2 + $0x78] sm:$0xf]  ;;  %1364 = vst [vmem:[#allocation2 + $0xe4] sm:$0xf] %v1363_v49 }
 0x1ef   : > { %2263 = vst [vmem:[#allocation2 + $0x6c] sm:$0x1] %v2262_v21  ;;  %v2167_v51 = vsel %vm5994_vm15, %v6927_v58, %v2166_v54  ;;  %2700 = vrot.lane.b32.xlu2 %v1204_v19, %s5305_s28  ;;  %v2509_v49 = vld [vmem:[#allocation2 + $0x88] sm:$0xf]  ;;  %v5133_v54 = vld [vmem:[#allocation2 + $0x178] sm:$0xf0] }
 0x1f0   : > { %2168 = vst [vmem:[#allocation2 + $0x78] sm:$0xf] %v2167_v51  ;;  %v5098_v44 = vld [vmem:[#allocation2 + $0x64] sm:$0xf]  ;;  %v7084_v60 = vpop.permute.xlu2 %2062  ;;  %2428 = vrot.lane.b32.xlu0 %v8215_v9, %s5303_s27  ;;  %v8223_v51 = vshrl.u32 %v6400_v55, 16 }
 0x1f1   : > { %v2782_v46 = vld [vmem:[#allocation2 + $0x7c] sm:$0xf]  ;;  %v4791_v35 = vor.u32 %v5098_v44, %v4788_v32  ;;  %1379 = vst [vmem:[#allocation2 + $0x12c] sm:$0xf] %v1378_v33  ;;  %2074 = vrot.lane.b32.xlu1 %v1204_v19, %s5304_s29 }
 0x1f2   : > { %v2783_v22 = vsel %vm6301_vm1, %v6987_v8, %v2782_v46  ;;  %1382 = vst [vmem:[#allocation2 + $0x138] sm:$0xf] %v1381_v61  ;;  %v2401_v50 = vpop.permute.xlu1 %2400  ;;  %v4926_v8 = vld [vmem:[#allocation2 + $0x170] sm:$0xf]  ;;  %v1208_v61 = vrot.slane %v8223_v51, 7 }
 0x1f3   : > { %2784 = vst [vmem:[#allocation2 + $0x7c] sm:$0xf] %v2783_v22  ;;  %3868 = vmatmul.bf16.gmra.mxu0 %v4791_v35  ;;  %v1864_v58 = vld [vmem:[#allocation2 + $0x90] sm:$0xf]  ;;  %v7091_v21 = vpop.permute.xlu0 %2690  ;;  %v2510_v33 = vsel %vm6152_vm4, %v2401_v50, %v2509_v49  ;;  %v8224_v35 = vld [vmem:[#allocation14_spill] sm:$0xff]  ;;  %v8225_v22 = vshll.u32 %v6400_v55, 16 }
 0x1f4   : > { %v2267_v26 = vld [vmem:[#allocation2 + $0x84] sm:$0x1]  ;;  %v1865_v38 = vsel %vm6163_vm14, %v1768_v0, %v1864_v58  ;;  %2511 = vst [vmem:[#allocation2 + $0x88] sm:$0xf] %v2510_v33  ;;  %v2512_v51 = vld [vmem:[#allocation2 + $0x94] sm:$0xf] }
 0x1f5   : > { %v2268_v9 = vsel %vm6054_vm10, 0, %v2267_v26  ;;  %1866 = vst [vmem:[#allocation2 + $0x90] sm:$0xf] %v1865_v38  ;;  %v1454_v19 = vld [vmem:[#allocation2 + $0xe4] sm:$0x1]  ;;  %v1211_v58 = vor.u32 %v8225_v22, %v1208_v61  ;;  %v4927_v38 = vor.u32 %v5133_v54, %v4926_v8  ;;  %v5153_v33 = vld [vmem:[%s8061_s3 + $0x8] sm:$0xff]  ;;  %v7116_v61 = vpop.f32.mrf.mxu1 }
 0x1f6   : > { %2269 = vst [vmem:[#allocation2 + $0x84] sm:$0x1] %v2268_v9  ;;  %v5099_v44 = vld [vmem:[#allocation2 + $0x68] sm:$0xf0]  ;;  %v1455_v0 = vsel %vm5655_vm7, 0, %v1454_v19  ;;  %4208 = vmatpush.bf16.msrb.mxu2 %v5153_v33 }
 0x1f7   : > { %v2264_v32 = vld [vmem:[#allocation2 + $0x78] sm:$0x1]  ;;  %v4787_v46 = vor.u32 %v5099_v44, %v4786_v39  ;;  %1456 = vst [vmem:[#allocation2 + $0xe4] sm:$0x1] %v1455_v0  ;;  %2414 = vrot.lane.b32.xlu2 %v8224_v35, %s5303_s27  ;;  %v1365_v26 = vld [vmem:[#allocation2 + $0xf0] sm:$0xf] }
 0x1f8   : > { %v2265_v49 = vsel %vm6054_vm10, 0, %v2264_v32  ;;  %v1366_v50 = vsel %vm5635_vm3, %v1211_v58, %v1365_v26  ;;  %v1545_v39 = vpop.permute.xlu2 %1544  ;;  %1552 = vrot.lane.b32.xlu0 %v6400_v55, %s5303_s27  ;;  %v1867_v19 = vld [vmem:[#allocation2 + $0x9c] sm:$0xf]  ;;  %v1469_v54 = vld [vmem:[#allocation2 + $0x12c] sm:$0x1] }
 0x1f9   : > { %2266 = vst [vmem:[#allocation2 + $0x78] sm:$0x1] %v2265_v49  ;;  %3779 = vmatmul.bf16.gmra.mxu3 %v4787_v46  ;;  %1779 = vrot.lane.b32.xlu1 %v8224_v35, %s5305_s28  ;;  %v5152_v46 = vld [vmem:[%s8061_s3] sm:$0xff]  ;;  %v1472_v26 = vld [vmem:[#allocation2 + $0x138] sm:$0x1] }
 0x1fa   : > { %v2873_v9 = vld [vmem:[#allocation2 + $0x7c] sm:$0x1]  ;;  %1367 = vst [vmem:[#allocation2 + $0xf0] sm:$0xf] %v1366_v50  ;;  %5015 = vmatmul.msk.bf16.gmra.mxu1 %vm3702_vm12, %v4927_v38  ;;  %v1770_v0 = vpop.permute.xlu1 %1769  ;;  %v1470_v50 = vsel %vm5655_vm7, 0, %v1469_v54  ;;  %4209 = vmatpush.bf16.msrb.mxu2 %v5152_v46  ;;  %v1473_v33 = vsel %vm5655_vm7, 0, %v1472_v26 }
 0x1fb   : > { %v2874_v8 = vsel %vm6380_vm6, 0, %v2873_v9  ;;  %1616 = vst.msk [vmem:[#allocation2 + $0xb4] sm:$0xf] %vm8226_vm5, %v1545_v39  ;;  %v2403_v32 = vpop.permute.xlu0 %2402  ;;  %v1868_v22 = vsel %vm6163_vm14, %v1770_v0, %v1867_v19  ;;  %v2607_v38 = vld [vmem:[#allocation2 + $0x88] sm:$0x8]  ;;  %v8228_v19 = vshrl.u32 %v6467_v62, 16 }
 0x1fc   : > { %2875 = vst [vmem:[#allocation2 + $0x7c] sm:$0x1] %v2874_v8  ;;  %v1956_v44 = vld [vmem:[#allocation2 + $0x90] sm:$0x8]  ;;  %v2513_v49 = vsel %vm6152_vm4, %v2403_v32, %v2512_v51  ;;  %v2608_v39 = vsel %vm6223_vm13, 0, %v2607_v38  ;;  %v8229_v8 = vshrl.u32 %v6393_v20, 16 }
 0x1fd   : > { %3028 = vst.msk [vmem:[#allocation2 + $0x7c] sm:$0xf] %vm8214_vm0, %v7065_v23  ;;  %v1957_v35 = vsel %vm6232_vm2, 0, %v1956_v44  ;;  %v8227_v23 = vshrl.u32 %v8219_v16, 16  ;;  %v1215_v51 = vrot.slane %v8228_v19, 7  ;;  %v8231_v26 = vshrl.u32 %v6458_v2, 16 }
 0x1fe   : > { %1958 = vst [vmem:[#allocation2 + $0x90] sm:$0x8] %v1957_v35  ;;  %v1257_v44 = vrot.slane %v8229_v8, 7  ;;  %v1368_v54 = vld [vmem:[#allocation2 + $0xfc] sm:$0xf]  ;;  %vm8247_vm0 = vcmask 781824  }
 0x1ff   : > { %1869 = vst [vmem:[#allocation2 + $0x9c] sm:$0xf] %v1868_v22  ;;  %2076 = vrot.lane.b32.xlu2 %v1211_v58, %s5304_s29  ;;  %v1250_v9 = vrot.slane %v8227_v23, 7  ;;  %v8230_v22 = vshll.u32 %v6467_v62, 16  ;;  %v1264_v38 = vrot.slane %v8231_v26, 7  ;;  %v3760_v23 = vpop.f32.mrf.mxu3 }
 0x200   : > { %2514 = vst [vmem:[#allocation2 + $0x94] sm:$0xf] %v2513_v49  ;;  %v7148_v35 = vpop.permute.xlu2 %2958  ;;  %2966 = vrot.lane.b32.xlu0 %v6400_v55, %s5304_s29  ;;  %v4798_v46 = vld [vmem:[#allocation2 + $0x78] sm:$0xf] }
 0x201   : > { %2609 = vst [vmem:[#allocation2 + $0x88] sm:$0x8] %v2608_v39  ;;  %v1457_v0 = vld [vmem:[#allocation2 + $0xf0] sm:$0x1]  ;;  %2702 = vrot.lane.b32.xlu1 %v1211_v58, %s5305_s28  ;;  %v7155_v49 = vor.u32 %v8230_v22, %v1215_v51  ;;  %v5102_v39 = vld [vmem:[#allocation2 + $0x80] sm:$0xf0] }
 0x202   : > { %v1458_v32 = vsel %vm5655_vm7, 0, %v1457_v0  ;;  %1471 = vst [vmem:[#allocation2 + $0x12c] sm:$0x1] %v1470_v50  ;;  %v1543_v19 = vpop.permute.xlu1 %1542  ;;  %v8232_v58 = vshll.u32 %v8219_v16, 16  ;;  %v1383_v51 = vld [vmem:[#allocation2 + $0x144] sm:$0xf]  ;;  %v4799_v5 = vor.u32 %v5102_v39, %v4798_v46 }
 0x203   : > { %1459 = vst [vmem:[#allocation2 + $0xf0] sm:$0x1] %v1458_v32  ;;  %v7159_v8 = vpop.permute.xlu0 %2064  ;;  %v1369_v55 = vsel %vm5635_vm3, %v7155_v49, %v1368_v54  ;;  %v8234_v32 = vshll.u32 %v6393_v20, 16 }
 0x204   : > { %1474 = vst [vmem:[#allocation2 + $0x138] sm:$0x1] %v1473_v33  ;;  %v7166_v0 = vor.u32 %v8232_v58, %v1250_v9  ;;  %v3849_v22 = vpop.f32.mrf.mxu0  ;;  %v8235_v9 = vshll.u32 %v6458_v2, 16 }
 0x205   : > { %v2172_v50 = vld [vmem:[#allocation2 + $0x90] sm:$0xf]  ;;  %1615 = vst.msk [vmem:[#allocation2 + $0xa8] sm:$0xf] %vm8233_vm8, %v1543_v19  ;;  %v7171_v26 = vor.u32 %v8234_v32, %v1257_v44  ;;  %v3850_v33 = vadd.f32 %v3849_v22, %v3760_v23  ;;  %v8237_v19 = vld [vmem:[#allocation17_spill] sm:$0xff]  ;;  %vm8249_vm8 = vmmov %vm8245_vm9 }
 0x206   : > { %v2173_v54 = vsel %vm5994_vm15, %v7084_v60, %v2172_v50  ;;  %v1959_v28 = vld [vmem:[#allocation2 + $0x9c] sm:$0x8]  ;;  %1370 = vst [vmem:[#allocation2 + $0xfc] sm:$0xf] %v1369_v55  ;;  %v7178_v58 = vor.u32 %v8235_v9, %v1264_v38  ;;  %v8236_v44 = vld [vmem:[#allocation16_spill] sm:$0xff]  ;;  %v8238_v32 = vshrl.u32 %v8237_v19, 16  ;;  %v1384_v38 = vsel %vm5635_vm3, %v7166_v0, %v1383_v51 }
 0x207   : > { %2174 = vst [vmem:[#allocation2 + $0x90] sm:$0xf] %v2173_v54  ;;  %v1960_v46 = vsel %vm6232_vm2, 0, %v1959_v28  ;;  %v2610_v39 = vld [vmem:[#allocation2 + $0x94] sm:$0x8]  ;;  %1781 = vrot.lane.b32.xlu2 %v8236_v44, %s5305_s28  ;;  %v1387_v55 = vsel %vm5635_vm3, %v7171_v26, %v1386_v3  ;;  %v3939_v50 = vadd.f32 %v6848_v47, %v3850_v33 }
 0x208   : > { %v1271_v12 = vrot.slane %v8238_v32, 7  ;;  %v2785_v60 = vld [vmem:[#allocation2 + $0x88] sm:$0xf]  ;;  %1961 = vst [vmem:[#allocation2 + $0x9c] sm:$0x8] %v1960_v46  ;;  %v2611_v23 = vsel %vm6223_vm13, 0, %v2610_v39  ;;  %v7203_v54 = vpop.permute.xlu2 %2694  ;;  %2416 = vrot.lane.b32.xlu0 %v8236_v44, %s5303_s27  ;;  %v1390_v3 = vsel %vm5635_vm3, %v7178_v58, %v1389_v56  ;;  %v3762_v39 = vpop.f32.mrf.mxu3 }
 0x209   : > { %v2786_v28 = vsel %vm6301_vm1, %v7091_v21, %v2785_v60  ;;  %2612 = vst [vmem:[#allocation2 + $0x94] sm:$0x8] %v2611_v23  ;;  %3784 = vmatmul.bf16.gmra.mxu3 %v4799_v5  ;;  %v7201_v22 = vld [vmem:[%s8064_s6] ss:$0 sm:$0xff]  ;;  %1554 = vrot.lane.b32.xlu1 %v6467_v62, %s5303_s27  ;;  %v8239_v5 = vshll.u32 %v8237_v19, 16 }
 0x20a   : > { %2787 = vst [vmem:[#allocation2 + $0x88] sm:$0xf] %v2786_v28  ;;  %v7216_v21 = vpop.permute.xlu1 %2956  ;;  %v1392_v9 = vld [vmem:[#allocation2 + $0x168] sm:$0xf]  ;;  %v7221_v46 = vld [vmem:[%s8065_s7] ss:$0 sm:$0xff]  ;;  %v4022_v60 = vmul.f32 %v7201_v22, %v3939_v50 }
 0x20b   : > { %1385 = vst [vmem:[#allocation2 + $0x144] sm:$0xf] %v1384_v38  ;;  %v7214_v47 = vor.u32 %v8239_v5, %v1271_v12  ;;  %v1772_v51 = vpop.permute.xlu0 %1771 }
 0x20c   : > { %v1870_v33 = vld [vmem:[#allocation2 + $0xa8] sm:$0xf]  ;;  %1388 = vst [vmem:[#allocation2 + $0x150] sm:$0xf] %v1387_v55  ;;  %v3851_v44 = vpop.f32.mrf.mxu0 }
 0x20d   : > { %v1871_v56 = vsel %vm6163_vm14, %v1772_v51, %v1870_v33  ;;  %v1460_v32 = vld [vmem:[#allocation2 + $0xfc] sm:$0x1]  ;;  %1391 = vst [vmem:[#allocation2 + $0x15c] sm:$0xf] %v1390_v3  ;;  %v3852_v23 = vadd.f32 %v3851_v44, %v3762_v39  ;;  %v1393_v3 = vsel %vm5635_vm3, %v7214_v47, %v1392_v9  ;;  %v4058_v39 = vadd.f32 %v7221_v46, %v4022_v60  ;;  %v8240_v9 = vld [vmem:[#allocation19_spill] sm:$0xff] }
 0x20e   : > { %v2270_v12 = vld [vmem:[#allocation2 + $0x90] sm:$0x1]  ;;  %1872 = vst [vmem:[#allocation2 + $0xa8] sm:$0xf] %v1871_v56  ;;  %v1461_v38 = vsel %vm5655_vm7, 0, %v1460_v32 }
 0x20f   : > { %v2271_v28 = vsel %vm6054_vm10, 0, %v2270_v12  ;;  %v2175_v55 = vld [vmem:[#allocation2 + $0x9c] sm:$0xf]  ;;  %2704 = vrot.lane.b32.xlu2 %v7155_v49, %s5305_s28  ;;  %1462 = vst [vmem:[#allocation2 + $0xfc] sm:$0x1] %v1461_v38  ;;  %v3941_v50 = vadd.f32 %v6882_v10, %v3852_v23 }
 0x210   : > { %2272 = vst [vmem:[#allocation2 + $0x90] sm:$0x1] %v2271_v28  ;;  %v2176_v5 = vsel %vm5994_vm15, %v7159_v8, %v2175_v55  ;;  %v2067_v56 = vpop.permute.xlu2 %2066  ;;  %1783 = vrot.lane.b32.xlu0 %v8240_v9, %s5305_s28  ;;  %v2788_v60 = vld [vmem:[#allocation2 + $0x94] sm:$0xf]  ;;  %v2518_v38 = vld [vmem:[#allocation2 + $0xac] sm:$0xf] }
 0x211   : > { %v2876_v51 = vld [vmem:[#allocation2 + $0x88] sm:$0x1]  ;;  %2177 = vst [vmem:[#allocation2 + $0x9c] sm:$0xf] %v2176_v5  ;;  %v4023_v44 = vmul.f32 %v7201_v22, %v3941_v50  ;;  %2968 = vrot.lane.b32.xlu1 %v6467_v62, %s5304_s29  ;;  %v4090_v5 = vmax.f32 %v4058_v39, 0.0 }
 0x212   : > { %v2877_v33 = vsel %vm6380_vm6, 0, %v2876_v51  ;;  %v1475_v10 = vld [vmem:[#allocation2 + $0x144] sm:$0x1]  ;;  %1394 = vst [vmem:[#allocation2 + $0x168] sm:$0xf] %v1393_v3  ;;  %v2693_v23 = vpop.permute.xlu1 %2692 }
 0x213   : > { %2878 = vst [vmem:[#allocation2 + $0x88] sm:$0x1] %v2877_v33  ;;  %v1476_v8 = vsel %vm5655_vm7, 0, %v1475_v10  ;;  %v1478_v32 = vld [vmem:[#allocation2 + $0x150] sm:$0x1]  ;;  %v4059_v12 = vadd.f32 %v7221_v46, %v4023_v44  ;;  %v2407_v28 = vpop.permute.xlu0 %2406  ;;  %v2789_v55 = vsel %vm6301_vm1, %v2693_v23, %v2788_v60  ;;  %v8242_v60 = vshrl.u32 %v6591_v52, 16 }
 0x214   : > { %3029 = vst.msk [vmem:[#allocation2 + $0x88] sm:$0xf] %vm8241_vm11, %v7046_v18  ;;  %v2519_v3 = vsel %vm6152_vm4, %v2407_v28, %v2518_v38  ;;  %v1481_v50 = vld [vmem:[#allocation2 + $0x15c] sm:$0x1]  ;;  %v1479_v33 = vsel %vm5655_vm7, 0, %v1478_v32  ;;  %vm8251_vm11 = vmmov %vm8226_vm5 }
 0x215   : > { %v1962_v62 = vld [vmem:[#allocation2 + $0xa8] sm:$0x8]  ;;  %1477 = vst [vmem:[#allocation2 + $0x144] sm:$0x1] %v1476_v8  ;;  %v4091_v51 = vmax.f32 %v4059_v12, 0.0  ;;  %v1482_v8 = vsel %vm5655_vm7, 0, %v1481_v50 }
 0x216   : > { %v1963_v18 = vsel %vm6232_vm2, 0, %v1962_v62  ;;  %2790 = vst [vmem:[#allocation2 + $0x94] sm:$0xf] %v2789_v55  ;;  %v1278_v23 = vrot.slane %v8242_v60, 7  ;;  %v2521_v32 = vld [vmem:[#allocation2 + $0xb8] sm:$0xf] }
 0x217   : > { %1964 = vst [vmem:[#allocation2 + $0xa8] sm:$0x8] %v1963_v18  ;;  %2418 = vrot.lane.b32.xlu2 %v8240_v9, %s5303_s27  ;;  %v4122_v44 = vpack.c.bf16 %v4091_v51, %v4090_v5  ;;  %v5101_v62 = vld [vmem:[#allocation2 + $0x7c] sm:$0xf]  ;;  %v2515_v50 = vld [vmem:[#allocation2 + $0xa0] sm:$0xf] }
 0x218   : > { %v2273_v10 = vld [vmem:[#allocation2 + $0x9c] sm:$0x1]  ;;  %2520 = vst [vmem:[#allocation2 + $0xac] sm:$0xf] %v2519_v3  ;;  %v2409_v38 = vpop.permute.xlu2 %2408  ;;  %1556 = vrot.lane.b32.xlu0 %v6551_v13, %s5303_s27 }
 0x219   : > { %v2274_v39 = vsel %vm6054_vm10, 0, %v2273_v10  ;;  %1480 = vst [vmem:[#allocation2 + $0x150] sm:$0x1] %v1479_v33  ;;  %v1484_v12 = vld [vmem:[#allocation2 + $0x168] sm:$0x1]  ;;  %5024 = vmatmul.msk.bf16.vlgmr.msrb.gmra.mxu2 %vm3702_vm12, %v4122_v44  ;;  %2078 = vrot.lane.b32.xlu1 %v7155_v49, %s5304_s29  ;;  %v2522_v28 = vsel %vm6152_vm4, %v2409_v38, %v2521_v32  ;;  %v8243_v33 = vshll.u32 %v6591_v52, 16 }
 0x21a   : > { %2275 = vst [vmem:[#allocation2 + $0x9c] sm:$0x1] %v2274_v39  ;;  %v1485_v9 = vsel %vm5655_vm7, 0, %v1484_v12  ;;  %v2405_v5 = vpop.permute.xlu1 %2404  ;;  %v1395_v10 = vld [vmem:[#allocation2 + $0x174] sm:$0xf]  ;;  %v8244_v38 = vshrl.u32 %v6551_v13, 16 }
 0x21b   : > { %v4800_v55 = vld [vmem:[#allocation2 + $0x84] sm:$0xf0]  ;;  %1483 = vst [vmem:[#allocation2 + $0x15c] sm:$0x1] %v1482_v8  ;;  %v7277_v51 = vpop.permute.xlu0 %2068  ;;  %v2516_v49 = vsel %vm6152_vm4, %v2405_v5, %v2515_v50  ;;  %v7283_v44 = vor.u32 %v8243_v33, %v1278_v23 }
 0x21c   : > { %2523 = vst [vmem:[#allocation2 + $0xb8] sm:$0xf] %v2522_v28  ;;  %v4803_v3 = vor.u32 %v5101_v62, %v4800_v55  ;;  %v1222_v23 = vrot.slane %v8244_v38, 7  ;;  %v8246_v28 = vshll.u32 %v6551_v13, 16  ;;  %v4810_v55 = vld [vmem:[#allocation2 + $0x90] sm:$0xf] }
 0x21d   : > { %v2879_v18 = vld [vmem:[#allocation2 + $0x94] sm:$0x1]  ;;  %1486 = vst [vmem:[#allocation2 + $0x168] sm:$0x1] %v1485_v9  ;;  %v1396_v9 = vsel %vm5635_vm3, %v7283_v44, %v1395_v10  ;;  %v1371_v5 = vld [vmem:[#allocation2 + $0x108] sm:$0xf] }
 0x21e   : > { %v2178_v39 = vld [vmem:[#allocation2 + $0xa8] sm:$0xf]  ;;  %v2880_v8 = vsel %vm6380_vm6, 0, %v2879_v18  ;;  %3873 = vmatmul.bf16.gmra.mxu0 %v4803_v3  ;;  %2517 = vst [vmem:[#allocation2 + $0xa0] sm:$0xf] %v2516_v49 }
 0x21f   : > { %v2179_v12 = vsel %vm5994_vm15, %v2067_v56, %v2178_v39  ;;  %2881 = vst [vmem:[#allocation2 + $0x94] sm:$0x1] %v2880_v8  ;;  %v2616_v60 = vld [vmem:[#allocation2 + $0xac] sm:$0x8]  ;;  %v1225_v56 = vor.u32 %v8246_v28, %v1222_v23  ;;  %v1873_v10 = vld [vmem:[#allocation2 + $0xb4] sm:$0xf] }
 0x220   : > { %2180 = vst [vmem:[#allocation2 + $0xa8] sm:$0xf] %v2179_v12  ;;  %v2617_v32 = vsel %vm6223_vm13, 0, %v2616_v60  ;;  %v1561_v62 = vpop.permute.xlu2 %1560  ;;  %2970 = vrot.lane.b32.xlu0 %v6551_v13, %s5304_s29  ;;  %v8248_v8 = vshrl.u32 %v6596_v36, 16  ;;  %v2184_v38 = vld [vmem:[#allocation2 + $0xc0] sm:$0xf] }
 0x221   : > { %3030 = vst.msk [vmem:[#allocation2 + $0x94] sm:$0xf] %vm8245_vm9, %v7216_v21  ;;  %1558 = vrot.lane.b32.xlu1 %v6596_v36, %s5303_s27  ;;  %v5105_v50 = vld [vmem:[#allocation2 + $0x98] sm:$0xf0]  ;;  %2080 = vrot.lane.b32.xlu2 %v1225_v56, %s5304_s29  ;;  %v8250_v28 = vshll.u32 %v6596_v36, 16  ;;  %vm8256_vm9 = vmmov %vm8226_vm5 }
 0x222   : > { %2618 = vst [vmem:[#allocation2 + $0xac] sm:$0x8] %v2617_v32  ;;  %v4811_v18 = vor.u32 %v5105_v50, %v4810_v55  ;;  %v1774_v49 = vpop.permute.xlu1 %1773  ;;  %v1229_v12 = vrot.slane %v8248_v8, 7  ;;  %v1372_v32 = vsel %vm5635_vm3, %v1225_v56, %v1371_v5  ;;  %v1374_v55 = vld [vmem:[#allocation2 + $0x114] sm:$0xf] }
 0x223   : > { %v2619_v3 = vld [vmem:[#allocation2 + $0xb8] sm:$0x8]  ;;  %1624 = vst.msk [vmem:[#allocation2 + $0x12c] sm:$0xf] %vm8226_vm5, %v1561_v62  ;;  %v2697_v39 = vpop.permute.xlu0 %2696 }
 0x224   : > { %v2620_v21 = vsel %vm6223_vm13, 0, %v2619_v3  ;;  %1397 = vst [vmem:[#allocation2 + $0x174] sm:$0xf] %v1396_v9  ;;  %3789 = vmatmul.bf16.gmra.mxu3 %v4811_v18  ;;  %v1874_v9 = vsel %vm6163_vm14, %v1774_v49, %v1873_v10  ;;  %v7324_v62 = vor.u32 %v8250_v28, %v1229_v12  ;;  %v3765_v10 = vpop.f32.mrf.mxu3 }
 0x225   : > { %2621 = vst [vmem:[#allocation2 + $0xb8] sm:$0x8] %v2620_v21  ;;  %v2613_v33 = vld [vmem:[#allocation2 + $0xa0] sm:$0x8] }
 0x226   : > { %2841 = vst.msk [vmem:[#allocation2 + $0xb8] sm:$0xf] %vm8247_vm0, %v8210_v25  ;;  %v2614_v13 = vsel %vm6223_vm13, 0, %v2613_v33  ;;  %v1375_v18 = vsel %vm5635_vm3, %v7324_v62, %v1374_v55  ;;  %vm8253_vm3 = vmmov %vm8249_vm8 }
 0x227   : > { %v2276_v60 = vld [vmem:[#allocation2 + $0xa8] sm:$0x1]  ;;  %3048 = vst.msk [vmem:[#allocation2 + $0xb8] sm:$0xf] %vm8249_vm8, %v8210_v25  ;;  %vm8258_vm0 = vmmov %vm8226_vm5 }
 0x228   : > { %v2277_v23 = vsel %vm6054_vm10, 0, %v2276_v60  ;;  %2615 = vst [vmem:[#allocation2 + $0xa0] sm:$0x8] %v2614_v13  ;;  %v2071_v21 = vpop.permute.xlu2 %2070  ;;  %2706 = vrot.lane.b32.xlu0 %v1225_v56, %s5305_s28  ;;  %vm8260_vm8 = vmmov %vm8253_vm3 }
 0x229   : > { %2278 = vst [vmem:[#allocation2 + $0xa8] sm:$0x1] %v2277_v23  ;;  %v2794_v3 = vld [vmem:[#allocation2 + $0xac] sm:$0xf]  ;;  %2972 = vrot.lane.b32.xlu1 %v6596_v36, %s5304_s29  ;;  %v2185_v5 = vsel %vm5994_vm15, %v2071_v21, %v2184_v38  ;;  %1785 = vrot.lane.b32.xlu2 %v6609_v48, %s5305_s28  ;;  %v2548_v38 = vld [vmem:[#allocation2 + $0x124] sm:$0xf] }
 0x22a   : > { %1373 = vst [vmem:[#allocation2 + $0x108] sm:$0xf] %v1372_v32  ;;  %v2795_v50 = vsel %vm6301_vm1, %v2697_v39, %v2794_v3  ;;  %v2961_v33 = vpop.permute.xlu1 %2960 }
 0x22b   : > { %1875 = vst [vmem:[#allocation2 + $0xb4] sm:$0xf] %v1874_v9  ;;  %v1487_v49 = vld [vmem:[#allocation2 + $0x174] sm:$0x1]  ;;  %v1547_v13 = vpop.permute.xlu0 %1546 }
 0x22c   : > { %2796 = vst [vmem:[#allocation2 + $0xac] sm:$0xf] %v2795_v50  ;;  %v1488_v36 = vsel %vm5655_vm7, 0, %v1487_v49 }
 0x22d   : > { %2186 = vst [vmem:[#allocation2 + $0xc0] sm:$0xf] %v2185_v5 }
 0x22e   : > { %1376 = vst [vmem:[#allocation2 + $0x114] sm:$0xf] %v1375_v18 }
 0x22f   : > { %v2791_v39 = vld [vmem:[#allocation2 + $0xa0] sm:$0xf]  ;;  %1617 = vst.msk [vmem:[#allocation2 + $0xcc] sm:$0xf] %vm8251_vm11, %v1547_v13  ;;  %vm8261_vm11 = vmmov %vm8258_vm0 }
 0x230   : > { %v2792_v7 = vsel %vm6301_vm1, %v7203_v54, %v2791_v39  ;;  %1489 = vst [vmem:[#allocation2 + $0x174] sm:$0x1] %v1488_v36  ;;  %v2427_v23 = vpop.permute.xlu2 %2426  ;;  %2420 = vrot.lane.b32.xlu0 %v6609_v48, %s5303_s27  ;;  %v8252_v36 = vshrl.u32 %v6707_v63, 16 }
 0x231   : > { %v3854_v56 = vpop.f32.mrf.mxu0  ;;  %2793 = vst [vmem:[#allocation2 + $0xa0] sm:$0xf] %v2792_v7  ;;  %v1463_v8 = vld [vmem:[#allocation2 + $0x108] sm:$0x1]  ;;  %2708 = vrot.lane.b32.xlu1 %v7324_v62, %s5305_s28  ;;  %2422 = vrot.lane.b32.xlu2 %v6677_v27, %s5303_s27  ;;  %v2549_v21 = vsel %vm6152_vm4, %v2427_v23, %v2548_v38 }
 0x232   : > { %v3855_v12 = vadd.f32 %v3854_v56, %v3765_v10  ;;  %v1464_v60 = vsel %vm5655_vm7, 0, %v1463_v8  ;;  %v1965_v32 = vld [vmem:[#allocation2 + $0xb4] sm:$0x8]  ;;  %v1776_v3 = vpop.permute.xlu1 %1775  ;;  %v2027_v13 = vrot.slane %v8252_v36, 7  ;;  %v2524_v10 = vld [vmem:[#allocation2 + $0xc4] sm:$0xf]  ;;  %v3767_v56 = vpop.f32.mrf.mxu3 }
 0x233   : > { %1465 = vst [vmem:[#allocation2 + $0x108] sm:$0x1] %v1464_v60  ;;  %v1966_v9 = vsel %vm6232_vm2, 0, %v1965_v32  ;;  %v2885_v28 = vld [vmem:[#allocation2 + $0xac] sm:$0x1]  ;;  %v2411_v49 = vpop.permute.xlu0 %2410  ;;  %v8254_v32 = vshll.u32 %v6707_v63, 16 }
 0x234   : > { %1967 = vst [vmem:[#allocation2 + $0xb4] sm:$0x8] %v1966_v9  ;;  %v2886_v54 = vsel %vm6380_vm6, 0, %v2885_v28  ;;  %v2282_v55 = vld [vmem:[#allocation2 + $0xc0] sm:$0x1]  ;;  %v3944_v18 = vadd.f32 %v6922_v6, %v3855_v12  ;;  %v2525_v31 = vsel %vm6152_vm4, %v2411_v49, %v2524_v10  ;;  %v8257_v36 = vld [vmem:[#allocation13_spill] sm:$0xff] }
 0x235   : > { %2887 = vst [vmem:[#allocation2 + $0xac] sm:$0x1] %v2886_v54  ;;  %v2283_v50 = vsel %vm6054_vm10, 0, %v2282_v55  ;;  %v1466_v5 = vld [vmem:[#allocation2 + $0x114] sm:$0x1] }
 0x236   : > { %2284 = vst [vmem:[#allocation2 + $0xc0] sm:$0x1] %v2283_v50  ;;  %v1467_v48 = vsel %vm5655_vm7, 0, %v1466_v5  ;;  %v1876_v7 = vld [vmem:[#allocation2 + $0xcc] sm:$0xf]  ;;  %v4024_v6 = vmul.f32 %v7201_v22, %v3944_v18  ;;  %vm8255_vm7 = vmmov %vm8253_vm3 }
 0x237   : > { %3032 = vst.msk [vmem:[#allocation2 + $0xac] sm:$0xf] %vm8253_vm3, %v2961_v33  ;;  %v2030_v33 = vor.u32 %v8254_v32, %v2027_v13  ;;  %v1877_v9 = vsel %vm6163_vm14, %v1776_v3, %v1876_v7  ;;  %v5104_v18 = vld [vmem:[#allocation2 + $0x94] sm:$0xf] }
 0x238   : > { %v2882_v39 = vld [vmem:[#allocation2 + $0xa0] sm:$0x1]  ;;  %2550 = vst [vmem:[#allocation2 + $0x124] sm:$0xf] %v2549_v21  ;;  %v1551_v38 = vpop.permute.xlu2 %1550  ;;  %1787 = vrot.lane.b32.xlu0 %v6677_v27, %s5305_s28 }
 0x239   : > { %v2883_v8 = vsel %vm6380_vm6, 0, %v2882_v39  ;;  %v3856_v60 = vpop.f32.mrf.mxu0  ;;  %1468 = vst [vmem:[#allocation2 + $0x114] sm:$0x1] %v1467_v48  ;;  %2082 = vrot.lane.b32.xlu1 %v7324_v62, %s5304_s29  ;;  %2084 = vrot.lane.b32.xlu2 %v2030_v33, %s5304_s29 }
 0x23a   : > { %2884 = vst [vmem:[#allocation2 + $0xa0] sm:$0x1] %v2883_v8  ;;  %v3857_v12 = vadd.f32 %v3856_v60, %v3767_v56  ;;  %v1549_v62 = vpop.permute.xlu1 %1548 }
 0x23b   : > { %3031 = vst.msk [vmem:[#allocation2 + $0xa0] sm:$0xf] %vm8255_vm7, %v7148_v35  ;;  %v2181_v23 = vld [vmem:[#allocation2 + $0xb4] sm:$0xf]  ;;  %v4060_v35 = vadd.f32 %v7221_v46, %v4024_v6  ;;  %v7388_v3 = vpop.permute.xlu0 %2962  ;;  %vm8263_vm7 = vmmov %vm8258_vm0 }
 0x23c   : > { %v3946_v28 = vadd.f32 %v6965_v14, %v3857_v12  ;;  %v2182_v54 = vsel %vm5994_vm15, %v7277_v51, %v2181_v23  ;;  %2526 = vst [vmem:[#allocation2 + $0xc4] sm:$0xf] %v2525_v31  ;;  %v1897_v31 = vld [vmem:[#allocation2 + $0x12c] sm:$0xf]  ;;  %v2527_v23 = vld [vmem:[#allocation2 + $0xd0] sm:$0xf] }
 0x23d   : > { %2183 = vst [vmem:[#allocation2 + $0xb4] sm:$0xf] %v2182_v54  ;;  %v4092_v51 = vmax.f32 %v4060_v35, 0.0  ;;  %v4822_v54 = vld [vmem:[#allocation2 + $0xa8] sm:$0xf] }
 0x23e   : > { %v4025_v55 = vmul.f32 %v7201_v22, %v3946_v28  ;;  %1878 = vst [vmem:[#allocation2 + $0xcc] sm:$0xf] %v1877_v9 }
 0x23f   : > { %v2646_v50 = vld [vmem:[#allocation2 + $0x124] sm:$0x8]  ;;  %1619 = vst.msk [vmem:[#allocation2 + $0xe4] sm:$0xf] %vm8256_vm9, %v1551_v38  ;;  %vm8265_vm9 = vmmov %vm8253_vm3 }
 0x240   : > { %v4061_v27 = vadd.f32 %v7221_v46, %v4025_v55  ;;  %v2647_v14 = vsel %vm6223_vm13, 0, %v2646_v50  ;;  %1618 = vst.msk [vmem:[#allocation2 + $0xd8] sm:$0xf] %vm8226_vm5, %v1549_v62  ;;  %1793 = vrot.lane.b32.xlu0 %v8257_v36, %s5305_s28  ;;  %vm8266_vm5 = vmmov %vm8258_vm0 }
 0x241   : > { %2648 = vst [vmem:[#allocation2 + $0x124] sm:$0x8] %v2647_v14  ;;  %v7395_v5 = vpop.permute.xlu2 %1791  ;;  %2086 = vrot.lane.b32.xlu1 %v7054_v43, %s5304_s29  ;;  %2710 = vrot.lane.b32.xlu2 %v2030_v33, %s5305_s28  ;;  %v4824_v14 = vld [vmem:[#allocation2 + $0xb4] sm:$0xf0] }
 0x242   : > { %v4093_v21 = vmax.f32 %v4061_v27, 0.0  ;;  %v4812_v48 = vld [vmem:[#allocation2 + $0x9c] sm:$0xf0]  ;;  %v2699_v56 = vpop.permute.xlu1 %2698 }
 0x243   : > { %v2622_v49 = vld [vmem:[#allocation2 + $0xc4] sm:$0x8]  ;;  %v4815_v13 = vor.u32 %v5104_v18, %v4812_v48  ;;  %v1790_v6 = vpop.permute.xlu0 %1789  ;;  %v2530_v18 = vld [vmem:[#allocation2 + $0xdc] sm:$0xf] }
 0x244   : > { %v2279_v10 = vld [vmem:[#allocation2 + $0xb4] sm:$0x1]  ;;  %v4123_v39 = vpack.c.bf16 %v4093_v21, %v4092_v51  ;;  %v2623_v7 = vsel %vm6223_vm13, 0, %v2622_v49  ;;  %v1898_v12 = vsel %vm6163_vm14, %v1790_v6, %v1897_v31 }
 0x245   : > { %v2280_v8 = vsel %vm6054_vm10, 0, %v2279_v10  ;;  %2624 = vst [vmem:[#allocation2 + $0xc4] sm:$0x8] %v2623_v7  ;;  %v1968_v43 = vld [vmem:[#allocation2 + $0xcc] sm:$0x8]  ;;  %3878 = vmatmul.bf16.gmra.mxu0 %v4815_v13 }
 0x246   : > { %2281 = vst [vmem:[#allocation2 + $0xb4] sm:$0x1] %v2280_v8  ;;  %5025 = vmatmul.msk.bf16.gmra.mxu2 %vm3702_vm12, %v4123_v39  ;;  %v1969_v60 = vsel %vm6232_vm2, 0, %v1968_v43  ;;  %v8259_v39 = vld [vmem:[#allocation15_spill] sm:$0xff] }
 0x247   : > { %1970 = vst [vmem:[#allocation2 + $0xcc] sm:$0x8] %v1969_v60 }
 0x248   : > { %1899 = vst [vmem:[#allocation2 + $0x12c] sm:$0xf] %v1898_v12  ;;  %v3859_v32 = vpop.f32.mrf.mxu0  ;;  %2974 = vrot.lane.b32.xlu0 %v6707_v63, %s5304_s29  ;;  %v5107_v63 = vld [vmem:[#allocation2 + $0xac] sm:$0xf] }
 0x249   : > { %v7411_v33 = vpop.permute.xlu2 %2700  ;;  %2424 = vrot.lane.b32.xlu1 %v6757_v29, %s5303_s27  ;;  %2088 = vrot.lane.b32.xlu2 %v7062_v17, %s5304_s29  ;;  %v4827_v13 = vor.u32 %v5107_v63, %v4824_v14 }
 0x24a   : > { %v2413_v9 = vpop.permute.xlu1 %2412 }
 0x24b   : > { %v2528_v35 = vsel %vm6152_vm4, %v2413_v9, %v2527_v23  ;;  %v1563_v29 = vpop.permute.xlu0 %1562 }
 0x24c   : > { %v2797_v38 = vld [vmem:[#allocation2 + $0xc4] sm:$0xf]  ;;  %1625 = vst.msk [vmem:[#allocation2 + $0x138] sm:$0xf] %vm8258_vm0, %v1563_v29 }
 0x24d   : > { %v2798_v28 = vsel %vm6301_vm1, %v2699_v56, %v2797_v38  ;;  %v5108_v62 = vld [vmem:[#allocation2 + $0xb0] sm:$0xf0]  ;;  %2529 = vst [vmem:[#allocation2 + $0xd0] sm:$0xf] %v2528_v35 }
 0x24e   : > { %2799 = vst [vmem:[#allocation2 + $0xc4] sm:$0xf] %v2798_v28  ;;  %v4823_v55 = vor.u32 %v5108_v62, %v4822_v54  ;;  %v2187_v6 = vld [vmem:[#allocation2 + $0xcc] sm:$0xf] }
 0x24f   : > { %v1989_v50 = vld [vmem:[#allocation2 + $0x12c] sm:$0x8] }
 0x250   : > { %v1990_v27 = vsel %vm6232_vm2, 0, %v1989_v50  ;;  %3794 = vmatmul.bf16.gmra.mxu3 %v4823_v55  ;;  %2712 = vrot.lane.b32.xlu0 %v7062_v17, %s5305_s28  ;;  %v3861_v10 = vpop.f32.mrf.mxu0  ;;  %v1879_v50 = vld [vmem:[#allocation2 + $0xd8] sm:$0xf] }
 0x251   : > { %v3770_v51 = vpop.f32.mrf.mxu3  ;;  %1991 = vst [vmem:[#allocation2 + $0x12c] sm:$0x8] %v1990_v27  ;;  %v2415_v48 = vpop.permute.xlu2 %2414  ;;  %2430 = vrot.lane.b32.xlu1 %v8257_v36, %s5303_s27  ;;  %2432 = vrot.lane.b32.xlu2 %v8259_v39, %s5303_s27 }
 0x252   : > { %v3860_v21 = vadd.f32 %v3859_v32, %v3770_v51  ;;  %v2531_v49 = vsel %vm6152_vm4, %v2415_v48, %v2530_v18  ;;  %v7434_v7 = vpop.permute.xlu1 %2964 }
 0x253   : > { %2532 = vst [vmem:[#allocation2 + $0xdc] sm:$0xf] %v2531_v49  ;;  %v1900_v43 = vld [vmem:[#allocation2 + $0x138] sm:$0xf]  ;;  %v2073_v60 = vpop.permute.xlu0 %2072 }
 0x254   : > { %v3949_v8 = vadd.f32 %v6996_v41, %v3860_v21  ;;  %v1901_v17 = vsel %vm6163_vm14, %v7395_v5, %v1900_v43  ;;  %v2625_v31 = vld [vmem:[#allocation2 + $0xd0] sm:$0x8]  ;;  %v2188_v41 = vsel %vm5994_vm15, %v2073_v60, %v2187_v6  ;;  %v8262_v43 = vld [vmem:[#allocation18_spill] sm:$0xff] }
 0x255   : > { %v2888_v56 = vld [vmem:[#allocation2 + $0xc4] sm:$0x1]  ;;  %3883 = vmatmul.bf16.gmra.mxu0 %v4827_v13  ;;  %v2626_v12 = vsel %vm6223_vm13, 0, %v2625_v31  ;;  %1902 = vst [vmem:[#allocation2 + $0x138] sm:$0xf] %v1901_v17 }
 0x256   : > { %v2889_v36 = vsel %vm6380_vm6, 0, %v2888_v56  ;;  %v4026_v38 = vmul.f32 %v7201_v22, %v3949_v8  ;;  %2627 = vst [vmem:[#allocation2 + $0xd0] sm:$0x8] %v2626_v12  ;;  %v2551_v60 = vld [vmem:[#allocation2 + $0x130] sm:$0xf] }
 0x257   : > { %2890 = vst [vmem:[#allocation2 + $0xc4] sm:$0x1] %v2889_v36 }
 0x258   : > { %3033 = vst.msk [vmem:[#allocation2 + $0xc4] sm:$0xf] %vm8260_vm8, %v7388_v3  ;;  %1568 = vrot.lane.b32.xlu0 %v6458_v2, %s5303_s27  ;;  %v4062_v62 = vadd.f32 %v7221_v46, %v4026_v38  ;;  %vm8269_vm8 = vmmov %vm8258_vm0 }
 0x259   : > { %v3772_v32 = vpop.f32.mrf.mxu3  ;;  %v7449_v9 = vpop.permute.xlu2 %2076  ;;  %2714 = vrot.lane.b32.xlu1 %v7166_v0, %s5305_s28  ;;  %2189 = vst [vmem:[#allocation2 + $0xcc] sm:$0xf] %v2188_v41  ;;  %1566 = vrot.lane.b32.xlu2 %v6393_v20, %s5303_s27 }
 0x25a   : > { %v3862_v23 = vadd.f32 %v3861_v10, %v3772_v32  ;;  %v2628_v5 = vld [vmem:[#allocation2 + $0xdc] sm:$0x8]  ;;  %v3864_v55 = vpop.f32.mrf.mxu0  ;;  %v4094_v21 = vmax.f32 %v4062_v62, 0.0 }
 0x25b   : > { %v2629_v28 = vsel %vm6223_vm13, 0, %v2628_v5  ;;  %v1565_v54 = vpop.permute.xlu1 %1564  ;;  %v1778_v29 = vpop.permute.xlu0 %1777  ;;  %v4834_v5 = vld [vmem:[#allocation2 + $0xc0] sm:$0xf] }
 0x25c   : > { %v3951_v3 = vadd.f32 %v7030_v15, %v3862_v23  ;;  %2630 = vst [vmem:[#allocation2 + $0xdc] sm:$0x8] %v2629_v28  ;;  %v1880_v15 = vsel %vm6163_vm14, %v1778_v29, %v1879_v50  ;;  %v1992_v27 = vld [vmem:[#allocation2 + $0x138] sm:$0x8] }
 0x25d   : > { %1626 = vst.msk [vmem:[#allocation2 + $0x144] sm:$0xf] %vm8261_vm11, %v1565_v54  ;;  %v1993_v14 = vsel %vm6232_vm2, 0, %v1992_v27  ;;  %v2800_v51 = vld [vmem:[#allocation2 + $0xd0] sm:$0xf]  ;;  %vm8270_vm11 = vmmov %vm8253_vm3 }
 0x25e   : > { %v4027_v35 = vmul.f32 %v7201_v22, %v3951_v3  ;;  %1881 = vst [vmem:[#allocation2 + $0xd8] sm:$0xf] %v1880_v15  ;;  %v2801_v48 = vsel %vm6301_vm1, %v7411_v33, %v2800_v51 }
 0x25f   : > { %1994 = vst [vmem:[#allocation2 + $0x138] sm:$0x8] %v1993_v14 }
 0x260   : > { %v4063_v63 = vadd.f32 %v7221_v46, %v4027_v35  ;;  %v2285_v13 = vld [vmem:[#allocation2 + $0xcc] sm:$0x1]  ;;  %2802 = vst [vmem:[#allocation2 + $0xd0] sm:$0xf] %v2801_v48  ;;  %2090 = vrot.lane.b32.xlu0 %v7166_v0, %s5304_s29  ;;  %v1882_v35 = vld [vmem:[#allocation2 + $0xe4] sm:$0xf] }
 0x261   : > { %1795 = vrot.lane.b32.xlu1 %v8259_v39, %s5305_s28  ;;  %v2286_v56 = vsel %vm6054_vm10, 0, %v2285_v13  ;;  %v7475_v8 = vpop.permute.xlu2 %1781  ;;  %1797 = vrot.lane.b32.xlu2 %v8262_v43, %s5305_s28  ;;  %v8264_v48 = vld [vmem:[#allocation20_spill] sm:$0xff]  ;;  %v5110_v13 = vld [vmem:[#allocation2 + $0xc4] sm:$0xf] }
 0x262   : > { %v4095_v18 = vmax.f32 %v4063_v63, 0.0  ;;  %v3775_v49 = vpop.f32.mrf.mxu3  ;;  %2287 = vst [vmem:[#allocation2 + $0xcc] sm:$0x1] %v2286_v56  ;;  %v3866_v12 = vpop.f32.mrf.mxu0 }
 0x263   : > { %v3865_v10 = vadd.f32 %v3864_v55, %v3775_v49  ;;  %v2075_v33 = vpop.permute.xlu1 %2074  ;;  %v2429_v39 = vpop.permute.xlu0 %2428  ;;  %v2803_v56 = vld [vmem:[#allocation2 + $0xdc] sm:$0xf] }
 0x264   : > { %v4124_v36 = vpack.c.bf16 %v4095_v18, %v4094_v21  ;;  %v2552_v6 = vsel %vm6152_vm4, %v2429_v39, %v2551_v60  ;;  %v2536_v21 = vld [vmem:[#allocation2 + $0xf4] sm:$0xf] }
 0x265   : > { %v3954_v17 = vadd.f32 %v7079_v59, %v3865_v10  ;;  %v1971_v31 = vld [vmem:[#allocation2 + $0xd8] sm:$0x8]  ;;  %2553 = vst [vmem:[#allocation2 + $0x130] sm:$0xf] %v2552_v6 }
 0x266   : > { %5026 = vmatmul.msk.bf16.gmra.mxu2 %vm3702_vm12, %v4124_v36  ;;  %v1972_v0 = vsel %vm6232_vm2, 0, %v1971_v31 }
 0x267   : > { %1973 = vst [vmem:[#allocation2 + $0xd8] sm:$0x8] %v1972_v0  ;;  %v2891_v41 = vld [vmem:[#allocation2 + $0xd0] sm:$0x1]  ;;  %v4028_v59 = vmul.f32 %v7201_v22, %v3954_v17 }
 0x268   : > { %v2892_v38 = vsel %vm6380_vm6, 0, %v2891_v41  ;;  %2978 = vrot.lane.b32.xlu0 %v8219_v16, %s5304_s29 }
 0x269   : > { %2092 = vrot.lane.b32.xlu1 %v7171_v26, %s5304_s29  ;;  %v5111_v3 = vld [vmem:[#allocation2 + $0xc8] sm:$0xf0]  ;;  %v7492_v28 = vpop.permute.xlu2 %2704  ;;  %2893 = vst [vmem:[#allocation2 + $0xd0] sm:$0x1] %v2892_v38  ;;  %2976 = vrot.lane.b32.xlu2 %v8212_v37, %s5304_s29  ;;  %v4064_v16 = vadd.f32 %v7221_v46, %v4028_v59 }
 0x26a   : > { %v3777_v32 = vpop.f32.mrf.mxu3  ;;  %v4835_v54 = vor.u32 %v5111_v3, %v4834_v5  ;;  %3034 = vst.msk [vmem:[#allocation2 + $0xd0] sm:$0xf] %vm8253_vm3, %v7434_v7 }
 0x26b   : > { %v3867_v23 = vadd.f32 %v3866_v12, %v3777_v32  ;;  %v1780_v62 = vpop.permute.xlu1 %1779  ;;  %v1553_v50 = vpop.permute.xlu0 %1552  ;;  %v4096_v14 = vmax.f32 %v4064_v16, 0.0 }
 0x26c   : > { %v1883_v29 = vsel %vm6163_vm14, %v1780_v62, %v1882_v35  ;;  %3799 = vmatmul.bf16.gmra.mxu3 %v4835_v54  ;;  %v2649_v63 = vld [vmem:[#allocation2 + $0x130] sm:$0x8]  ;;  %1620 = vst.msk [vmem:[#allocation2 + $0xf0] sm:$0xf] %vm8263_vm7, %v1553_v50  ;;  %v3958_v32 = vpop.f32.mrf.mxu1  ;;  %v2533_v50 = vld [vmem:[#allocation2 + $0xe8] sm:$0xf]  ;;  %vm8271_vm7 = vmmov %vm8258_vm0 }
 0x26d   : > { %v3956_v55 = vadd.f32 %v7116_v61, %v3867_v23  ;;  %1884 = vst [vmem:[#allocation2 + $0xe4] sm:$0xf] %v1883_v29  ;;  %v2650_v37 = vsel %vm6223_vm13, 0, %v2649_v63 }
 0x26e   : > { %v2190_v27 = vld [vmem:[#allocation2 + $0xd8] sm:$0xf]  ;;  %2651 = vst [vmem:[#allocation2 + $0x130] sm:$0x8] %v2650_v37 }
 0x26f   : > { %v4029_v15 = vmul.f32 %v7201_v22, %v3956_v55  ;;  %v2191_v61 = vsel %vm5994_vm15, %v2075_v33, %v2190_v27 }
 0x270   : > { %2192 = vst [vmem:[#allocation2 + $0xd8] sm:$0xf] %v2191_v61  ;;  %2716 = vrot.lane.b32.xlu0 %v7171_v26, %s5305_s28  ;;  %v3869_v41 = vpop.f32.mrf.mxu0 }
 0x271   : > { %v4065_v7 = vadd.f32 %v7221_v46, %v4029_v15  ;;  %2434 = vrot.lane.b32.xlu1 %v8262_v43, %s5303_s27  ;;  %v2419_v18 = vpop.permute.xlu2 %2418  ;;  %2436 = vrot.lane.b32.xlu2 %v8264_v48, %s5303_s27  ;;  %v4836_v10 = vld [vmem:[#allocation2 + $0xcc] sm:$0xf0] }
 0x272   : > { %v2537_v49 = vsel %vm6152_vm4, %v2419_v18, %v2536_v21  ;;  %v4839_v43 = vor.u32 %v5110_v13, %v4836_v10 }
 0x273   : > { %v4097_v51 = vmax.f32 %v4065_v7, 0.0  ;;  %v2703_v36 = vpop.permute.xlu1 %2702  ;;  %2538 = vst [vmem:[#allocation2 + $0xf4] sm:$0xf] %v2537_v49  ;;  %v1885_v17 = vld [vmem:[#allocation2 + $0xf0] sm:$0xf]  ;;  %v2967_v31 = vpop.permute.xlu0 %2966 }
 0x274   : > { %v1974_v60 = vld [vmem:[#allocation2 + $0xe4] sm:$0x8]  ;;  %v2804_v39 = vsel %vm6301_vm1, %v2703_v36, %v2803_v56  ;;  %v1886_v6 = vsel %vm6163_vm14, %v7475_v8, %v1885_v17  ;;  %3888 = vmatmul.bf16.gmra.mxu0 %v4839_v43  ;;  %v3960_v7 = vpop.f32.mrf.mxu1 }
 0x275   : > { %v4125_v33 = vpack.c.bf16 %v4097_v51, %v4096_v14  ;;  %v1975_v26 = vsel %vm6232_vm2, 0, %v1974_v60  ;;  %2805 = vst [vmem:[#allocation2 + $0xdc] sm:$0xf] %v2804_v39 }
 0x276   : > { %1976 = vst [vmem:[#allocation2 + $0xe4] sm:$0x8] %v1975_v26  ;;  %v2542_v26 = vld [vmem:[#allocation2 + $0x10c] sm:$0xf] }
 0x277   : > { %5027 = vmatmul.msk.bf16.gmra.mxu2 %vm3702_vm12, %v4125_v33  ;;  %1887 = vst [vmem:[#allocation2 + $0xf0] sm:$0xf] %v1886_v6  ;;  %v2288_v12 = vld [vmem:[#allocation2 + $0xd8] sm:$0x1] }
 0x278   : > { %v2289_v0 = vsel %vm6054_vm10, 0, %v2288_v12  ;;  %1572 = vrot.lane.b32.xlu0 %v6591_v52, %s5303_s27 }
 0x279   : > { %2718 = vrot.lane.b32.xlu1 %v7178_v58, %s5305_s28  ;;  %2290 = vst [vmem:[#allocation2 + $0xd8] sm:$0x1] %v2289_v0  ;;  %1570 = vrot.lane.b32.xlu2 %v8237_v19, %s5303_s27 }
 0x27a   : > { %v2634_v59 = vld [vmem:[#allocation2 + $0xf4] sm:$0x8] }
 0x27b   : > { %v2635_v23 = vsel %vm6223_vm13, 0, %v2634_v59  ;;  %v7539_v62 = vpop.permute.xlu2 %2080  ;;  %v2417_v35 = vpop.permute.xlu0 %2416 }
 0x27c   : > { %v3780_v38 = vpop.f32.mrf.mxu3  ;;  %v2894_v5 = vld [vmem:[#allocation2 + $0xdc] sm:$0x1]  ;;  %2636 = vst [vmem:[#allocation2 + $0xf4] sm:$0x8] %v2635_v23  ;;  %v1555_v16 = vpop.permute.xlu1 %1554  ;;  %v2534_v63 = vsel %vm6152_vm4, %v2417_v35, %v2533_v50 }
 0x27d   : > { %v3870_v8 = vadd.f32 %v3869_v41, %v3780_v38  ;;  %v2193_v3 = vld [vmem:[#allocation2 + $0xe4] sm:$0xf]  ;;  %v2895_v54 = vsel %vm6380_vm6, 0, %v2894_v5  ;;  %2535 = vst [vmem:[#allocation2 + $0xe8] sm:$0xf] %v2534_v63 }
 0x27e   : > { %v2194_v55 = vsel %vm5994_vm15, %v7449_v9, %v2193_v3  ;;  %v1977_v29 = vld [vmem:[#allocation2 + $0xf0] sm:$0x8]  ;;  %2896 = vst [vmem:[#allocation2 + $0xdc] sm:$0x1] %v2895_v54  ;;  %v3871_v9 = vpop.f32.mrf.mxu0  ;;  %v8267_v54 = vshrl.u32 %v6644_v40, 16 }
 0x27f   : > { %2195 = vst [vmem:[#allocation2 + $0xe4] sm:$0xf] %v2194_v55  ;;  %v1978_v15 = vsel %vm6232_vm2, 0, %v1977_v29  ;;  %v3959_v37 = vadd.f32 %v3958_v32, %v3870_v8  ;;  %v7606_v63 = vld [vmem:[%s8066_s8] ss:$0 sm:$0xff] }
 0x280   : > { %1979 = vst [vmem:[#allocation2 + $0xf0] sm:$0x8] %v1978_v15  ;;  %2094 = vrot.lane.b32.xlu0 %v7178_v58, %s5304_s29  ;;  %v4846_v41 = vld [vmem:[#allocation2 + $0xd8] sm:$0xf]  ;;  %v2034_v35 = vrot.slane %v8267_v54, 7 }
 0x281   : > { %3035 = vst.msk [vmem:[#allocation2 + $0xdc] sm:$0xf] %vm8265_vm9, %v2967_v31  ;;  %1799 = vrot.lane.b32.xlu1 %v8264_v48, %s5305_s28  ;;  %1801 = vrot.lane.b32.xlu2 %v6646_v34, %s5305_s28  ;;  %v4030_v61 = vmul.f32 %v7201_v22, %v3959_v37  ;;  %v8268_v37 = vshll.u32 %v6644_v40, 16  ;;  %v2539_v54 = vld [vmem:[#allocation2 + $0x100] sm:$0xf]  ;;  %vm8272_vm9 = vmmov %vm8253_vm3 }
 0x282   : > { %1621 = vst.msk [vmem:[#allocation2 + $0xfc] sm:$0xf] %vm8266_vm5, %v1555_v16  ;;  %vm8273_vm5 = vmmov %vm8253_vm3 }
 0x283   : > { %v1786_v51 = vpop.permute.xlu2 %1785  ;;  %v1784_v21 = vpop.permute.xlu0 %1783  ;;  %v4066_v13 = vadd.f32 %v7221_v46, %v4030_v61 }
 0x284   : > { %v3782_v27 = vpop.f32.mrf.mxu3  ;;  %v7557_v48 = vpop.permute.xlu1 %2968  ;;  %v2631_v56 = vld [vmem:[#allocation2 + $0xe8] sm:$0x8] }
 0x285   : > { %v3872_v14 = vadd.f32 %v3871_v9, %v3782_v27  ;;  %v2632_v33 = vsel %vm6223_vm13, 0, %v2631_v56  ;;  %v2037_v9 = vor.u32 %v8268_v37, %v2034_v35  ;;  %v3963_v27 = vpop.f32.mrf.mxu1 }
 0x286   : > { %v2291_v18 = vld [vmem:[#allocation2 + $0xe4] sm:$0x1]  ;;  %2633 = vst [vmem:[#allocation2 + $0xe8] sm:$0x8] %v2632_v33  ;;  %v2809_v33 = vld [vmem:[#allocation2 + $0xf4] sm:$0xf] }
 0x287   : > { %v3961_v49 = vadd.f32 %v3960_v7, %v3872_v14  ;;  %v2292_v58 = vsel %vm6054_vm10, 0, %v2291_v18  ;;  %v2196_v12 = vld [vmem:[#allocation2 + $0xf0] sm:$0xf]  ;;  %v7613_v7 = vld [vmem:[%s5504_s30] sm:$0xff]  }
 0x288   : > { %2293 = vst [vmem:[#allocation2 + $0xe4] sm:$0x1] %v2292_v58  ;;  %2982 = vrot.lane.b32.xlu0 %v6458_v2, %s5304_s29 }
 0x289   : > { %v4031_v10 = vmul.f32 %v7201_v22, %v3961_v49  ;;  %2096 = vrot.lane.b32.xlu1 %v7214_v47, %s5304_s29  ;;  %v1888_v60 = vld [vmem:[#allocation2 + $0xfc] sm:$0xf]  ;;  %2980 = vrot.lane.b32.xlu2 %v6393_v20, %s5304_s29  ;;  %v4098_v22 = vmax.f32 %v4066_v13, 0.0  ;;  %v4363_v13 = vunpack.c.l.bf16 %v7613_v7 }
 0x28a   : > { %v1889_v43 = vsel %vm6163_vm14, %v1784_v21, %v1888_v60 }
 0x28b   : > { %v4067_v36 = vadd.f32 %v7221_v46, %v4031_v10  ;;  %1890 = vst [vmem:[#allocation2 + $0xfc] sm:$0xf] %v1889_v43  ;;  %v2423_v17 = vpop.permute.xlu2 %2422  ;;  %v1557_v46 = vpop.permute.xlu0 %1556 }
 0x28c   : > { %v2543_v6 = vsel %vm6152_vm4, %v2423_v17, %v2542_v26  ;;  %v2079_v0 = vpop.permute.xlu1 %2078  ;;  %1622 = vst.msk [vmem:[#allocation2 + $0x108] sm:$0xf] %vm8258_vm0, %v1557_v46  ;;  %v3785_v16 = vpop.f32.mrf.mxu3  ;;  %vm8274_vm0 = vcmask 781824  }
 0x28d   : > { %v4099_v39 = vmax.f32 %v4067_v36, 0.0  ;;  %2544 = vst [vmem:[#allocation2 + $0x10c] sm:$0xf] %v2543_v6  ;;  %v2197_v2 = vsel %vm5994_vm15, %v2079_v0, %v2196_v12  ;;  %v2806_v38 = vld [vmem:[#allocation2 + $0xe8] sm:$0xf] }
 0x28e   : > { %2198 = vst [vmem:[#allocation2 + $0xf0] sm:$0xf] %v2197_v2  ;;  %v2807_v59 = vsel %vm6301_vm1, %v7492_v28, %v2806_v38  ;;  %v7651_v12 = vld [vmem:[%s8064_s6] ss:$0 sm:$0xff]  ;;  %v4364_v38 = vunpack.c.h.bf16 %v7613_v7 }
 0x28f   : > { %v4126_v31 = vpack.c.bf16 %v4099_v39, %v4098_v22  ;;  %v5114_v20 = vld [vmem:[#allocation2 + $0xe0] sm:$0xf0]  ;;  %2808 = vst [vmem:[#allocation2 + $0xe8] sm:$0xf] %v2807_v59 }
 0x290   : > { %v4847_v32 = vor.u32 %v5114_v20, %v4846_v41  ;;  %2722 = vrot.lane.b32.xlu0 %v7283_v44, %s5305_s28  ;;  %v3965_v41 = vpop.f32.mrf.mxu1 }
 0x291   : > { %5028 = vmatmul.msk.bf16.gmra.mxu2 %vm3702_vm12, %v4126_v31  ;;  %2438 = vrot.lane.b32.xlu1 %v6646_v34, %s5303_s27 }
 0x292   : > { %3804 = vmatmul.bf16.gmra.mxu3 %v4847_v32  ;;  %v1980_v8 = vld [vmem:[#allocation2 + $0xfc] sm:$0x8]  ;;  %2720 = vrot.lane.b32.xlu2 %v7214_v47, %s5305_s28 }
 0x293   : > { %v1981_v23 = vsel %vm6232_vm2, 0, %v1980_v8  ;;  %v1891_v5 = vld [vmem:[#allocation2 + $0x108] sm:$0xf]  ;;  %v7591_v34 = vpop.permute.xlu2 %2084  ;;  %v7593_v3 = vpop.permute.xlu0 %2970 }
 0x294   : > { %1982 = vst [vmem:[#allocation2 + $0xfc] sm:$0x8] %v1981_v23  ;;  %v2640_v55 = vld [vmem:[#allocation2 + $0x10c] sm:$0x8]  ;;  %v1892_v28 = vsel %vm6163_vm14, %v1786_v51, %v1891_v5  ;;  %v1559_v29 = vpop.permute.xlu1 %1558  ;;  %v7621_v51 = vld [vmem:[%s8067_s9] ss:$0 sm:$0xff]  ;;  %v3787_v46 = vpop.f32.mrf.mxu3 }
 0x295   : > { %v2641_v47 = vsel %vm6223_vm13, 0, %v2640_v55  ;;  %v2294_v50 = vld [vmem:[#allocation2 + $0xf0] sm:$0x1]  ;;  %1893 = vst [vmem:[#allocation2 + $0x108] sm:$0xf] %v1892_v28 }
 0x296   : > { %2642 = vst [vmem:[#allocation2 + $0x10c] sm:$0x8] %v2641_v47  ;;  %v2295_v15 = vsel %vm6054_vm10, 0, %v2294_v50  ;;  %v2897_v14 = vld [vmem:[#allocation2 + $0xe8] sm:$0x1] }
 0x297   : > { %2296 = vst [vmem:[#allocation2 + $0xf0] sm:$0x1] %v2295_v15  ;;  %v5113_v23 = vld [vmem:[#allocation2 + $0xdc] sm:$0xf] }
 0x298   : > { %1623 = vst.msk [vmem:[#allocation2 + $0x114] sm:$0xf] %vm8269_vm8, %v1559_v29  ;;  %2984 = vrot.lane.b32.xlu0 %v8237_v19, %s5304_s29  ;;  %vm8275_vm8 = vmmov %vm8253_vm3 }
 0x299   : > { %2098 = vrot.lane.b32.xlu1 %v7283_v44, %s5304_s29  ;;  %v2898_v44 = vsel %vm6380_vm6, 0, %v2897_v14 }
 0x29a   : > { %2100 = vrot.lane.b32.xlu2 %v2037_v9, %s5304_s29  ;;  %2899 = vst [vmem:[#allocation2 + $0xe8] sm:$0x1] %v2898_v44 }
 0x29b   : > { %v3874_v61 = vpop.f32.mrf.mxu0  ;;  %v2199_v18 = vld [vmem:[#allocation2 + $0xfc] sm:$0xf]  ;;  %v2711_v10 = vpop.permute.xlu2 %2710  ;;  %3036 = vst.msk [vmem:[#allocation2 + $0xe8] sm:$0xf] %vm8270_vm11, %v7557_v48  ;;  %vm8276_vm11 = vmmov %vm8271_vm7 }
 0x29c   : > { %v3875_v21 = vadd.f32 %v3874_v61, %v3785_v16  ;;  %v4211_v49 = vpop.f32.mrf.mxu2  ;;  %v2200_v19 = vsel %vm5994_vm15, %v7539_v62, %v2199_v18  ;;  %v2707_v56 = vpop.permute.xlu0 %2706  ;;  %v1983_v36 = vld [vmem:[#allocation2 + $0x108] sm:$0x8]  ;;  %v7672_v16 = vld [vmem:[%s8065_s7] ss:$0 sm:$0xff] }
 0x29d   : > { %v4295_v58 = vmul.f32 %v7606_v63, %v4211_v49  ;;  %v7634_v60 = vpop.permute.xlu1 %2972  ;;  %2201 = vst [vmem:[#allocation2 + $0xfc] sm:$0xf] %v2200_v19  ;;  %v1984_v43 = vsel %vm6232_vm2, 0, %v1983_v36  ;;  %v2815_v39 = vld [vmem:[#allocation2 + $0x10c] sm:$0xf]  ;;  %v2810_v26 = vsel %vm6301_vm1, %v2707_v56, %v2809_v33 }
 0x29e   : > { %v3964_v22 = vadd.f32 %v3963_v27, %v3875_v21  ;;  %1985 = vst [vmem:[#allocation2 + $0x108] sm:$0x8] %v1984_v43  ;;  %v2816_v48 = vsel %vm6301_vm1, %v2711_v10, %v2815_v39  ;;  %v4858_v43 = vld [vmem:[#allocation2 + $0xf0] sm:$0xf] }
 0x29f   : > { %v4331_v62 = vadd.f32 %v7621_v51, %v4295_v58  ;;  %2817 = vst [vmem:[#allocation2 + $0x10c] sm:$0xf] %v2816_v48  ;;  %v2557_v58 = vld [vmem:[#allocation2 + $0x148] sm:$0xf]  ;;  %v1894_v56 = vld [vmem:[#allocation2 + $0x114] sm:$0xf] }
 0x2a0   : > { %2811 = vst [vmem:[#allocation2 + $0xf4] sm:$0xf] %v2810_v26  ;;  %2724 = vrot.lane.b32.xlu0 %v2037_v9, %s5305_s28  ;;  %v4032_v0 = vmul.f32 %v7651_v12, %v3964_v22 }
 0x2a1   : > { %v4395_v17 = vadd.f32 %v4363_v13, %v4331_v62  ;;  %2986 = vrot.lane.b32.xlu1 %v6591_v52, %s5304_s29  ;;  %v2211_v52 = vld [vmem:[#allocation2 + $0x12c] sm:$0xf] }
 0x2a2   : > { %2440 = vrot.lane.b32.xlu2 %v6697_v30, %s5303_s27  ;;  %v4848_v5 = vld [vmem:[#allocation2 + $0xe4] sm:$0xf0]  ;;  %v4068_v15 = vadd.f32 %v7672_v16, %v4032_v0 }
 0x2a3   : > { %v3876_v31 = vpop.f32.mrf.mxu0  ;;  %v4427_v6 = vmax.f32 %v4395_v17, 0.0  ;;  %v2089_v8 = vpop.permute.xlu2 %2088  ;;  %v4851_v28 = vor.u32 %v5113_v23, %v4848_v5 }
 0x2a4   : > { %v3877_v2 = vadd.f32 %v3876_v31, %v3787_v46  ;;  %v4213_v20 = vpop.f32.mrf.mxu2  ;;  %v2421_v35 = vpop.permute.xlu0 %2420  ;;  %v2297_v55 = vld [vmem:[#allocation2 + $0xfc] sm:$0x1]  ;;  %v2212_v30 = vsel %vm5994_vm15, %v2089_v8, %v2211_v52  ;;  %v4100_v18 = vmax.f32 %v4068_v15, 0.0  ;;  %v2545_v15 = vld [vmem:[#allocation2 + $0x118] sm:$0xf] }
 0x2a5   : > { %4459 = vst [vmem:[%s7656_s11] sm:$0xff] %v4427_v6  ;;  %v4296_v32 = vmul.f32 %v7606_v63, %v4213_v20  ;;  %v2540_v29 = vsel %vm6152_vm4, %v2421_v35, %v2539_v54  ;;  %v7665_v47 = vpop.permute.xlu1 %2708  ;;  %v2298_v50 = vsel %vm6054_vm10, 0, %v2297_v55  ;;  %3893 = vmatmul.bf16.gmra.mxu0 %v4851_v28  ;;  %v2202_v22 = vld [vmem:[#allocation2 + $0x108] sm:$0xf]  ;;  %v2208_v6 = vld [vmem:[#allocation2 + $0x120] sm:$0xf] }
 0x2a6   : > { %v3966_v59 = vadd.f32 %v3965_v41, %v3877_v2  ;;  %2213 = vst [vmem:[#allocation2 + $0x12c] sm:$0xf] %v2212_v30  ;;  %v2906_v27 = vld [vmem:[#allocation2 + $0x10c] sm:$0x1]  ;;  %v1903_v2 = vld [vmem:[#allocation2 + $0x144] sm:$0xf] }
 0x2a7   : > { %v4332_v37 = vadd.f32 %v7621_v51, %v4296_v32  ;;  %2299 = vst [vmem:[#allocation2 + $0xfc] sm:$0x1] %v2298_v50  ;;  %v2907_v61 = vsel %vm6380_vm6, 0, %v2906_v27  ;;  %v2900_v14 = vld [vmem:[#allocation2 + $0xf4] sm:$0x1] }
 0x2a8   : > { %v4033_v9 = vmul.f32 %v7651_v12, %v3966_v59  ;;  %2541 = vst [vmem:[#allocation2 + $0x100] sm:$0xf] %v2540_v29  ;;  %v2901_v44 = vsel %vm6380_vm6, 0, %v2900_v14  ;;  %v3968_v29 = vpop.f32.mrf.mxu1 }
 0x2a9   : > { %v4396_v7 = vadd.f32 %v4364_v38, %v4332_v37  ;;  %2988 = vrot.lane.b32.xlu1 %v6644_v40, %s5304_s29  ;;  %2908 = vst [vmem:[#allocation2 + $0x10c] sm:$0x1] %v2907_v61  ;;  %s5154_s29 = sshll.u32 %s5384_s17, 8  ;;  %s4492_s17 = scalar_lea.sflag [#allocation4], %s350_s20 }
 0x2aa   : > { %v4069_v21 = vadd.f32 %v7672_v16, %v4033_v9  ;;  %2902 = vst [vmem:[#allocation2 + $0xf4] sm:$0x1] %v2901_v44  ;;  %v3790_v9 = vpop.f32.mrf.mxu3  ;;  %s4503_s21 = scalar_lea.hbm %s8068_s10, %s5154_s29 }
 0x2ab   : > { %v4428_v49 = vmax.f32 %v4396_v7, 0.0  ;;  %3037 = vst.msk [vmem:[#allocation2 + $0xf4] sm:$0xf] %vm8253_vm3, %v7593_v3  ;;  %v2433_v13 = vpop.permute.xlu2 %2432  ;;  %s4506_s25 = sshll.u32 %s4503_s21, 4  ;;  %s4507_s25 = int_to_ptr.hbm [resolvable:$true] %s4506_s25 }
 0x2ac   : > { %v4101_v19 = vmax.f32 %v4069_v21, 0.0  ;;  %v1788_v10 = vpop.permute.xlu0 %1787  ;;  %v2558_v40 = vsel %vm6152_vm4, %v2433_v13, %v2557_v58  ;;  %v2818_v13 = vld [vmem:[#allocation2 + $0x124] sm:$0xf]  ;;  %s5252_s26 = sshra.s32 %s4507_s25, 4  ;;  %s5253_s26 = int_to_ptr.hbm [resolvable:$true] %s5252_s26 }
 0x2ad   : > { %4460 = vst [vmem:[%s7656_s11 + $0x8] sm:$0xff] %v4428_v49  ;;  %v2309_v33 = vld [vmem:[#allocation2 + $0x12c] sm:$0x1]  ;;  %v1895_v62 = vsel %vm6163_vm14, %v1788_v10, %v1894_v56  ;;  %v2083_v39 = vpop.permute.xlu1 %2082  ;;  %s5254_s27 = scalar_lea.hbm %s5253_s26, 256  ;;  %p5259_p0 = scmp.lt.s32.totalorder %s5253_s26, %s8068_s10 }
 0x2ae   : > { %v4127_v36 = vpack.c.bf16 %v4101_v19, %v4100_v18  ;;  %v2310_v26 = vsel %vm6054_vm10, 0, %v2309_v33  ;;  %2559 = vst [vmem:[#allocation2 + $0x148] sm:$0xf] %v2558_v40  ;;  %v5117_v3 = vld [vmem:[#allocation2 + $0xf8] sm:$0xf0]  ;;  %v2203_v46 = vsel %vm5994_vm15, %v2083_v39, %v2202_v22  ;;  %v7729_v56 = vld [vmem:[%s5504_s30 + $0x8] sm:$0xff]   ;;  %p5255_p11 = scmp.ne.s32.totalorder %s5253_s26, %s5254_s27  ;;  %p5260_p1 = scmp.lt.s32.totalorder %s5258_s12, %s5254_s27 }
 0x2af   : > { %2311 = vst [vmem:[#allocation2 + $0x12c] sm:$0x1] %v2310_v26  ;;  %v2637_v48 = vld [vmem:[#allocation2 + $0x100] sm:$0x8]  ;;  %v4859_v17 = vor.u32 %v5117_v3, %v4858_v43  ;;  %v4365_v3 = vunpack.c.l.bf16 %v7729_v56 }
 0x2b0   : > { %5029 = vmatmul.msk.bf16.gmra.mxu2 %vm3702_vm12, %v4127_v36  ;;  %v2638_v31 = vsel %vm6223_vm13, 0, %v2637_v48  ;;  %1896 = vst [vmem:[#allocation2 + $0x114] sm:$0xf] %v1895_v62  ;;  %v3970_v62 = vpop.f32.mrf.mxu1  ;;  %p5256_p12 = pnand %p5255_p11, %p5401_p5  ;;  %p5261_p2 = por %p5260_p1, %p5259_p0 }
 0x2b1   : > { %2639 = vst [vmem:[#allocation2 + $0x100] sm:$0x8] %v2638_v31  ;;  %3809 = vmatmul.bf16.gmra.mxu3 %v4859_v17 }
 0x2b2   : > { %2204 = vst [vmem:[#allocation2 + $0x108] sm:$0xf] %v2203_v46  ;;  %p5257_p13 = pneg %p5256_p12 }
 0x2b3   : > { %v1567_v0 = vpop.permute.xlu2 %1566 }
 0x2b4   : > { %v1794_v41 = vpop.permute.xlu0 %1793  ;;  %1627 = vst.msk [vmem:[#allocation2 + $0x150] sm:$0xf] %vm8271_vm7, %v1567_v0  ;;  %p5262_p3 = pnand %p5261_p2, %p5257_p13 }
 0x2b5   : > { %v2655_v20 = vld [vmem:[#allocation2 + $0x148] sm:$0x8]  ;;  %v1904_v52 = vsel %vm6163_vm14, %v1794_v41, %v1903_v2  ;;  %v2087_v32 = vpop.permute.xlu1 %2086 }
 0x2b6   : > { %v2656_v38 = vsel %vm6223_vm13, 0, %v2655_v20  ;;  %1905 = vst [vmem:[#allocation2 + $0x144] sm:$0xf] %v1904_v52  ;;  %v2209_v59 = vsel %vm5994_vm15, %v2087_v32, %v2208_v6  ;;  %v5116_v20 = vld [vmem:[#allocation2 + $0xf4] sm:$0xf] }
 0x2b7   : > { %2657 = vst [vmem:[#allocation2 + $0x148] sm:$0x8] %v2656_v38  ;;  %v1986_v8 = vld [vmem:[#allocation2 + $0x114] sm:$0x8]  ;;  %v2563_v38 = vld [vmem:[#allocation2 + $0x160] sm:$0xf] }
 0x2b8   : > { %v2812_v23 = vld [vmem:[#allocation2 + $0x100] sm:$0xf]  ;;  %v1987_v5 = vsel %vm6232_vm2, 0, %v1986_v8  ;;  %2210 = vst [vmem:[#allocation2 + $0x120] sm:$0xf] %v2209_v59 }
 0x2b9   : > { %v2813_v54 = vsel %vm6301_vm1, %v7665_v47, %v2812_v23  ;;  %1988 = vst [vmem:[#allocation2 + $0x114] sm:$0x8] %v1987_v5  ;;  %v2300_v35 = vld [vmem:[#allocation2 + $0x108] sm:$0x1] }
 0x2ba   : > { %2814 = vst [vmem:[#allocation2 + $0x100] sm:$0xf] %v2813_v54  ;;  %v2301_v55 = vsel %vm6054_vm10, 0, %v2300_v35 }
 0x2bb   : > { %2302 = vst [vmem:[#allocation2 + $0x108] sm:$0x1] %v2301_v55  ;;  %v7712_v30 = vpop.permute.xlu2 %1797 }
 0x2bc   : > { %v2975_v28 = vpop.permute.xlu0 %2974 }
 0x2bd   : > { %v1995_v50 = vld [vmem:[#allocation2 + $0x144] sm:$0x8]  ;;  %3039 = vst.msk [vmem:[#allocation2 + $0x10c] sm:$0xf] %vm8272_vm9, %v2975_v28  ;;  %v2425_v37 = vpop.permute.xlu1 %2424  ;;  %vm8277_vm9 = vmmov %vm8253_vm3 }
 0x2be   : > { %v1996_v47 = vsel %vm6232_vm2, 0, %v1995_v50  ;;  %v2546_v27 = vsel %vm6152_vm4, %v2425_v37, %v2545_v15 }
 0x2bf   : > { %1997 = vst [vmem:[#allocation2 + $0x144] sm:$0x8] %v1996_v47  ;;  %v2306_v7 = vld [vmem:[#allocation2 + $0x120] sm:$0x1] }
 0x2c0   : > { %v2205_v61 = vld [vmem:[#allocation2 + $0x114] sm:$0xf]  ;;  %v2307_v14 = vsel %vm6054_vm10, 0, %v2306_v7  ;;  %2547 = vst [vmem:[#allocation2 + $0x118] sm:$0xf] %v2546_v27 }
 0x2c1   : > { %v2903_v44 = vld [vmem:[#allocation2 + $0x100] sm:$0x1]  ;;  %v2206_v18 = vsel %vm5994_vm15, %v7591_v34, %v2205_v61  ;;  %2308 = vst [vmem:[#allocation2 + $0x120] sm:$0x1] %v2307_v14  ;;  %v2554_v34 = vld [vmem:[#allocation2 + $0x13c] sm:$0xf]  ;;  %v4366_v61 = vunpack.c.h.bf16 %v7729_v56 }
 0x2c2   : > { %v3879_v21 = vpop.f32.mrf.mxu0  ;;  %v2904_v19 = vsel %vm6380_vm6, 0, %v2903_v44  ;;  %2207 = vst [vmem:[#allocation2 + $0x114] sm:$0xf] %v2206_v18  ;;  %v2821_v27 = vld [vmem:[#allocation2 + $0x130] sm:$0xf]  ;;  %v3973_v44 = vpop.f32.mrf.mxu1 }
 0x2c3   : > { %v3880_v49 = vadd.f32 %v3879_v21, %v3790_v9  ;;  %2905 = vst [vmem:[#allocation2 + $0x100] sm:$0x1] %v2904_v19  ;;  %v2977_v58 = vpop.permute.xlu2 %2976 }
 0x2c4   : > { %3038 = vst.msk [vmem:[#allocation2 + $0x100] sm:$0xf] %vm8273_vm5, %v7634_v60  ;;  %v2713_v10 = vpop.permute.xlu0 %2712  ;;  %v3792_v60 = vpop.f32.mrf.mxu3  ;;  %vm8278_vm5 = vmmov %vm8271_vm7 }
 0x2c5   : > { %v3969_v36 = vadd.f32 %v3968_v29, %v3880_v49  ;;  %v2819_v33 = vsel %vm6301_vm1, %v2713_v10, %v2818_v13  ;;  %v2431_v40 = vpop.permute.xlu1 %2430 }
 0x2c6   : > { %2820 = vst [vmem:[#allocation2 + $0x124] sm:$0xf] %v2819_v33  ;;  %v2555_v43 = vsel %vm6152_vm4, %v2431_v40, %v2554_v34 }
 0x2c7   : > { %v2643_v39 = vld [vmem:[#allocation2 + $0x118] sm:$0x8]  ;;  %2556 = vst [vmem:[#allocation2 + $0x13c] sm:$0xf] %v2555_v43  ;;  %v4034_v31 = vmul.f32 %v7651_v12, %v3969_v36  ;;  %v4870_v36 = vld [vmem:[#allocation2 + $0x108] sm:$0xf] }
 0x2c8   : > { %v2644_v48 = vsel %vm6223_vm13, 0, %v2643_v39 }
 0x2c9   : > { %v4216_v22 = vpop.f32.mrf.mxu2  ;;  %v2303_v46 = vld [vmem:[#allocation2 + $0x114] sm:$0x1]  ;;  %2645 = vst [vmem:[#allocation2 + $0x118] sm:$0x8] %v2644_v48  ;;  %v4070_v5 = vadd.f32 %v7672_v16, %v4034_v31  ;;  %v1906_v31 = vld [vmem:[#allocation2 + $0x150] sm:$0xf] }
 0x2ca   : > { %v4297_v26 = vmul.f32 %v7606_v63, %v4216_v22  ;;  %v3881_v17 = vpop.f32.mrf.mxu0  ;;  %v2304_v0 = vsel %vm6054_vm10, 0, %v2303_v46  ;;  %2842 = vst.msk [vmem:[#allocation2 + $0x118] sm:$0xf] %vm8274_vm0, %v8210_v25  ;;  %vm8279_vm0 = vmmov %vm8253_vm3 }
 0x2cb   : > { %v3882_v6 = vadd.f32 %v3881_v17, %v3792_v60  ;;  %2305 = vst [vmem:[#allocation2 + $0x114] sm:$0x1] %v2304_v0  ;;  %v4860_v52 = vld [vmem:[#allocation2 + $0xfc] sm:$0xf0]  ;;  %v2437_v59 = vpop.permute.xlu2 %2436  ;;  %v4102_v18 = vmax.f32 %v4070_v5, 0.0 }
 0x2cc   : > { %v4333_v2 = vadd.f32 %v7621_v51, %v4297_v26  ;;  %3049 = vst.msk [vmem:[#allocation2 + $0x118] sm:$0xf] %vm8275_vm8, %v8210_v25  ;;  %v4863_v8 = vor.u32 %v5116_v20, %v4860_v52  ;;  %v1569_v23 = vpop.permute.xlu0 %1568  ;;  %v2564_v55 = vsel %vm6152_vm4, %v2437_v59, %v2563_v38  ;;  %v2214_v60 = vld [vmem:[#allocation2 + $0x138] sm:$0xf]  ;;  %v5119_v59 = vld [vmem:[#allocation2 + $0x10c] sm:$0xf]  ;;  %vm8282_vm8 = vmmov %vm8279_vm0 }
 0x2cd   : > { %v3971_v41 = vadd.f32 %v3970_v62, %v3882_v6  ;;  %v2909_v54 = vld [vmem:[#allocation2 + $0x124] sm:$0x1]  ;;  %1628 = vst.msk [vmem:[#allocation2 + $0x15c] sm:$0xf] %vm8276_vm11, %v1569_v23  ;;  %v2715_v28 = vpop.permute.xlu1 %2714  ;;  %vm8283_vm11 = vmmov %vm8279_vm0 }
 0x2ce   : > { %v4397_v32 = vadd.f32 %v4365_v3, %v4333_v2  ;;  %v2910_v50 = vsel %vm6380_vm6, 0, %v2909_v54  ;;  %v2652_v15 = vld [vmem:[#allocation2 + $0x13c] sm:$0x8]  ;;  %2565 = vst [vmem:[#allocation2 + $0x160] sm:$0xf] %v2564_v55  ;;  %3898 = vmatmul.bf16.gmra.mxu0 %v4863_v8  ;;  %v2822_v14 = vsel %vm6301_vm1, %v2715_v28, %v2821_v27 }
 0x2cf   : > { %v4035_v35 = vmul.f32 %v7651_v12, %v3971_v41  ;;  %2911 = vst [vmem:[#allocation2 + $0x124] sm:$0x1] %v2910_v50  ;;  %v2653_v9 = vsel %vm6223_vm13, 0, %v2652_v15  ;;  %v2217_v55 = vld [vmem:[#allocation2 + $0x144] sm:$0xf] }
 0x2d0   : > { %v4429_v29 = vmax.f32 %v4397_v32, 0.0  ;;  %3040 = vst.msk [vmem:[#allocation2 + $0x124] sm:$0xf] %vm8253_vm3, %v2977_v58  ;;  %v3975_v32 = vpop.f32.mrf.mxu1  ;;  %v4882_v27 = vld [vmem:[#allocation2 + $0x120] sm:$0xf] }
 0x2d1   : > { %v4218_v37 = vpop.f32.mrf.mxu2  ;;  %v4071_v47 = vadd.f32 %v7672_v16, %v4035_v35  ;;  %2654 = vst [vmem:[#allocation2 + $0x13c] sm:$0x8] %v2653_v9 }
 0x2d2   : > { %4461 = vst [vmem:[%s7656_s11 + $0x10] sm:$0xff] %v4429_v29  ;;  %v4298_v7 = vmul.f32 %v7606_v63, %v4218_v37  ;;  %v3884_v21 = vpop.f32.mrf.mxu0  ;;  %v5120_v33 = vld [vmem:[#allocation2 + $0x110] sm:$0xf0] }
 0x2d3   : > { %v4103_v49 = vmax.f32 %v4071_v47, 0.0  ;;  %v3795_v19 = vpop.f32.mrf.mxu3  ;;  %2823 = vst [vmem:[#allocation2 + $0x130] sm:$0xf] %v2822_v14  ;;  %v4871_v34 = vor.u32 %v5120_v33, %v4870_v36  ;;  %v1571_v62 = vpop.permute.xlu2 %1570  ;;  %v4872_v2 = vld [vmem:[#allocation2 + $0x114] sm:$0xf0]  ;;  %v363_v33 = vld [vmem:[%s5504_s30 + $0x10] sm:$0xff]  }
 0x2d4   : > { %v4334_v13 = vadd.f32 %v7621_v51, %v4298_v7  ;;  %v3885_v10 = vadd.f32 %v3884_v21, %v3795_v19  ;;  %v1909_v43 = vld [vmem:[#allocation2 + $0x15c] sm:$0xf]  ;;  %v2091_v22 = vpop.permute.xlu0 %2090  ;;  %1629 = vst.msk [vmem:[#allocation2 + $0x168] sm:$0xf] %vm8271_vm7, %v1571_v62  ;;  %v4875_v54 = vor.u32 %v5119_v59, %v4872_v2  ;;  %v5123_v14 = vld [vmem:[#allocation2 + $0x128] sm:$0xf0] }
 0x2d5   : > { %v4128_v40 = vpack.c.bf16 %v4103_v49, %v4102_v18  ;;  %v2661_v39 = vld [vmem:[#allocation2 + $0x160] sm:$0x8]  ;;  %v1910_v58 = vsel %vm6163_vm14, %v7712_v30, %v1909_v43  ;;  %3814 = vmatmul.bf16.gmra.mxu3 %v4871_v34  ;;  %v1796_v26 = vpop.permute.xlu1 %1795  ;;  %v2215_v46 = vsel %vm5994_vm15, %v2091_v22, %v2214_v60  ;;  %v4883_v49 = vor.u32 %v5123_v14, %v4882_v27 }
 0x2d6   : > { %v4398_v56 = vadd.f32 %v4366_v61, %v4334_v13  ;;  %v2662_v48 = vsel %vm6223_vm13, 0, %v2661_v39  ;;  %1911 = vst [vmem:[#allocation2 + $0x15c] sm:$0xf] %v1910_v58  ;;  %v3974_v17 = vadd.f32 %v3973_v44, %v3885_v10  ;;  %v1907_v30 = vsel %vm6163_vm14, %v1796_v26, %v1906_v31 }
 0x2d7   : > { %5030 = vmatmul.msk.bf16.gmra.mxu2 %vm3702_vm12, %v4128_v40  ;;  %2663 = vst [vmem:[#allocation2 + $0x160] sm:$0x8] %v2662_v48  ;;  %v2560_v40 = vld [vmem:[#allocation2 + $0x154] sm:$0xf]  ;;  %v4367_v58 = vunpack.c.l.bf16 %v363_v33  ;;  %v5122_v48 = vld [vmem:[#allocation2 + $0x124] sm:$0xf] }
 0x2d8   : > { %v4430_v3 = vmax.f32 %v4398_v56, 0.0  ;;  %2216 = vst [vmem:[#allocation2 + $0x138] sm:$0xf] %v2215_v46  ;;  %v4036_v20 = vmul.f32 %v7651_v12, %v3974_v17  ;;  %v2824_v10 = vld [vmem:[#allocation2 + $0x13c] sm:$0xf] }
 0x2d9   : > { %1908 = vst [vmem:[#allocation2 + $0x150] sm:$0xf] %v1907_v30 }
 0x2da   : > { %4462 = vst [vmem:[%s7656_s11 + $0x18] sm:$0xff] %v4430_v3  ;;  %v3886_v6 = vpop.f32.mrf.mxu0  ;;  %v2912_v41 = vld [vmem:[#allocation2 + $0x130] sm:$0x1]  ;;  %v4072_v50 = vadd.f32 %v7672_v16, %v4036_v20 }
 0x2db   : > { %v3797_v0 = vpop.f32.mrf.mxu3  ;;  %v2913_v38 = vsel %vm6380_vm6, 0, %v2912_v41  ;;  %v7779_v23 = vpop.permute.xlu2 %1801 }
 0x2dc   : > { %v3887_v52 = vadd.f32 %v3886_v6, %v3797_v0  ;;  %2914 = vst [vmem:[#allocation2 + $0x130] sm:$0x1] %v2913_v38  ;;  %v2979_v5 = vpop.permute.xlu0 %2978  ;;  %v4104_v21 = vmax.f32 %v4072_v50, 0.0  ;;  %v2827_v38 = vld [vmem:[#allocation2 + $0x148] sm:$0xf] }
 0x2dd   : > { %v2001_v35 = vld [vmem:[#allocation2 + $0x15c] sm:$0x8]  ;;  %3041 = vst.msk [vmem:[#allocation2 + $0x130] sm:$0xf] %vm8277_vm9, %v2979_v5  ;;  %v2093_v28 = vpop.permute.xlu1 %2092 }
 0x2de   : > { %v3976_v8 = vadd.f32 %v3975_v32, %v3887_v52  ;;  %v2002_v29 = vsel %vm6232_vm2, 0, %v2001_v35  ;;  %v2218_v37 = vsel %vm5994_vm15, %v2093_v28, %v2217_v55  ;;  %3903 = vmatmul.bf16.gmra.mxu0 %v4875_v54  ;;  %v3978_v35 = vpop.f32.mrf.mxu1 }
 0x2df   : > { %2003 = vst [vmem:[#allocation2 + $0x15c] sm:$0x8] %v2002_v29  ;;  %v2312_v9 = vld [vmem:[#allocation2 + $0x138] sm:$0x1] }
 0x2e0   : > { %v4037_v15 = vmul.f32 %v7651_v12, %v3976_v8  ;;  %2219 = vst [vmem:[#allocation2 + $0x144] sm:$0xf] %v2218_v37  ;;  %v2313_v7 = vsel %vm6054_vm10, 0, %v2312_v9  ;;  %v1998_v61 = vld [vmem:[#allocation2 + $0x150] sm:$0x8]  ;;  %v4368_v8 = vunpack.c.h.bf16 %v363_v33 }
 0x2e1   : > { %2314 = vst [vmem:[#allocation2 + $0x138] sm:$0x1] %v2313_v7  ;;  %v1999_v44 = vsel %vm6232_vm2, 0, %v1998_v61 }
 0x2e2   : > { %v4073_v47 = vadd.f32 %v7672_v16, %v4037_v15  ;;  %2000 = vst [vmem:[#allocation2 + $0x150] sm:$0x8] %v1999_v44 }
 0x2e3   : > { %v2981_v19 = vpop.permute.xlu2 %2980 }
 0x2e4   : > { %v4105_v18 = vmax.f32 %v4073_v47, 0.0  ;;  %v2717_v13 = vpop.permute.xlu0 %2716  ;;  %v4884_v26 = vld [vmem:[#allocation2 + $0x12c] sm:$0xf0] }
 0x2e5   : > { %3819 = vmatmul.bf16.gmra.mxu3 %v4883_v49  ;;  %v2825_v34 = vsel %vm6301_vm1, %v2717_v13, %v2824_v10  ;;  %v2435_v56 = vpop.permute.xlu1 %2434  ;;  %v4887_v30 = vor.u32 %v5122_v48, %v4884_v26  ;;  %v2569_v26 = vld [vmem:[#allocation2 + $0x178] sm:$0xf] }
 0x2e6   : > { %v4129_v36 = vpack.c.bf16 %v4105_v18, %v4104_v21  ;;  %2826 = vst [vmem:[#allocation2 + $0x13c] sm:$0xf] %v2825_v34  ;;  %v2561_v43 = vsel %vm6152_vm4, %v2435_v56, %v2560_v40  ;;  %v1912_v18 = vld [vmem:[#allocation2 + $0x168] sm:$0xf] }
 0x2e7   : > { %v2315_v22 = vld [vmem:[#allocation2 + $0x144] sm:$0x1]  ;;  %2562 = vst [vmem:[#allocation2 + $0x154] sm:$0xf] %v2561_v43 }
 0x2e8   : > { %5031 = vmatmul.msk.bf16.gmra.mxu2 %vm3702_vm12, %v4129_v36  ;;  %v2316_v60 = vsel %vm6054_vm10, 0, %v2315_v22  ;;  %v4894_v50 = vld [vmem:[#allocation2 + $0x138] sm:$0xf]  ;;  %v3980_v22 = vpop.f32.mrf.mxu1 }
 0x2e9   : > { %v4221_v62 = vpop.f32.mrf.mxu2  ;;  %2317 = vst [vmem:[#allocation2 + $0x144] sm:$0x1] %v2316_v60  ;;  %v2220_v61 = vld [vmem:[#allocation2 + $0x150] sm:$0xf] }
 0x2ea   : > { %v4299_v39 = vmul.f32 %v7606_v63, %v4221_v62 }
 0x2ec   : > { %v4335_v3 = vadd.f32 %v7621_v51, %v4299_v39  ;;  %v2721_v46 = vpop.permute.xlu2 %2720  ;;  %v1573_v31 = vpop.permute.xlu0 %1572 }
 0x2ed   : > { %v2915_v6 = vld [vmem:[#allocation2 + $0x13c] sm:$0x1]  ;;  %1630 = vst.msk [vmem:[#allocation2 + $0x174] sm:$0xf] %vm8278_vm5, %v1573_v31  ;;  %v2719_v0 = vpop.permute.xlu1 %2718 }
 0x2ee   : > { %v4399_v17 = vadd.f32 %v4367_v58, %v4335_v3  ;;  %v2916_v41 = vsel %vm6380_vm6, 0, %v2915_v6  ;;  %v2658_v20 = vld [vmem:[#allocation2 + $0x154] sm:$0x8]  ;;  %3908 = vmatmul.bf16.gmra.mxu0 %v4887_v30  ;;  %v2828_v54 = vsel %vm6301_vm1, %v2719_v0, %v2827_v38  ;;  %v2223_v38 = vld [vmem:[#allocation2 + $0x15c] sm:$0xf] }
 0x2ef   : > { %2917 = vst [vmem:[#allocation2 + $0x13c] sm:$0x1] %v2916_v41  ;;  %v2659_v32 = vsel %vm6223_vm13, 0, %v2658_v20  ;;  %v3800_v5 = vpop.f32.mrf.mxu3 }
 0x2f0   : > { %v4431_v2 = vmax.f32 %v4399_v17, 0.0  ;;  %3042 = vst.msk [vmem:[#allocation2 + $0x13c] sm:$0xf] %vm8279_vm0, %v2981_v19  ;;  %v5126_v55 = vld [vmem:[#allocation2 + $0x140] sm:$0xf0]  ;;  %v365_v19 = vld [vmem:[%s5504_s30 + $0x18] sm:$0xff]  }
 0x2f1   : > { %v4223_v52 = vpop.f32.mrf.mxu2  ;;  %2660 = vst [vmem:[#allocation2 + $0x154] sm:$0x8] %v2659_v32  ;;  %v3889_v29 = vpop.f32.mrf.mxu0  ;;  %v4895_v37 = vor.u32 %v5126_v55, %v4894_v50  ;;  %v4369_v34 = vunpack.c.l.bf16 %v365_v19  ;;  %v2833_v50 = vld [vmem:[#allocation2 + $0x160] sm:$0xf] }
 0x2f2   : > { %4463 = vst [vmem:[%s7656_s11 + $0x20] sm:$0xff] %v4431_v2  ;;  %v4300_v59 = vmul.f32 %v7606_v63, %v4223_v52  ;;  %v3890_v15 = vadd.f32 %v3889_v29, %v3800_v5 }
 0x2f3   : > { %2829 = vst [vmem:[#allocation2 + $0x148] sm:$0xf] %v2828_v54 }
 0x2f4   : > { %v4336_v28 = vadd.f32 %v7621_v51, %v4300_v59  ;;  %v1915_v47 = vld [vmem:[#allocation2 + $0x174] sm:$0xf]  ;;  %v7814_v27 = vpop.permute.xlu2 %2100  ;;  %v2095_v7 = vpop.permute.xlu0 %2094  ;;  %v3979_v10 = vadd.f32 %v3978_v35, %v3890_v15  ;;  %v4370_v35 = vunpack.c.h.bf16 %v365_v19 }
 0x2f5   : > { %v1916_v14 = vsel %vm6163_vm14, %v7779_v23, %v1915_v47  ;;  %3824 = vmatmul.bf16.gmra.mxu3 %v4895_v37  ;;  %v2221_v21 = vsel %vm5994_vm15, %v2095_v7, %v2220_v61  ;;  %v1800_v44 = vpop.permute.xlu1 %1799 }
 0x2f6   : > { %v4400_v9 = vadd.f32 %v4368_v8, %v4336_v28  ;;  %1917 = vst [vmem:[#allocation2 + $0x174] sm:$0xf] %v1916_v14  ;;  %v1913_v13 = vsel %vm6163_vm14, %v1800_v44, %v1912_v18  ;;  %v4038_v58 = vmul.f32 %v7651_v12, %v3979_v10  ;;  %vm8280_vm14 = vmmov %vm8279_vm0 }
 0x2f7   : > { %2222 = vst [vmem:[#allocation2 + $0x150] sm:$0xf] %v2221_v21  ;;  %v3802_v43 = vpop.f32.mrf.mxu3  ;;  %v5125_v61 = vld [vmem:[#allocation2 + $0x13c] sm:$0xf] }
 0x2f8   : > { %v4432_v49 = vmax.f32 %v4400_v9, 0.0  ;;  %v2830_v23 = vld [vmem:[#allocation2 + $0x154] sm:$0xf]  ;;  %1914 = vst [vmem:[#allocation2 + $0x168] sm:$0xf] %v1913_v13  ;;  %v4074_v20 = vadd.f32 %v7672_v16, %v4038_v58  ;;  %v367_v58 = vld [vmem:[%s5504_s30 + $0x20] sm:$0xff]  }
 0x2f9   : > { %v2831_v40 = vsel %vm6301_vm1, %v2721_v46, %v2830_v23  ;;  %v3891_v62 = vpop.f32.mrf.mxu0  ;;  %v4372_v4 = vunpack.c.h.bf16 %v367_v58 }
 0x2fa   : > { %4464 = vst [vmem:[%s7656_s11 + $0x28] sm:$0xff] %v4432_v49  ;;  %v4226_v36 = vpop.f32.mrf.mxu2  ;;  %v2918_v56 = vld [vmem:[#allocation2 + $0x148] sm:$0x1]  ;;  %v3892_v60 = vadd.f32 %v3891_v62, %v3802_v43  ;;  %v4106_v9 = vmax.f32 %v4074_v20, 0.0 }
 0x2fb   : > { %v4301_v33 = vmul.f32 %v7606_v63, %v4226_v36  ;;  %2832 = vst [vmem:[#allocation2 + $0x154] sm:$0xf] %v2831_v40  ;;  %v2919_v42 = vsel %vm6380_vm6, 0, %v2918_v56 }
 0x2fc   : > { %2920 = vst [vmem:[#allocation2 + $0x148] sm:$0x1] %v2919_v42  ;;  %v2441_v3 = vpop.permute.xlu2 %2440  ;;  %v2983_v48 = vpop.permute.xlu0 %2982  ;;  %v3981_v46 = vadd.f32 %v3980_v22, %v3892_v60 }
 0x2fd   : > { %v4337_v39 = vadd.f32 %v7621_v51, %v4301_v33  ;;  %v2007_v31 = vld [vmem:[#allocation2 + $0x174] sm:$0x8]  ;;  %v2570_v30 = vsel %vm6152_vm4, %v2441_v3, %v2569_v26  ;;  %3043 = vst.msk [vmem:[#allocation2 + $0x148] sm:$0xf] %vm8280_vm14, %v2983_v48  ;;  %v2097_v6 = vpop.permute.xlu1 %2096  ;;  %v4371_v3 = vunpack.c.l.bf16 %v367_v58 }
 0x2fe   : > { %v2008_v0 = vsel %vm6232_vm2, 0, %v2007_v31  ;;  %v2318_v2 = vld [vmem:[#allocation2 + $0x150] sm:$0x1]  ;;  %2571 = vst [vmem:[#allocation2 + $0x178] sm:$0xf] %v2570_v30  ;;  %v4039_v32 = vmul.f32 %v7651_v12, %v3981_v46  ;;  %v2224_v5 = vsel %vm5994_vm15, %v2097_v6, %v2223_v38 }
 0x2ff   : > { %v4401_v17 = vadd.f32 %v4369_v34, %v4337_v39  ;;  %2009 = vst [vmem:[#allocation2 + $0x174] sm:$0x8] %v2008_v0  ;;  %v2319_v52 = vsel %vm6054_vm10, 0, %v2318_v2  ;;  %v2004_v8 = vld [vmem:[#allocation2 + $0x168] sm:$0x8] }
 0x300   : > { %2320 = vst [vmem:[#allocation2 + $0x150] sm:$0x1] %v2319_v52  ;;  %v2005_v55 = vsel %vm6232_vm2, 0, %v2004_v8  ;;  %v4075_v28 = vadd.f32 %v7672_v16, %v4039_v32  ;;  %v2566_v34 = vld [vmem:[#allocation2 + $0x16c] sm:$0xf]  ;;  %vm8281_vm2 = vcmask 781824  }
 0x301   : > { %v4433_v41 = vmax.f32 %v4401_v17, 0.0  ;;  %2006 = vst [vmem:[#allocation2 + $0x168] sm:$0x8] %v2005_v55 }
 0x302   : > { %v4228_v59 = vpop.f32.mrf.mxu2  ;;  %v2921_v29 = vld [vmem:[#allocation2 + $0x154] sm:$0x1]  ;;  %v4107_v47 = vmax.f32 %v4075_v28, 0.0  ;;  %2225 = vst [vmem:[#allocation2 + $0x15c] sm:$0xf] %v2224_v5 }
 0x303   : > { %4465 = vst [vmem:[%s7656_s11 + $0x30] sm:$0xff] %v4433_v41  ;;  %v4302_v54 = vmul.f32 %v7606_v63, %v4228_v59  ;;  %v2922_v15 = vsel %vm6380_vm6, 0, %v2921_v29 }
 0x304   : > { %2923 = vst [vmem:[#allocation2 + $0x154] sm:$0x1] %v2922_v15  ;;  %v2723_v7 = vpop.permute.xlu0 %2722  ;;  %v4896_v14 = vld [vmem:[#allocation2 + $0x144] sm:$0xf0]  ;;  %v4130_v49 = vpack.c.bf16 %v4107_v47, %v4106_v9  ;;  %v3983_v9 = vpop.f32.mrf.mxu1 }
 0x305   : > { %v4338_v37 = vadd.f32 %v7621_v51, %v4302_v54  ;;  %v2667_v21 = vld [vmem:[#allocation2 + $0x178] sm:$0x8]  ;;  %v2834_v44 = vsel %vm6301_vm1, %v2723_v7, %v2833_v50  ;;  %v2439_v18 = vpop.permute.xlu1 %2438  ;;  %v4899_v19 = vor.u32 %v5125_v61, %v4896_v14 }
 0x306   : > { %v2229_v13 = vld [vmem:[#allocation2 + $0x174] sm:$0xf]  ;;  %v2668_v10 = vsel %vm6223_vm13, 0, %v2667_v21  ;;  %2835 = vst [vmem:[#allocation2 + $0x160] sm:$0xf] %v2834_v44  ;;  %5032 = vmatmul.msk.bf16.gmra.mxu2 %vm3702_vm12, %v4130_v49  ;;  %v2567_v40 = vsel %vm6152_vm4, %v2439_v18, %v2566_v34 }
 0x307   : > { %v4402_v45 = vadd.f32 %v4370_v35, %v4338_v37  ;;  %v2230_v33 = vsel %vm5994_vm15, %v7814_v27, %v2229_v13  ;;  %2669 = vst [vmem:[#allocation2 + $0x178] sm:$0x8] %v2668_v10  ;;  %3913 = vmatmul.bf16.gmra.mxu0 %v4899_v19  ;;  %v4906_v48 = vld [vmem:[#allocation2 + $0x150] sm:$0xf] }
 0x308   : > { %2231 = vst [vmem:[#allocation2 + $0x174] sm:$0xf] %v2230_v33  ;;  %v2226_v22 = vld [vmem:[#allocation2 + $0x168] sm:$0xf] }
 0x309   : > { %v4434_v36 = vmax.f32 %v4402_v45, 0.0  ;;  %2843 = vst.msk [vmem:[#allocation2 + $0x178] sm:$0xf] %vm8281_vm2, %v8210_v25  ;;  %v2321_v23 = vld [vmem:[#allocation2 + $0x15c] sm:$0x1] }
 0x30a   : > { %3050 = vst.msk [vmem:[#allocation2 + $0x178] sm:$0xf] %vm8282_vm8, %v8210_v25  ;;  %v2322_v27 = vsel %vm6054_vm10, 0, %v2321_v23 }
 0x30b   : > { %4466 = vst [vmem:[%s7656_s11 + $0x38] sm:$0xff] %v4434_v36  ;;  %v369_v36 = vld [vmem:[%s5504_s30 + $0x28] sm:$0xff]  }
 0x30c   : > { %2323 = vst [vmem:[#allocation2 + $0x15c] sm:$0x1] %v2322_v27  ;;  %v2985_v56 = vpop.permute.xlu0 %2984  ;;  %v3985_v19 = vpop.f32.mrf.mxu1 }
 0x30d   : > { %v2924_v43 = vld [vmem:[#allocation2 + $0x160] sm:$0x1]  ;;  %2568 = vst [vmem:[#allocation2 + $0x16c] sm:$0xf] %v2567_v40  ;;  %v2099_v62 = vpop.permute.xlu1 %2098 }
 0x30e   : > { %v2925_v39 = vsel %vm6380_vm6, 0, %v2924_v43  ;;  %3044 = vst.msk [vmem:[#allocation2 + $0x154] sm:$0xf] %vm8283_vm11, %v2985_v56  ;;  %v2227_v11 = vsel %vm5994_vm15, %v2099_v62, %v2226_v22  ;;  %vm8284_vm15 = vmmov %vm8279_vm0  ;;  %v4373_v56 = vunpack.c.l.bf16 %v369_v36 }
 0x30f   : > { %v2327_v42 = vld [vmem:[#allocation2 + $0x174] sm:$0x1]  ;;  %2926 = vst [vmem:[#allocation2 + $0x160] sm:$0x1] %v2925_v39 }
 0x310   : > { %v2328_v25 = vsel %vm6054_vm10, 0, %v2327_v42  ;;  %2228 = vst [vmem:[#allocation2 + $0x168] sm:$0xf] %v2227_v11 }
 0x311   : > { %2329 = vst [vmem:[#allocation2 + $0x174] sm:$0x1] %v2328_v25  ;;  %v4920_v13 = vld [vmem:[#allocation2 + $0x174] sm:$0xf0] }
 0x313   : > { %v5129_v17 = vld [vmem:[#allocation2 + $0x158] sm:$0xf0] }
 0x314   : > { %v4231_v60 = vpop.f32.mrf.mxu2  ;;  %v2664_v31 = vld [vmem:[#allocation2 + $0x16c] sm:$0x8]  ;;  %v4907_v46 = vor.u32 %v5129_v17, %v4906_v48  ;;  %v2725_v59 = vpop.permute.xlu0 %2724 }
 0x315   : > { %v4303_v26 = vmul.f32 %v7606_v63, %v4231_v60  ;;  %v2665_v53 = vsel %vm6223_vm13, 0, %v2664_v31  ;;  %v2987_v6 = vpop.permute.xlu1 %2986  ;;  %v5128_v54 = vld [vmem:[#allocation2 + $0x154] sm:$0xf]  ;;  %v3805_v15 = vpop.f32.mrf.mxu3 }
 0x316   : > { %2666 = vst [vmem:[#allocation2 + $0x16c] sm:$0x8] %v2665_v53  ;;  %3829 = vmatmul.bf16.gmra.mxu3 %v4907_v46  ;;  %v3988_v31 = vpop.f32.mrf.mxu1 }
 0x317   : > { %v4339_v30 = vadd.f32 %v7621_v51, %v4303_v26  ;;  %v2324_v2 = vld [vmem:[#allocation2 + $0x168] sm:$0x1]  ;;  %3045 = vst.msk [vmem:[#allocation2 + $0x160] sm:$0xf] %vm8284_vm15, %v2987_v6  ;;  %v4374_v26 = vunpack.c.h.bf16 %v369_v36 }
 0x318   : > { %v2325_v41 = vsel %vm6054_vm10, 0, %v2324_v2  ;;  %v5132_v50 = vld [vmem:[#allocation2 + $0x170] sm:$0xf0] }
 0x319   : > { %v4403_v0 = vadd.f32 %v4371_v3, %v4339_v30  ;;  %2326 = vst [vmem:[#allocation2 + $0x168] sm:$0x1] %v2325_v41 }
 0x31b   : > { %v4435_v20 = vmax.f32 %v4403_v0, 0.0 }
 0x31c   : > { %v4233_v52 = vpop.f32.mrf.mxu2 }
 0x31d   : > { %4467 = vst [vmem:[%s7656_s11 + $0x40] sm:$0xff] %v4435_v20  ;;  %v4304_v32 = vmul.f32 %v7606_v63, %v4233_v52  ;;  %v2836_v8 = vld [vmem:[#allocation2 + $0x16c] sm:$0xf]  ;;  %v2989_v14 = vpop.permute.xlu1 %2988  ;;  %v3807_v21 = vpop.f32.mrf.mxu3 }
 0x31e   : > { %v2837_v5 = vsel %vm6301_vm1, %v2725_v59, %v2836_v8  ;;  %v4908_v35 = vld [vmem:[#allocation2 + $0x15c] sm:$0xf0]  ;;  %vm8285_vm1 = vmmov %vm8279_vm0  ;;  %v3990_v6 = vpop.f32.mrf.mxu1 }
 0x31f   : > { %v4340_v38 = vadd.f32 %v7621_v51, %v4304_v32  ;;  %2838 = vst [vmem:[#allocation2 + $0x16c] sm:$0xf] %v2837_v5  ;;  %v4911_v24 = vor.u32 %v5128_v54, %v4908_v35 }
 0x320   : > { %v4918_v28 = vld [vmem:[#allocation2 + $0x168] sm:$0xf] }
 0x321   : > { %v4404_v55 = vadd.f32 %v4372_v4, %v4340_v38  ;;  %3918 = vmatmul.bf16.gmra.mxu0 %v4911_v24  ;;  %v4919_v37 = vor.u32 %v5132_v50, %v4918_v28  ;;  %v371_v4 = vld [vmem:[%s5504_s30 + $0x30] sm:$0xff]  }
 0x322   : > { %v3894_v47 = vpop.f32.mrf.mxu0 }
 0x323   : > { %v4436_v29 = vmax.f32 %v4404_v55, 0.0  ;;  %v3895_v7 = vadd.f32 %v3894_v47, %v3805_v15  ;;  %v4375_v55 = vunpack.c.l.bf16 %v371_v4 }
 0x325   : > { %4468 = vst [vmem:[%s7656_s11 + $0x48] sm:$0xff] %v4436_v29  ;;  %v3984_v45 = vadd.f32 %v3983_v9, %v3895_v7 }
 0x326   : > { %v2927_v61 = vld [vmem:[#allocation2 + $0x16c] sm:$0x1]  ;;  %3834 = vmatmul.bf16.gmra.mxu3 %v4919_v37  ;;  %v3993_v38 = vpop.f32.mrf.mxu1 }
 0x327   : > { %v2928_v57 = vsel %vm6380_vm6, 0, %v2927_v61  ;;  %v4040_v18 = vmul.f32 %v7651_v12, %v3984_v45 }
 0x328   : > { %2929 = vst [vmem:[#allocation2 + $0x16c] sm:$0x1] %v2928_v57 }
 0x329   : > { %3046 = vst.msk [vmem:[#allocation2 + $0x16c] sm:$0xf] %vm8285_vm1, %v2989_v14  ;;  %v4076_v34 = vadd.f32 %v7672_v16, %v4040_v18 }
 0x32a   : > { %v3896_v44 = vpop.f32.mrf.mxu0 }
 0x32b   : > { %v3897_v49 = vadd.f32 %v3896_v44, %v3807_v21  ;;  %v4108_v22 = vmax.f32 %v4076_v34, 0.0  ;;  %v4376_v21 = vunpack.c.h.bf16 %v371_v4  ;;  %v373_v34 = vld [vmem:[%s5504_s30 + $0x38] sm:$0xff]  }
 0x32d   : > { %v3986_v10 = vadd.f32 %v3985_v19, %v3897_v49  ;;  %v7928_v49 = vld [vmem:[%s8064_s6] ss:$0 sm:$0xff] }
 0x32e   : > { %v3995_v14 = vpop.f32.mrf.mxu1 }
 0x32f   : > { %v4041_v1 = vmul.f32 %v7651_v12, %v3986_v10 }
 0x330   : > { %v5131_v33 = vld [vmem:[#allocation2 + $0x16c] sm:$0xf] }
 0x331   : > { %v4923_v23 = vor.u32 %v5131_v33, %v4920_v13  ;;  %v4077_v43 = vadd.f32 %v7672_v16, %v4041_v1 }
 0x333   : > { %v4236_v40 = vpop.f32.mrf.mxu2  ;;  %3923 = vmatmul.bf16.gmra.mxu0 %v4923_v23  ;;  %v4109_v39 = vmax.f32 %v4077_v43, 0.0 }
 0x334   : > { %v4305_v27 = vmul.f32 %v7606_v63, %v4236_v40  ;;  %v7904_v63 = vld [vmem:[%s8066_s8] ss:$0 sm:$0xff]  ;;  %v3810_v46 = vpop.f32.mrf.mxu3 }
 0x335   : > { %v4131_v42 = vpack.c.bf16 %v4109_v39, %v4108_v22 }
 0x336   : > { %v4341_v62 = vadd.f32 %v7621_v51, %v4305_v27  ;;  %v7910_v51 = vld [vmem:[%s8067_s9] ss:$0 sm:$0xff]  ;;  %v3998_v22 = vpop.f32.mrf.mxu1 }
 0x337   : > { %5033 = vmatmul.msk.bf16.gmra.mxu2 %vm3702_vm12, %v4131_v42 }
 0x338   : > { %v4405_v11 = vadd.f32 %v4373_v56, %v4341_v62  ;;  %v4377_v62 = vunpack.c.l.bf16 %v373_v34 }
 0x33a   : > { %v4437_v25 = vmax.f32 %v4405_v11, 0.0 }
 0x33b   : > { %v4238_v58 = vpop.f32.mrf.mxu2 }
 0x33c   : > { %4469 = vst [vmem:[%s7656_s11 + $0x50] sm:$0xff] %v4437_v25  ;;  %v4306_v60 = vmul.f32 %v7904_v63, %v4238_v58  ;;  %v3812_v0 = vpop.f32.mrf.mxu3 }
 0x33e   : > { %v4342_v3 = vadd.f32 %v7910_v51, %v4306_v60 }
 0x340   : > { %v4406_v48 = vadd.f32 %v4374_v26, %v4342_v3 }
 0x342   : > { %v4438_v17 = vmax.f32 %v4406_v48, 0.0 }
 0x344   : > { %4470 = vst [vmem:[%s7656_s11 + $0x58] sm:$0xff] %v4438_v17 }
 0x34b   : > { %v3899_v53 = vpop.f32.mrf.mxu0 }
 0x34c   : > { %v3900_v30 = vadd.f32 %v3899_v53, %v3810_v46 }
 0x34e   : > { %v3989_v2 = vadd.f32 %v3988_v31, %v3900_v30  ;;  %v4378_v31 = vunpack.c.h.bf16 %v373_v34 }
 0x350   : > { %v4042_v20 = vmul.f32 %v7651_v12, %v3989_v2  ;;  %v4000_v2 = vpop.f32.mrf.mxu1 }
 0x352   : > { %v4078_v59 = vadd.f32 %v7672_v16, %v4042_v20 }
 0x353   : > { %v3901_v41 = vpop.f32.mrf.mxu0 }
 0x354   : > { %v3902_v52 = vadd.f32 %v3901_v41, %v3812_v0  ;;  %v4110_v50 = vmax.f32 %v4078_v59, 0.0 }
 0x356   : > { %v3991_v32 = vadd.f32 %v3990_v6, %v3902_v52  ;;  %v7946_v52 = vld [vmem:[%s8065_s7] ss:$0 sm:$0xff] }
 0x358   : > { %v4043_v8 = vmul.f32 %v7651_v12, %v3991_v32  ;;  %v3815_v5 = vpop.f32.mrf.mxu3 }
 0x35a   : > { %v4241_v54 = vpop.f32.mrf.mxu2  ;;  %v4079_v24 = vadd.f32 %v7672_v16, %v4043_v8 }
 0x35b   : > { %v4307_v35 = vmul.f32 %v7904_v63, %v4241_v54  ;;  %v3904_v28 = vpop.f32.mrf.mxu0 }
 0x35c   : > { %v4111_v15 = vmax.f32 %v4079_v24, 0.0  ;;  %v3905_v37 = vadd.f32 %v3904_v28, %v3815_v5 }
 0x35d   : > { %v4343_v29 = vadd.f32 %v7910_v51, %v4307_v35 }
 0x35e   : > { %v4132_v47 = vpack.c.bf16 %v4111_v15, %v4110_v50  ;;  %v3994_v61 = vadd.f32 %v3993_v38, %v3905_v37 }
 0x35f   : > { %v4407_v9 = vadd.f32 %v4375_v55, %v4343_v29  ;;  %v4003_v55 = vpop.f32.mrf.mxu1  ;;  %v375_v29 = vld [vmem:[%s5504_s30 + $0x40] sm:$0xff]  }
 0x360   : > { %v3817_v12 = vpop.f32.mrf.mxu3  ;;  %5034 = vmatmul.msk.bf16.gmra.mxu2 %vm3702_vm12, %v4132_v47  ;;  %v4044_v19 = vmul.f32 %v7928_v49, %v3994_v61 }
 0x361   : > { %v4439_v7 = vmax.f32 %v4407_v9, 0.0  ;;  %v4379_v9 = vunpack.c.l.bf16 %v375_v29 }
 0x362   : > { %v4243_v57 = vpop.f32.mrf.mxu2  ;;  %v4080_v1 = vadd.f32 %v7672_v16, %v4044_v19 }
 0x363   : > { %4471 = vst [vmem:[%s7656_s11 + $0x60] sm:$0xff] %v4439_v7  ;;  %v4308_v45 = vmul.f32 %v7904_v63, %v4243_v57  ;;  %v3906_v44 = vpop.f32.mrf.mxu0 }
 0x364   : > { %v3907_v13 = vadd.f32 %v3906_v44, %v3817_v12  ;;  %v4112_v11 = vmax.f32 %v4080_v1, 0.0 }
 0x365   : > { %v4344_v18 = vadd.f32 %v7910_v51, %v4308_v45 }
 0x366   : > { %v3996_v36 = vadd.f32 %v3995_v14, %v3907_v13 }
 0x367   : > { %v4408_v10 = vadd.f32 %v4376_v21, %v4344_v18  ;;  %v4005_v14 = vpop.f32.mrf.mxu1 }
 0x368   : > { %v4045_v23 = vmul.f32 %v7928_v49, %v3996_v36  ;;  %v3820_v40 = vpop.f32.mrf.mxu3 }
 0x369   : > { %v4440_v33 = vmax.f32 %v4408_v10, 0.0 }
 0x36a   : > { %v4081_v56 = vadd.f32 %v7672_v16, %v4045_v23 }
 0x36b   : > { %4472 = vst [vmem:[%s7656_s11 + $0x68] sm:$0xff] %v4440_v33  ;;  %v4246_v27 = vpop.f32.mrf.mxu2  ;;  %v3909_v39 = vpop.f32.mrf.mxu0  ;;  %v4380_v33 = vunpack.c.h.bf16 %v375_v29 }
 0x36c   : > { %v4309_v43 = vmul.f32 %v7904_v63, %v4246_v27  ;;  %v4113_v42 = vmax.f32 %v4081_v56, 0.0  ;;  %v3910_v25 = vadd.f32 %v3909_v39, %v3820_v40 }
 0x36e   : > { %v4345_v58 = vadd.f32 %v7910_v51, %v4309_v43  ;;  %v4133_v26 = vpack.c.bf16 %v4113_v42, %v4112_v11  ;;  %v3999_v3 = vadd.f32 %v3998_v22, %v3910_v25 }
 0x370   : > { %v4409_v60 = vadd.f32 %v4377_v62, %v4345_v58  ;;  %5035 = vmatmul.msk.bf16.gmra.mxu2 %vm3702_vm12, %v4133_v26  ;;  %v3822_v46 = vpop.f32.mrf.mxu3  ;;  %v4046_v30 = vmul.f32 %v7928_v49, %v3999_v3  ;;  %v4008_v62 = vpop.f32.mrf.mxu1 }
 0x372   : > { %v4441_v48 = vmax.f32 %v4409_v60, 0.0  ;;  %v4082_v32 = vadd.f32 %v7946_v52, %v4046_v30 }
 0x373   : > { %v4248_v17 = vpop.f32.mrf.mxu2  ;;  %v3911_v53 = vpop.f32.mrf.mxu0 }
 0x374   : > { %4473 = vst [vmem:[%s7656_s11 + $0x70] sm:$0xff] %v4441_v48  ;;  %v4310_v16 = vmul.f32 %v7904_v63, %v4248_v17  ;;  %v3912_v6 = vadd.f32 %v3911_v53, %v3822_v46  ;;  %v4114_v8 = vmax.f32 %v4082_v32, 0.0 }
 0x376   : > { %v4346_v0 = vadd.f32 %v7910_v51, %v4310_v16  ;;  %v4001_v41 = vadd.f32 %v4000_v2, %v3912_v6 }
 0x378   : > { %v4410_v20 = vadd.f32 %v4378_v31, %v4346_v0  ;;  %v4047_v4 = vmul.f32 %v7928_v49, %v4001_v41  ;;  %v3825_v35 = vpop.f32.mrf.mxu3  ;;  %v4010_v25 = vpop.f32.mrf.mxu1 }
 0x37a   : > { %v4442_v38 = vmax.f32 %v4410_v20, 0.0  ;;  %v4083_v59 = vadd.f32 %v7946_v52, %v4047_v4 }
 0x37c   : > { %4474 = vst [vmem:[%s7656_s11 + $0x78] sm:$0xff] %v4442_v38  ;;  %v4115_v5 = vmax.f32 %v4083_v59, 0.0 }
 0x37e   : > { %v4134_v54 = vpack.c.bf16 %v4115_v5, %v4114_v8  ;;  %v377_v8 = vld [vmem:[%s5504_s30 + $0x48] sm:$0xff]  }
 0x380   : > { %5036 = vmatmul.msk.bf16.gmra.mxu2 %vm3702_vm12, %v4134_v54  ;;  %v3827_v47 = vpop.f32.mrf.mxu3  ;;  %v4013_v30 = vpop.f32.mrf.mxu1 }
 0x384   : > { %v3914_v24 = vpop.f32.mrf.mxu0 }
 0x385   : > { %v3915_v28 = vadd.f32 %v3914_v24, %v3825_v35 }
 0x387   : > { %v4004_v50 = vadd.f32 %v4003_v55, %v3915_v28  ;;  %v4381_v28 = vunpack.c.l.bf16 %v377_v8 }
 0x388   : > { %v4015_v59 = vpop.f32.mrf.mxu1 }
 0x389   : > { %v4251_v15 = vpop.f32.mrf.mxu2  ;;  %v4048_v61 = vmul.f32 %v7928_v49, %v4004_v50 }
 0x38a   : > { %v4311_v37 = vmul.f32 %v7904_v63, %v4251_v15 }
 0x38b   : > { %v4084_v44 = vadd.f32 %v7946_v52, %v4048_v61 }
 0x38c   : > { %v3916_v7 = vpop.f32.mrf.mxu0  ;;  %v4347_v12 = vadd.f32 %v7910_v51, %v4311_v37 }
 0x38d   : > { %v3917_v57 = vadd.f32 %v3916_v7, %v3827_v47  ;;  %v4116_v34 = vmax.f32 %v4084_v44, 0.0 }
 0x38e   : > { %v4411_v45 = vadd.f32 %v4379_v9, %v4347_v12 }
 0x38f   : > { %v4006_v21 = vadd.f32 %v4005_v14, %v3917_v57 }
 0x390   : > { %v4443_v18 = vmax.f32 %v4411_v45, 0.0  ;;  %v379_v45 = vld [vmem:[%s5504_s30 + $0x50] sm:$0xff]  }
 0x391   : > { %v4049_v19 = vmul.f32 %v7928_v49, %v4006_v21  ;;  %v4253_v13 = vpop.f32.mrf.mxu2 }
 0x392   : > { %4475 = vst [vmem:[%s7656_s11 + $0x80] sm:$0xff] %v4443_v18  ;;  %v4312_v36 = vmul.f32 %v7904_v63, %v4253_v13  ;;  %v4383_v18 = vunpack.c.l.bf16 %v379_v45 }
 0x393   : > { %v4085_v10 = vadd.f32 %v7946_v52, %v4049_v19 }
 0x394   : > { %v4348_v23 = vadd.f32 %v7910_v51, %v4312_v36 }
 0x395   : > { %v4117_v1 = vmax.f32 %v4085_v10, 0.0 }
 0x396   : > { %v4412_v40 = vadd.f32 %v4380_v33, %v4348_v23 }
 0x397   : > { %v4135_v27 = vpack.c.bf16 %v4117_v1, %v4116_v34  ;;  %v4384_v34 = vunpack.c.h.bf16 %v379_v45 }
 0x398   : > { %v4444_v56 = vmax.f32 %v4412_v40, 0.0  ;;  %v381_v40 = vld [vmem:[%s5504_s30 + $0x58] sm:$0xff]  }
 0x399   : > { %5037 = vmatmul.msk.bf16.gmra.mxu2 %vm3702_vm12, %v4135_v27  ;;  %v3830_v43 = vpop.f32.mrf.mxu3 }
 0x39a   : > { %4476 = vst [vmem:[%s7656_s11 + $0x88] sm:$0xff] %v4444_v56 }
 0x39e   : > { %v3919_v22 = vpop.f32.mrf.mxu0 }
 0x39f   : > { %v3920_v39 = vadd.f32 %v3919_v22, %v3830_v43 }
 0x3a1   : > { %v4009_v11 = vadd.f32 %v4008_v62, %v3920_v39  ;;  %v3832_v42 = vpop.f32.mrf.mxu3  ;;  %v4385_v62 = vunpack.c.l.bf16 %v381_v40 }
 0x3a3   : > { %v4050_v60 = vmul.f32 %v7928_v49, %v4009_v11 }
 0x3a5   : > { %v4086_v48 = vadd.f32 %v7946_v52, %v4050_v60 }
 0x3a6   : > { %v3921_v58 = vpop.f32.mrf.mxu0 }
 0x3a7   : > { %v3922_v26 = vadd.f32 %v3921_v58, %v3832_v42  ;;  %v4118_v46 = vmax.f32 %v4086_v48, 0.0  ;;  %v4386_v58 = vunpack.c.h.bf16 %v381_v40 }
 0x3a9   : > { %v4011_v3 = vadd.f32 %v4010_v25, %v3922_v26  ;;  %v3835_v31 = vpop.f32.mrf.mxu3 }
 0x3ab   : > { %v4051_v17 = vmul.f32 %v7928_v49, %v4011_v3  ;;  %v383_v3 = vld [vmem:[%s5504_s30 + $0x60] sm:$0xff]  }
 0x3ad   : > { %v4087_v16 = vadd.f32 %v7946_v52, %v4051_v17 }
 0x3af   : > { %v4119_v53 = vmax.f32 %v4087_v16, 0.0 }
 0x3b0   : > { %v3924_v6 = vpop.f32.mrf.mxu0 }
 0x3b1   : > { %v3925_v0 = vadd.f32 %v3924_v6, %v3835_v31  ;;  %v4136_v2 = vpack.c.bf16 %v4119_v53, %v4118_v46  ;;  %v3837_v20 = vpop.f32.mrf.mxu3  ;;  %v4387_v31 = vunpack.c.l.bf16 %v383_v3 }
 0x3b3   : > { %5038 = vmatmul.msk.bf16.gmra.mxu2 %vm3702_vm12, %v4136_v2  ;;  %v4014_v41 = vadd.f32 %v4013_v30, %v3925_v0  ;;  %v4388_v2 = vunpack.c.h.bf16 %v383_v3 }
 0x3b5   : > { %v4052_v4 = vmul.f32 %v7928_v49, %v4014_v41 }
 0x3b7   : > { %v4088_v35 = vadd.f32 %v7946_v52, %v4052_v4  ;;  %v385_v4 = vld [vmem:[%s5504_s30 + $0x68] sm:$0xff]  }
 0x3b8   : > { %v3926_v32 = vpop.f32.mrf.mxu0 }
 0x3b9   : > { %v3927_v38 = vadd.f32 %v3926_v32, %v3837_v20  ;;  %v4120_v15 = vmax.f32 %v4088_v35, 0.0 }
 0x3ba   : > { %v4256_v54 = vpop.f32.mrf.mxu2 }
 0x3bb   : > { %v4016_v5 = vadd.f32 %v4015_v59, %v3927_v38  ;;  %v4313_v24 = vmul.f32 %v7904_v63, %v4256_v54 }
 0x3bd   : > { %v4053_v55 = vmul.f32 %v7928_v49, %v4016_v5  ;;  %v4349_v50 = vadd.f32 %v7910_v51, %v4313_v24  ;;  %v4382_v49 = vunpack.c.h.bf16 %v377_v8  ;;  %v4389_v8 = vunpack.c.l.bf16 %v385_v4 }
 0x3bf   : > { %v4089_v29 = vadd.f32 %v7946_v52, %v4053_v55  ;;  %v4413_v9 = vadd.f32 %v4381_v28, %v4349_v50  ;;  %v4390_v28 = vunpack.c.h.bf16 %v385_v4 }
 0x3c1   : > { %v4121_v37 = vmax.f32 %v4089_v29, 0.0  ;;  %v4445_v47 = vmax.f32 %v4413_v9, 0.0 }
 0x3c2   : > { %v4258_v61 = vpop.f32.mrf.mxu2 }
 0x3c3   : > { %v4137_v7 = vpack.c.bf16 %v4121_v37, %v4120_v15  ;;  %4477 = vst [vmem:[%s7656_s11 + $0x90] sm:$0xff] %v4445_v47  ;;  %v4314_v12 = vmul.f32 %v7904_v63, %v4258_v61  ;;  %v387_v37 = vld [vmem:[%s5504_s30 + $0x70] sm:$0xff]  }
 0x3c5   : > { %5039 = vmatmul.msk.bf16.gmra.mxu2 %vm3702_vm12, %v4137_v7  ;;  %v4350_v57 = vadd.f32 %v7910_v51, %v4314_v12  ;;  %v4391_v7 = vunpack.c.l.bf16 %v387_v37 }
 0x3c7   : > { %v4414_v14 = vadd.f32 %v4382_v49, %v4350_v57 }
 0x3c9   : > { %v4446_v52 = vmax.f32 %v4414_v14, 0.0 }
 0x3cb   : > { %4478 = vst [vmem:[%s7656_s11 + $0x98] sm:$0xff] %v4446_v52  ;;  %v4392_v52 = vunpack.c.h.bf16 %v387_v37 }
 0x3e3   : > { %v4261_v21 = vpop.f32.mrf.mxu2 }
 0x3e4   : > { %v4315_v44 = vmul.f32 %v7904_v63, %v4261_v21 }
 0x3e6   : > { %v4351_v19 = vadd.f32 %v7910_v51, %v4315_v44 }
 0x3e8   : > { %v4415_v13 = vadd.f32 %v4383_v18, %v4351_v19  ;;  %v389_v18 = vld [vmem:[%s5504_s30 + $0x78] sm:$0xff]   ;;  %s4504_s30 = sshll.u32 %s7656_s11, 4  ;;  %s4505_s30 = int_to_ptr.vmem [resolvable:$true] %s4504_s30 }
 0x3e9   : > { %v4394_v40 = vunpack.c.h.bf16 %v389_v18 }
 0x3ea   : > { %v4447_v10 = vmax.f32 %v4415_v13, 0.0 }
 0x3eb   : > { %v4263_v36 = vpop.f32.mrf.mxu2 }
 0x3ec   : > { %4479 = vst [vmem:[%s7656_s11 + $0xa0] sm:$0xff] %v4447_v10  ;;  %v4316_v33 = vmul.f32 %v7904_v63, %v4263_v36  ;;  %v4393_v10 = vunpack.c.l.bf16 %v389_v18 }
 0x3ee   : > { %v4352_v1 = vadd.f32 %v7910_v51, %v4316_v33 }
 0x3f0   : > { %v4416_v23 = vadd.f32 %v4384_v34, %v4352_v1 }
 0x3f2   : > { %v4448_v27 = vmax.f32 %v4416_v23, 0.0 }
 0x3f3   : > { %v4266_v56 = vpop.f32.mrf.mxu2 }
 0x3f4   : > { %4480 = vst [vmem:[%s7656_s11 + $0xa8] sm:$0xff] %v4448_v27  ;;  %v4317_v43 = vmul.f32 %v7904_v63, %v4266_v56 }
 0x3f6   : > { %v4353_v22 = vadd.f32 %v7910_v51, %v4317_v43 }
 0x3f8   : > { %v4417_v39 = vadd.f32 %v4385_v62, %v4353_v22 }
 0x3fa   : > { %v4449_v11 = vmax.f32 %v4417_v39, 0.0 }
 0x3fb   : > { %v4268_v42 = vpop.f32.mrf.mxu2 }
 0x3fc   : > { %4481 = vst [vmem:[%s7656_s11 + $0xb0] sm:$0xff] %v4449_v11  ;;  %v4318_v25 = vmul.f32 %v7904_v63, %v4268_v42 }
 0x3fe   : > { %v4354_v60 = vadd.f32 %v7910_v51, %v4318_v25 }
 0x400   : > { %v4418_v26 = vadd.f32 %v4386_v58, %v4354_v60 }
 0x402   : > { %v4450_v48 = vmax.f32 %v4418_v26, 0.0 }
 0x403   : > { %v4271_v17 = vpop.f32.mrf.mxu2 }
 0x404   : > { %4482 = vst [vmem:[%s7656_s11 + $0xb8] sm:$0xff] %v4450_v48  ;;  %v4319_v16 = vmul.f32 %v7904_v63, %v4271_v17 }
 0x406   : > { %v4355_v46 = vadd.f32 %v7910_v51, %v4319_v16 }
 0x408   : > { %v4419_v53 = vadd.f32 %v4387_v31, %v4355_v46 }
 0x40a   : > { %v4451_v30 = vmax.f32 %v4419_v53, 0.0 }
 0x40b   : > { %v4273_v6 = vpop.f32.mrf.mxu2 }
 0x40c   : > { %4483 = vst [vmem:[%s7656_s11 + $0xc0] sm:$0xff] %v4451_v30  ;;  %v4320_v0 = vmul.f32 %v7904_v63, %v4273_v6 }
 0x40e   : > { %v4356_v41 = vadd.f32 %v7910_v51, %v4320_v0 }
 0x410   : > { %v4420_v20 = vadd.f32 %v4388_v2, %v4356_v41 }
 0x412   : > { %v4452_v32 = vmax.f32 %v4420_v20, 0.0 }
 0x414   : > { %4484 = vst [vmem:[%s7656_s11 + $0xc8] sm:$0xff] %v4452_v32 }
 0x41c   : > { %v4276_v38 = vpop.f32.mrf.mxu2 }
 0x41d   : > { %v4321_v59 = vmul.f32 %v7904_v63, %v4276_v38 }
 0x41f   : > { %v4357_v5 = vadd.f32 %v7910_v51, %v4321_v59 }
 0x421   : > { %v4421_v54 = vadd.f32 %v4389_v8, %v4357_v5 }
 0x423   : > { %v4453_v35 = vmax.f32 %v4421_v54, 0.0 }
 0x424   : > { %v4278_v55 = vpop.f32.mrf.mxu2 }
 0x425   : > { %4485 = vst [vmem:[%s7656_s11 + $0xd0] sm:$0xff] %v4453_v35  ;;  %v4322_v24 = vmul.f32 %v7904_v63, %v4278_v55 }
 0x427   : > { %v4358_v29 = vadd.f32 %v7910_v51, %v4322_v24 }
 0x429   : > { %v4422_v50 = vadd.f32 %v4390_v28, %v4358_v29 }
 0x42b   : > { %v4454_v15 = vmax.f32 %v4422_v50, 0.0 }
 0x42d   : > { %4486 = vst [vmem:[%s7656_s11 + $0xd8] sm:$0xff] %v4454_v15 }
 0x436   : > { %v4281_v9 = vpop.f32.mrf.mxu2 }
 0x437   : > { %v4323_v47 = vmul.f32 %v7904_v63, %v4281_v9 }
 0x439   : > { %v4359_v61 = vadd.f32 %v7910_v51, %v4323_v47 }
 0x43b   : > { %v4423_v12 = vadd.f32 %v4391_v7, %v4359_v61 }
 0x43d   : > { %v4455_v49 = vmax.f32 %v4423_v12, 0.0 }
 0x43e   : > { %v4283_v57 = vpop.f32.mrf.mxu2 }
 0x43f   : > { %4487 = vst [vmem:[%s7656_s11 + $0xe0] sm:$0xff] %v4455_v49  ;;  %v4324_v14 = vmul.f32 %v7904_v63, %v4283_v57 }
 0x441   : > { %v4360_v45 = vadd.f32 %v7910_v51, %v4324_v14 }
 0x443   : > { %v4424_v21 = vadd.f32 %v4392_v52, %v4360_v45 }
 0x445   : > { %v4456_v44 = vmax.f32 %v4424_v21, 0.0 }
 0x447   : > { %4488 = vst [vmem:[%s7656_s11 + $0xe8] sm:$0xff] %v4456_v44 }
 0x448   : > { %v4286_v19 = vpop.f32.mrf.mxu2 }
 0x449   : > { %v4325_v13 = vmul.f32 %v7904_v63, %v4286_v19 }
 0x44b   : > { %v4361_v36 = vadd.f32 %v7910_v51, %v4325_v13 }
 0x44d   : > { %v4425_v33 = vadd.f32 %v4393_v10, %v4361_v36 }
 0x44f   : > { %v4457_v34 = vmax.f32 %v4425_v33, 0.0 }
 0x450   : > { %v4288_v1 = vpop.f32.mrf.mxu2 }
 0x451   : > { %4489 = vst [vmem:[%s7656_s11 + $0xf0] sm:$0xff] %v4457_v34  ;;  %v4326_v23 = vmul.f32 %v7904_v63, %v4288_v1 }
 0x453   : > { %v4362_v27 = vadd.f32 %v7910_v51, %v4326_v23 }
 0x455   : > { %v4426_v56 = vadd.f32 %v4394_v40, %v4362_v27 }
 0x457   : > { %v4458_v43 = vmax.f32 %v4426_v56, 0.0 }
 0x459   : > { %4490 = vst [vmem:[%s7656_s11 + $0xf8] sm:$0xff] %v4458_v43 }
 0x45a   : > { %5265 = shalt.err (!%p5262_p3)
}
 0x45b   : > { %s5306_s20 = smov 128   ;;  %s5307_s11 = smov 8  }
 0x45c   : > { %5179 = dma.vmem_to_hbm [thread:$0]  (%p5401_p5), %s4505_s30, 4096, %s4507_s25, %s4492_s17, %s5306_s20, %s5306_s20, %s5307_s11  }
 0x45d PF: > { %p5185_p4 = scmp.ge.s32.totalorder %s5300_s16, 2  ;;  %s4521_s28 = sand.u32 1, %s5288_s13  }
 0x45e   : > { %s4522_s29 = scalar_lea.sflag [#allocation4], %s4521_s28 }
 0x45f   : > { %p5182_p7 = pnand %p5185_p4, %p5405_p6 }
 0x461   : > { %p5183_p8 = pneg %p5182_p7 }
 0x463   : > { %5283 = dma.done.wait (%p5183_p8), %s4522_s29, 4096  }
 0x464   : > { %5285 = vsyncadd (%p5183_p8), %s4522_s29, 4294963200  ;;  %p20_p9 = scmp.ge.s32.totalorder %s5388_s19, 4   ;;  %s8286_s13 = smov %s5292_s14 }
 0x465   : > { %s8287_s14 = smov %s5296_s15  ;;  %s8288_s15 = smov %s5399_s22 }
 0x466   : > { %s8289_s16 = smov %s5388_s19  ;;  %22 = sbr.rel (!%p20_p9) target bundleno = 3 (0x3), region = 97 }
 0x46b   :  { %4528 = vsyncpa [#allocation4], 1 }
 0x46c   :  { %4530 = vsyncpa [#allocation4 + $0x1], 1 }

</bundles_post_ra>
